<compile_context>
chip_gen: v7x
topology: tpu7x:2x2x1
jax: 0.10.0
libtpu: 0.0.40
codegen_flags: <defaults>
</compile_context>

<pallas_src>
import jax
import jax.numpy as jnp
from jax.experimental import pallas as pl
from jax.experimental.pallas import tpu as pltpu

D_IN = 1000
D_H1 = 1000
D_H2 = 100
D_OUT = 1
BN_EPS = 1e-5

# Padded (lane-dense) dims.
PAD_IN = 1024
PAD_H1 = 1024
PAD_H2 = 128
PAD_OUT = 128


def _round_up(x, m):
    return (x + m - 1) // m * m


def _ahp_kernel(x_ref,
                s1_ref, c1_ref,
                w1_ref, b1_ref,
                w2_ref, b2_ref,
                w3_ref, b3_ref,
                out_ref):
    # ---- bn1 (affine) -> relu -> (dropout=id), f32 math, bf16 for the MXU ----
    x = x_ref[...].astype(jnp.float32)
    h = jnp.maximum(x * s1_ref[...] + c1_ref[...], 0.0).astype(jnp.bfloat16)

    # ---- fc1 (BN2 folded into weights/bias) -> relu ----
    h = jnp.dot(h, w1_ref[...], preferred_element_type=jnp.float32) + b1_ref[...]
    h = jnp.maximum(h, 0.0).astype(jnp.bfloat16)

    # ---- fc2 (BN3 folded into weights/bias) -> relu ----
    h = jnp.dot(h, w2_ref[...], preferred_element_type=jnp.float32) + b2_ref[...]
    h = jnp.maximum(h, 0.0).astype(jnp.bfloat16)

    # ---- fc3: padded (128,128) weight; lanes 0 and 1 both hold the real
    #      output column, lanes >=2 are zero ----
    pre = jnp.dot(h, w3_ref[...], preferred_element_type=jnp.float32) + b3_ref[...]

    # sigmoid: exp + approximate reciprocal both ride the EUP slot.
    sig = pl.reciprocal(1.0 + jnp.exp(-pre), approx=True)

    # Lane-dense output slab: lane 0 = pre, lane 1 = sigmoid(pre), rest = 0.
    lane = jax.lax.broadcasted_iota(jnp.int32, pre.shape, 1)
    out_ref[...] = jnp.where(lane == 1, sig, pre)


def _fold_bn(gamma, beta, mean, var, eps=BN_EPS):
    scale = gamma / jnp.sqrt(var + eps)
    bias = beta - mean * scale
    return scale.astype(jnp.float32), bias.astype(jnp.float32)


def _prep_params(params):
    """Fold BNs, transpose / pad / cast weights for the kernel."""
    s1, c1 = _fold_bn(*params["bn1"])
    s2, c2 = _fold_bn(*params["bn2"])
    s3, c3 = _fold_bn(*params["bn3"])

    # Linear weights stored as (in, out) so the hot path is `act @ W`.
    w1 = params["fc1_w"].T.astype(jnp.float32)      # (1000, 1000)
    w2 = params["fc2_w"].T.astype(jnp.float32)      # (1000, 100)
    w3 = params["fc3_w"].T.astype(jnp.float32)      # (100, 1)

    # Fold the post-linear BatchNorms into the preceding Linear.
    w1f = w1 * s2[None, :]
    b1f = params["fc1_b"].astype(jnp.float32) * s2 + c2
    w2f = w2 * s3[None, :]
    b2f = params["fc2_b"].astype(jnp.float32) * s3 + c3
    b3 = params["fc3_b"].astype(jnp.float32)

    def pad2(a, r, c):
        return jnp.pad(a, ((0, r - a.shape[0]), (0, c - a.shape[1])))

    def pad1(a, c):
        return jnp.pad(a, (0, c - a.shape[0]))

    s1p = pad1(s1, PAD_IN).reshape(1, PAD_IN)
    c1p = pad1(c1, PAD_IN).reshape(1, PAD_IN)
    w1p = pad2(w1f, PAD_IN, PAD_H1).astype(jnp.bfloat16)
    b1p = pad1(b1f, PAD_H1).reshape(1, PAD_H1)
    w2p = pad2(w2f, PAD_H1, PAD_H2).astype(jnp.bfloat16)
    b2p = pad1(b2f, PAD_H2).reshape(1, PAD_H2)

    # fc3: duplicate the single real column into lanes 0 and 1 so the kernel
    # can emit one lane-dense (TILE, 128) output holding [pre | sig | 0...].
    w3p = jnp.zeros((PAD_H2, PAD_OUT), jnp.float32)
    w3p = w3p.at[:D_H2, 0].set(w3[:, 0]).at[:D_H2, 1].set(w3[:, 0])
    w3p = w3p.astype(jnp.bfloat16)
    b3p = jnp.zeros((1, PAD_OUT), jnp.float32).at[0, 0].set(b3[0]).at[0, 1].set(b3[0])

    return s1p, c1p, w1p, b1p, w2p, b2p, w3p, b3p


def ahp_forward(x, params, *, tile_n=512):
    """x: (N, 1000) float32. Returns (sigmoid(pre), pre), both (N, 1)."""
    n = x.shape[0]
    tile = min(tile_n, _round_up(max(n, 8), 8))
    n_pad = _round_up(n, tile)

    # bf16 input halves the dominant HBM->VMEM stream; pad batch + feature dims.
    xp = jnp.pad(x.astype(jnp.bfloat16), ((0, n_pad - n), (0, PAD_IN - D_IN)))

    s1p, c1p, w1p, b1p, w2p, b2p, w3p, b3p = _prep_params(params)

    const = lambda i: (0, 0)   # weights/scales stay VMEM-resident across the grid
    out = pl.pallas_call(
        _ahp_kernel,
        out_shape=jax.ShapeDtypeStruct((n_pad, PAD_OUT), jnp.float32),
        grid=(n_pad // tile,),
        in_specs=[
            pl.BlockSpec((tile, PAD_IN), lambda i: (i, 0)),   # x tile
            pl.BlockSpec((1, PAD_IN), const),                 # s1
            pl.BlockSpec((1, PAD_IN), const),                 # c1
            pl.BlockSpec((PAD_IN, PAD_H1), const),            # w1 (BN2 folded)
            pl.BlockSpec((1, PAD_H1), const),                 # b1
            pl.BlockSpec((PAD_H1, PAD_H2), const),            # w2 (BN3 folded)
            pl.BlockSpec((1, PAD_H2), const),                 # b2
            pl.BlockSpec((PAD_H2, PAD_OUT), const),           # w3 (lane-padded)
            pl.BlockSpec((1, PAD_OUT), const),                # b3
        ],
        out_specs=pl.BlockSpec((tile, PAD_OUT), lambda i: (i, 0)),
        compiler_params=pltpu.CompilerParams(
            dimension_semantics=("parallel",)),
    )(xp, s1p, c1p, w1p, b1p, w2p, b2p, w3p, b3p)

    pre = out[:n, 0:1]
    sig = out[:n, 1:2]
    return sig, pre


def init_params(key):
    """Deterministic parameter init matching the shapes in __init__."""
    ks = jax.random.split(key, 6)

    def lin(kw, kb, fan_in, fan_out):
        bound = 1.0 / jnp.sqrt(fan_in)
        w = jax.random.uniform(kw, (fan_out, fan_in), jnp.float32, -bound, bound)
        b = jax.random.uniform(kb, (fan_out,), jnp.float32, -bound, bound)
        return w, b

    fc1_w, fc1_b = lin(ks[0], ks[1], D_IN, D_H1)
    fc2_w, fc2_b = lin(ks[2], ks[3], D_H1, D_H2)
    fc3_w, fc3_b = lin(ks[4], ks[5], D_H2, D_OUT)

    def bn(dim):
        # PyTorch BatchNorm1d defaults: gamma=1, beta=0, running_mean=0, running_var=1
        return (jnp.ones((dim,), jnp.float32), jnp.zeros((dim,), jnp.float32),
                jnp.zeros((dim,), jnp.float32), jnp.ones((dim,), jnp.float32))

    return {
        "bn1": bn(D_IN), "bn2": bn(D_H1), "bn3": bn(D_H2),
        "fc1_w": fc1_w, "fc1_b": fc1_b,
        "fc2_w": fc2_w, "fc2_b": fc2_b,
        "fc3_w": fc3_w, "fc3_b": fc3_b,
    }


def _reference(x, params):
    """Pure-JAX f32 reference of the eval-mode PyTorch forward."""
    s1, c1 = _fold_bn(*params["bn1"])
    s2, c2 = _fold_bn(*params["bn2"])
    s3, c3 = _fold_bn(*params["bn3"])
    h = jnp.maximum(x * s1 + c1, 0.0)
    h = h @ params["fc1_w"].T + params["fc1_b"]
    h = jnp.maximum(h * s2 + c2, 0.0)
    h = h @ params["fc2_w"].T + params["fc2_b"]
    h = jnp.maximum(h * s3 + c3, 0.0)
    pre = h @ params["fc3_w"].T + params["fc3_b"]
    return jax.nn.sigmoid(pre), pre


if __name__ == "__main__":
    key = jax.random.PRNGKey(0)
    kx, kp = jax.random.split(key)

    batch = 8
    x = jax.random.normal(kx, (batch, D_IN), jnp.float32)
    params = init_params(kp)

    sig, pre = ahp_forward(x, params)
    sig, pre = jax.block_until_ready(sig), jax.block_until_ready(pre)

    ref_sig, ref_pre = _reference(x, params)
    assert sig.shape == (batch, 1) and pre.shape == (batch, 1)
    # bf16 matmuls (f32 accumulation) + approx reciprocal -> looser tolerance.
    assert jnp.allclose(pre, ref_pre, atol=5e-2, rtol=5e-2)
    assert jnp.allclose(sig, ref_sig, atol=2e-2, rtol=2e-2)

    print("KERNEL_OK")
</pallas_src>

<mosaic_0001>
module attributes {stable_mosaic.version = 11 : i64} {
  func.func @_ahp_kernel(%arg0: i32, %arg1: memref<8x1024xbf16, #tpu.memory_space<vmem>>, %arg2: memref<1x1024xf32, #tpu.memory_space<vmem>>, %arg3: memref<1x1024xf32, #tpu.memory_space<vmem>>, %arg4: memref<1024x1024xbf16, #tpu.memory_space<vmem>>, %arg5: memref<1x1024xf32, #tpu.memory_space<vmem>>, %arg6: memref<1024x128xbf16, #tpu.memory_space<vmem>>, %arg7: memref<1x128xf32, #tpu.memory_space<vmem>>, %arg8: memref<128x128xbf16, #tpu.memory_space<vmem>>, %arg9: memref<1x128xf32, #tpu.memory_space<vmem>>, %arg10: memref<8x128xf32, #tpu.memory_space<vmem>>) attributes {dimension_semantics = [#tpu.dimension_semantics<parallel>], iteration_bounds = array<i64: 1>, scalar_prefetch = 0 : i64, scratch_operands = 0 : i64, tpu.core_type = #tpu.core_type<tc>, window_params = [{transform_indices = @transform_0, window_bounds = array<i64: 8, 1024>}, {pipeline_mode = #tpu.pipeline_mode<synchronous>, transform_indices = @transform_1, window_bounds = array<i64: 1, 1024>}, {pipeline_mode = #tpu.pipeline_mode<synchronous>, transform_indices = @transform_2, window_bounds = array<i64: 1, 1024>}, {pipeline_mode = #tpu.pipeline_mode<synchronous>, transform_indices = @transform_3, window_bounds = array<i64: 1024, 1024>}, {pipeline_mode = #tpu.pipeline_mode<synchronous>, transform_indices = @transform_4, window_bounds = array<i64: 1, 1024>}, {pipeline_mode = #tpu.pipeline_mode<synchronous>, transform_indices = @transform_5, window_bounds = array<i64: 1024, 128>}, {pipeline_mode = #tpu.pipeline_mode<synchronous>, transform_indices = @transform_6, window_bounds = array<i64: 1, 128>}, {pipeline_mode = #tpu.pipeline_mode<synchronous>, transform_indices = @transform_7, window_bounds = array<i64: 128, 128>}, {pipeline_mode = #tpu.pipeline_mode<synchronous>, transform_indices = @transform_8, window_bounds = array<i64: 1, 128>}, {transform_indices = @transform_9, window_bounds = array<i64: 8, 128>}]} {
    %c0 = arith.constant 0 : index
    %c0_0 = arith.constant 0 : index
    %0 = vector.load %arg1[%c0, %c0_0] : memref<8x1024xbf16, #tpu.memory_space<vmem>>, vector<8x1024xbf16>
    %1 = arith.extf %0 : vector<8x1024xbf16> to vector<8x1024xf32>
    %c0_1 = arith.constant 0 : index
    %c0_2 = arith.constant 0 : index
    %2 = vector.load %arg2[%c0_1, %c0_2] : memref<1x1024xf32, #tpu.memory_space<vmem>>, vector<1x1024xf32>
    %3 = vector.broadcast %2 : vector<1x1024xf32> to vector<8x1024xf32>
    %4 = arith.mulf %1, %3 : vector<8x1024xf32>
    %c0_3 = arith.constant 0 : index
    %c0_4 = arith.constant 0 : index
    %5 = vector.load %arg3[%c0_3, %c0_4] : memref<1x1024xf32, #tpu.memory_space<vmem>>, vector<1x1024xf32>
    %6 = vector.broadcast %5 : vector<1x1024xf32> to vector<8x1024xf32>
    %7 = arith.addf %4, %6 : vector<8x1024xf32>
    %cst = arith.constant 0.000000e+00 : f32
    %8 = vector.broadcast %cst : f32 to vector<8x1024xf32>
    %9 = arith.maximumf %7, %8 : vector<8x1024xf32>
    %10 = arith.truncf %9 : vector<8x1024xf32> to vector<8x1024xbf16>
    %c0_5 = arith.constant 0 : index
    %c0_6 = arith.constant 0 : index
    %11 = vector.load %arg4[%c0_5, %c0_6] : memref<1024x1024xbf16, #tpu.memory_space<vmem>>, vector<1024x1024xbf16>
    %cst_7 = arith.constant dense<0.000000e+00> : vector<8x1024xf32>
    %12 = tpu.matmul %10, %11, %cst_7 {dimension_numbers = #tpu.dot_dimension_numbers<[1], [0], [0], [1], [0, 0, 1, 1], [], []>} : vector<8x1024xbf16>, vector<1024x1024xbf16>, vector<8x1024xf32> -> vector<8x1024xf32>
    %c0_8 = arith.constant 0 : index
    %c0_9 = arith.constant 0 : index
    %13 = vector.load %arg5[%c0_8, %c0_9] : memref<1x1024xf32, #tpu.memory_space<vmem>>, vector<1x1024xf32>
    %14 = vector.broadcast %13 : vector<1x1024xf32> to vector<8x1024xf32>
    %15 = arith.addf %12, %14 : vector<8x1024xf32>
    %cst_10 = arith.constant 0.000000e+00 : f32
    %16 = vector.broadcast %cst_10 : f32 to vector<8x1024xf32>
    %17 = arith.maximumf %15, %16 : vector<8x1024xf32>
    %18 = arith.truncf %17 : vector<8x1024xf32> to vector<8x1024xbf16>
    %c0_11 = arith.constant 0 : index
    %c0_12 = arith.constant 0 : index
    %19 = vector.load %arg6[%c0_11, %c0_12] : memref<1024x128xbf16, #tpu.memory_space<vmem>>, vector<1024x128xbf16>
    %cst_13 = arith.constant dense<0.000000e+00> : vector<8x128xf32>
    %20 = tpu.matmul %18, %19, %cst_13 {dimension_numbers = #tpu.dot_dimension_numbers<[1], [0], [0], [1], [0, 0, 1, 1], [], []>} : vector<8x1024xbf16>, vector<1024x128xbf16>, vector<8x128xf32> -> vector<8x128xf32>
    %c0_14 = arith.constant 0 : index
    %c0_15 = arith.constant 0 : index
    %21 = vector.load %arg7[%c0_14, %c0_15] : memref<1x128xf32, #tpu.memory_space<vmem>>, vector<1x128xf32>
    %22 = vector.broadcast %21 : vector<1x128xf32> to vector<8x128xf32>
    %23 = arith.addf %20, %22 : vector<8x128xf32>
    %cst_16 = arith.constant 0.000000e+00 : f32
    %24 = vector.broadcast %cst_16 : f32 to vector<8x128xf32>
    %25 = arith.maximumf %23, %24 : vector<8x128xf32>
    %26 = arith.truncf %25 : vector<8x128xf32> to vector<8x128xbf16>
    %c0_17 = arith.constant 0 : index
    %c0_18 = arith.constant 0 : index
    %27 = vector.load %arg8[%c0_17, %c0_18] : memref<128x128xbf16, #tpu.memory_space<vmem>>, vector<128x128xbf16>
    %cst_19 = arith.constant dense<0.000000e+00> : vector<8x128xf32>
    %28 = tpu.matmul %26, %27, %cst_19 {dimension_numbers = #tpu.dot_dimension_numbers<[1], [0], [0], [1], [0, 0, 1, 1], [], []>} : vector<8x128xbf16>, vector<128x128xbf16>, vector<8x128xf32> -> vector<8x128xf32>
    %c0_20 = arith.constant 0 : index
    %c0_21 = arith.constant 0 : index
    %29 = vector.load %arg9[%c0_20, %c0_21] : memref<1x128xf32, #tpu.memory_space<vmem>>, vector<1x128xf32>
    %30 = vector.broadcast %29 : vector<1x128xf32> to vector<8x128xf32>
    %31 = arith.addf %28, %30 : vector<8x128xf32>
    %cst_22 = arith.constant 0.000000e+00 : f32
    %32 = vector.broadcast %cst_22 : f32 to vector<8x128xf32>
    %33 = arith.subf %32, %31 : vector<8x128xf32>
    %34 = math.exp %33 : vector<8x128xf32>
    %cst_23 = arith.constant 1.000000e+00 : f32
    %35 = vector.broadcast %cst_23 : f32 to vector<8x128xf32>
    %36 = arith.addf %35, %34 : vector<8x128xf32>
    %37 = tpu.reciprocal %36 {approx = true} : vector<8x128xf32> -> vector<8x128xf32>
    %38 = tpu.iota {dimensions = array<i32: 1>} : vector<8x128xi32>
    %c1_i32 = arith.constant 1 : i32
    %39 = vector.broadcast %c1_i32 : i32 to vector<8x128xi32>
    %40 = arith.cmpi eq, %38, %39 : vector<8x128xi32>
    %41 = arith.select %40, %37, %31 : vector<8x128xi1>, vector<8x128xf32>
    %c0_24 = arith.constant 0 : index
    %c0_25 = arith.constant 0 : index
    %42 = vector.load %arg10[%c0_24, %c0_25] : memref<8x128xf32, #tpu.memory_space<vmem>>, vector<8x128xf32>
    tpu.vector_store %arg10[%c0_24, %c0_25], %41 {strides = array<i32>} : memref<8x128xf32, #tpu.memory_space<vmem>>, vector<8x128xf32>,
    return
  }
  func.func @transform_0(%arg0: i32) -> (i32, i32) {
    %c0_i32 = arith.constant 0 : i32
    %c0_i32_0 = arith.constant 0 : i32
    return %arg0, %c0_i32 : i32, i32
  }
  func.func @transform_1(%arg0: i32) -> (i32, i32) {
    %c0_i32 = arith.constant 0 : i32
    %c0_i32_0 = arith.constant 0 : i32
    %c0_i32_1 = arith.constant 0 : i32
    return %c0_i32, %c0_i32_0 : i32, i32
  }
  func.func @transform_2(%arg0: i32) -> (i32, i32) {
    %c0_i32 = arith.constant 0 : i32
    %c0_i32_0 = arith.constant 0 : i32
    %c0_i32_1 = arith.constant 0 : i32
    return %c0_i32, %c0_i32_0 : i32, i32
  }
  func.func @transform_3(%arg0: i32) -> (i32, i32) {
    %c0_i32 = arith.constant 0 : i32
    %c0_i32_0 = arith.constant 0 : i32
    %c0_i32_1 = arith.constant 0 : i32
    return %c0_i32, %c0_i32_0 : i32, i32
  }
  func.func @transform_4(%arg0: i32) -> (i32, i32) {
    %c0_i32 = arith.constant 0 : i32
    %c0_i32_0 = arith.constant 0 : i32
    %c0_i32_1 = arith.constant 0 : i32
    return %c0_i32, %c0_i32_0 : i32, i32
  }
  func.func @transform_5(%arg0: i32) -> (i32, i32) {
    %c0_i32 = arith.constant 0 : i32
    %c0_i32_0 = arith.constant 0 : i32
    %c0_i32_1 = arith.constant 0 : i32
    return %c0_i32, %c0_i32_0 : i32, i32
  }
  func.func @transform_6(%arg0: i32) -> (i32, i32) {
    %c0_i32 = arith.constant 0 : i32
    %c0_i32_0 = arith.constant 0 : i32
    %c0_i32_1 = arith.constant 0 : i32
    return %c0_i32, %c0_i32_0 : i32, i32
  }
  func.func @transform_7(%arg0: i32) -> (i32, i32) {
    %c0_i32 = arith.constant 0 : i32
    %c0_i32_0 = arith.constant 0 : i32
    %c0_i32_1 = arith.constant 0 : i32
    return %c0_i32, %c0_i32_0 : i32, i32
  }
  func.func @transform_8(%arg0: i32) -> (i32, i32) {
    %c0_i32 = arith.constant 0 : i32
    %c0_i32_0 = arith.constant 0 : i32
    %c0_i32_1 = arith.constant 0 : i32
    return %c0_i32, %c0_i32_0 : i32, i32
  }
  func.func @transform_9(%arg0: i32) -> (i32, i32) {
    %c0_i32 = arith.constant 0 : i32
    %c0_i32_0 = arith.constant 0 : i32
    return %arg0, %c0_i32 : i32, i32
  }
}

</mosaic_0001>

<bundles_post_ra>
// kernel: tpu_custom_call.1
= control target key start
LH: loop header
LB: loop body
LE: loop exit
PB: predicated region body
PF: predicated region fallthrough
CT: control target
= control target key end

     0   :  { %14 = vsyncpa [#allocation3], 0  ;;  %s6328_s0 = inlined_call_operand.hbm [shape: bf16[8,1024], index: 0, kind: input, shape index: {}]   ;;  %s6329_s1 = inlined_call_operand.hbm [shape: f32[1,1024], index: 1, kind: input, shape index: {}]   ;;  %s6330_s2 = inlined_call_operand.hbm [shape: f32[1,1024], index: 2, kind: input, shape index: {}]   ;;  %s6331_s3 = inlined_call_operand.hbm [shape: bf16[1024,1024], index: 3, kind: input, shape index: {}]   ;;  %s6332_s4 = inlined_call_operand.hbm [shape: f32[1,1024], index: 4, kind: input, shape index: {}]   ;;  %s6333_s5 = inlined_call_operand.hbm [shape: bf16[1024,128], index: 5, kind: input, shape index: {}]   ;;  %s6334_s6 = inlined_call_operand.hbm [shape: f32[1,128], index: 6, kind: input, shape index: {}]   ;;  %s6335_s7 = inlined_call_operand.hbm [shape: bf16[128,128], index: 7, kind: input, shape index: {}]   ;;  %s6336_s8 = inlined_call_operand.hbm [shape: f32[1,128], index: 8, kind: input, shape index: {}]   ;;  %s6337_s9 = inlined_call_operand.hbm [shape: f32[8,128], index: 9, kind: output, shape index: {}]  }
   0x1   :  { %15 = vsyncpa [#allocation6], 0 }
   0x2   :  { %16 = vsyncpa [#allocation9], 0 }
   0x3   :  { %17 = vsyncpa [#allocation12], 0 }
   0x4   :  { %18 = vsyncpa [#allocation15], 0 }
   0x5   :  { %19 = vsyncpa [#allocation4], 0  ;;  %s5964_s30 = smov [#allocation5]   ;;  %s5965_s11 = smov [#allocation8]  }
   0x6   :  { %s36_s10 = sshll.u32 %s5964_s30, 4  ;;  %s55_s12 = sshll.u32 %s5965_s11, 4  ;;  %s37_s10 = int_to_ptr.vmem [resolvable:$true] %s36_s10  ;;  %s6030_s12 = int_to_ptr.vmem [resolvable:$true] %s55_s12 }
   0x7   :  { %s5732_s15 = scalar_lea.hbm %s6329_s1, 128 }
   0x8   :  { %p5733_p0 = scmp.ne.s32.totalorder %s6329_s1, %s5732_s15  ;;  %p5736_p1 = scmp.lt.u32.totalorder %s5732_s15, %s6329_s1 }
   0xa   :  { %p5738_p2 = pnand %p5736_p1, %p5733_p0 }
   0xc   :  { %5741 = shalt.err (!%p5738_p2)
}
   0xd   :  { %s5742_s20 = scalar_lea.vmem %s37_s10, 128  ;;  %p5747_p4 = scmp.lt.s32.totalorder %s37_s10, %s37_s10 }
   0xe   :  { %p5743_p3 = scmp.ne.s32.totalorder %s37_s10, %s5742_s20  ;;  %p5748_p5 = scmp.lt.s32.totalorder %s5742_s20, %s5742_s20 }
  0x10   :  { %p5749_p6 = por %p5748_p5, %p5747_p4 }
  0x12   :  { %p5750_p7 = pnand %p5749_p6, %p5743_p3 }
  0x14   :  { %5753 = shalt.err (!%p5750_p7)
}
  0x15   :  { %39 = dma.hbm_to_vmem [thread:$0]  %s6329_s1, 128, %s37_s10, [#allocation6]  }
  0x16   :  { %s5754_s25 = scalar_lea.hbm %s6331_s3, 65536 }
  0x17   :  { %p5755_p8 = scmp.ne.s32.totalorder %s6331_s3, %s5754_s25  ;;  %p5758_p9 = scmp.lt.u32.totalorder %s5754_s25, %s6331_s3 }
  0x19   :  { %p5760_p10 = pnand %p5758_p9, %p5755_p8 }
  0x1b   :  { %5763 = shalt.err (!%p5760_p10)
}
  0x1c   :  { %s5764_s30 = scalar_lea.vmem %s6030_s12, 65536  ;;  %p5769_p12 = scmp.lt.s32.totalorder %s6030_s12, %s6030_s12 }
  0x1d   :  { %p5765_p11 = scmp.ne.s32.totalorder %s6030_s12, %s5764_s30  ;;  %p5770_p13 = scmp.lt.s32.totalorder %s5764_s30, %s5764_s30 }
  0x1f   :  { %p5771_p0 = por %p5770_p13, %p5769_p12 }
  0x21   :  { %p5772_p1 = pnand %p5771_p0, %p5765_p11 }
  0x23   :  { %5775 = shalt.err (!%p5772_p1)
}
  0x24   :  { %s5966_s1 = smov 512   ;;  %s5967_s10 = smov 32  }
  0x25   :  { %61 = dma.hbm_to_vmem [thread:$0]  %s6331_s3, 65536, %s6030_s12, [#allocation9], %s5966_s1, %s5966_s1, %s5967_s10  }
  0x26   :  { %s5968_s14 = smov [#allocation11]   ;;  %s5776_s18 = scalar_lea.hbm %s6333_s5, 8192 }
  0x27   :  { %s77_s15 = sshll.u32 %s5968_s14, 4  ;;  %p5777_p2 = scmp.ne.s32.totalorder %s6333_s5, %s5776_s18  ;;  %s78_s15 = int_to_ptr.vmem [resolvable:$true] %s77_s15 }
  0x28   :  { %p5780_p3 = scmp.lt.u32.totalorder %s5776_s18, %s6333_s5 }
  0x2a   :  { %p5782_p4 = pnand %p5780_p3, %p5777_p2 }
  0x2c   :  { %5785 = shalt.err (!%p5782_p4)
}
  0x2d   :  { %s5786_s23 = scalar_lea.vmem %s78_s15, 8192  ;;  %p5791_p6 = scmp.lt.s32.totalorder %s78_s15, %s78_s15 }
  0x2e   :  { %p5787_p5 = scmp.ne.s32.totalorder %s78_s15, %s5786_s23  ;;  %p5792_p7 = scmp.lt.s32.totalorder %s5786_s23, %s5786_s23 }
  0x30   :  { %p5793_p8 = por %p5792_p7, %p5791_p6 }
  0x32   :  { %p5794_p9 = pnand %p5793_p8, %p5787_p5 }
  0x34   :  { %5797 = shalt.err (!%p5794_p9)
}
  0x35   :  { %s5969_s3 = smov 64   ;;  %s5970_s12 = smov 4  }
  0x36   :  { %83 = dma.hbm_to_vmem [thread:$0]  %s6333_s5, 8192, %s78_s15, [#allocation12], %s5969_s3, %s5969_s3, %s5970_s12  }
  0x37   :  { %s5971_s26 = smov [#allocation14]   ;;  %s5972_s28 = smov [#allocation2]  }
  0x38   :  { %s99_s27 = sshll.u32 %s5971_s26, 4  ;;  %s26_s29 = sshll.u32 %s5972_s28, 4  ;;  %s100_s27 = int_to_ptr.vmem [resolvable:$true] %s99_s27  ;;  %s27_s29 = int_to_ptr.vmem [resolvable:$true] %s26_s29 }
  0x39   :  { %s5798_s10 = scalar_lea.hbm %s6335_s7, 1024 }
  0x3a   :  { %p5799_p10 = scmp.ne.s32.totalorder %s6335_s7, %s5798_s10  ;;  %p5802_p11 = scmp.lt.u32.totalorder %s5798_s10, %s6335_s7 }
  0x3c   :  { %p5804_p12 = pnand %p5802_p11, %p5799_p10 }
  0x3e   :  { %5807 = shalt.err (!%p5804_p12)
}
  0x3f   :  { %s5808_s5 = scalar_lea.vmem %s100_s27, 1024  ;;  %p5813_p0 = scmp.lt.s32.totalorder %s100_s27, %s100_s27 }
  0x40   :  { %p5809_p13 = scmp.ne.s32.totalorder %s100_s27, %s5808_s5  ;;  %p5814_p1 = scmp.lt.s32.totalorder %s5808_s5, %s5808_s5 }
  0x42   :  { %p5815_p2 = por %p5814_p1, %p5813_p0 }
  0x44   :  { %p5816_p3 = pnand %p5815_p2, %p5809_p13 }
  0x46   :  { %5819 = shalt.err (!%p5816_p3)
}
  0x47   :  { %105 = dma.hbm_to_vmem [thread:$0]  %s6335_s7, 1024, %s100_s27, [#allocation15], %s5969_s3, %s5969_s3, %s5970_s12  }
  0x48   :  { %s5820_s20 = scalar_lea.hbm %s6328_s0, 512 }
  0x49   :  { %p5821_p4 = scmp.ne.s32.totalorder %s6328_s0, %s5820_s20  ;;  %p5824_p5 = scmp.lt.u32.totalorder %s5820_s20, %s6328_s0 }
  0x4b   :  { %p5826_p6 = pnand %p5824_p5, %p5821_p4 }
  0x4d   :  { %5829 = shalt.err (!%p5826_p6)
}
  0x4e   :  { %s5830_s25 = scalar_lea.vmem %s27_s29, 512  ;;  %p5835_p8 = scmp.lt.s32.totalorder %s27_s29, %s27_s29 }
  0x4f   :  { %p5831_p7 = scmp.ne.s32.totalorder %s27_s29, %s5830_s25  ;;  %p5836_p9 = scmp.lt.s32.totalorder %s5830_s25, %s5830_s25 }
  0x51   :  { %p5837_p10 = por %p5836_p9, %p5835_p8 }
  0x53   :  { %p5838_p11 = pnand %p5837_p10, %p5831_p7 }
  0x55   :  { %5841 = shalt.err (!%p5838_p11)
}
  0x56   :  { %29 = dma.hbm_to_vmem [thread:$0]  %s6328_s0, 512, %s27_s29, [#allocation3]  }
  0x57   :  { %s5973_s12 = smov [#allocation7]   ;;  %s5974_s27 = smov [#allocation10]  }
  0x58   :  { %s46_s26 = sshll.u32 %s5973_s12, 4  ;;  %s68_s28 = sshll.u32 %s5974_s27, 4  ;;  %s47_s26 = int_to_ptr.vmem [resolvable:$true] %s46_s26  ;;  %s69_s28 = int_to_ptr.vmem [resolvable:$true] %s68_s28 }
  0x59   :  { %s5842_s10 = scalar_lea.hbm %s6330_s2, 128 }
  0x5a   :  { %p5843_p12 = scmp.ne.s32.totalorder %s6330_s2, %s5842_s10  ;;  %p5846_p13 = scmp.lt.u32.totalorder %s5842_s10, %s6330_s2 }
  0x5c   :  { %p5848_p0 = pnand %p5846_p13, %p5843_p12 }
  0x5e   :  { %5851 = shalt.err (!%p5848_p0)
}
  0x5f   :  { %s5852_s0 = scalar_lea.vmem %s47_s26, 128  ;;  %p5857_p2 = scmp.lt.s32.totalorder %s47_s26, %s47_s26 }
  0x60   :  { %p5853_p1 = scmp.ne.s32.totalorder %s47_s26, %s5852_s0  ;;  %p5858_p3 = scmp.lt.s32.totalorder %s5852_s0, %s5852_s0 }
  0x62   :  { %p5859_p4 = por %p5858_p3, %p5857_p2 }
  0x64   :  { %p5860_p5 = pnand %p5859_p4, %p5853_p1 }
  0x66   :  { %5863 = shalt.err (!%p5860_p5)
}
  0x67   :  { %49 = dma.hbm_to_vmem [thread:$0]  %s6330_s2, 128, %s47_s26, [#allocation6]  }
  0x68   :  { %s5864_s18 = scalar_lea.hbm %s6332_s4, 128 }
  0x69   :  { %p5865_p6 = scmp.ne.s32.totalorder %s6332_s4, %s5864_s18  ;;  %p5868_p7 = scmp.lt.u32.totalorder %s5864_s18, %s6332_s4 }
  0x6b   :  { %p5870_p8 = pnand %p5868_p7, %p5865_p6 }
  0x6d   :  { %5873 = shalt.err (!%p5870_p8)
}
  0x6e   :  { %s5874_s23 = scalar_lea.vmem %s69_s28, 128  ;;  %p5879_p10 = scmp.lt.s32.totalorder %s69_s28, %s69_s28 }
  0x6f   :  { %p5875_p9 = scmp.ne.s32.totalorder %s69_s28, %s5874_s23  ;;  %p5880_p11 = scmp.lt.s32.totalorder %s5874_s23, %s5874_s23 }
  0x71   :  { %p5881_p12 = por %p5880_p11, %p5879_p10 }
  0x73   :  { %p5882_p13 = pnand %p5881_p12, %p5875_p9 }
  0x75   :  { %5885 = shalt.err (!%p5882_p13)
}
  0x76   :  { %71 = dma.hbm_to_vmem [thread:$0]  %s6332_s4, 128, %s69_s28, [#allocation9]  }
  0x77   :  { %s5975_s25 = smov [#allocation13]   ;;  %s5976_s3 = smov [#allocation16]  }
  0x78   :  { %s90_s7 = sshll.u32 %s5975_s25, 4  ;;  %s112_s12 = sshll.u32 %s5976_s3, 4  ;;  %s91_s7 = int_to_ptr.vmem [resolvable:$true] %s90_s7  ;;  %s113_s12 = int_to_ptr.vmem [resolvable:$true] %s112_s12 }
  0x79   :  { %s5886_s30 = scalar_lea.hbm %s6334_s6, 16 }
  0x7a   :  { %p5887_p0 = scmp.ne.s32.totalorder %s6334_s6, %s5886_s30  ;;  %p5890_p1 = scmp.lt.u32.totalorder %s5886_s30, %s6334_s6 }
  0x7c   :  { %p5892_p2 = pnand %p5890_p1, %p5887_p0 }
  0x7e   :  { %5895 = shalt.err (!%p5892_p2)
}
  0x7f   :  { %s5896_s4 = scalar_lea.vmem %s91_s7, 16  ;;  %s5900_s28 = scalar_lea.vmem %s91_s7, 32 }
  0x80   :  { %p5897_p3 = scmp.ne.s32.totalorder %s91_s7, %s5896_s4  ;;  %p5901_p4 = scmp.lt.s32.totalorder %s91_s7, %s91_s7 }
  0x81   :  { %p5902_p5 = scmp.lt.s32.totalorder %s5900_s28, %s5896_s4 }
  0x83   :  { %p5903_p6 = por %p5902_p5, %p5901_p4 }
  0x85   :  { %p5904_p7 = pnand %p5903_p6, %p5897_p3 }
  0x87   :  { %5907 = shalt.err (!%p5904_p7)
}
  0x88   :  { %93 = dma.hbm_to_vmem [thread:$0]  %s6334_s6, 16, %s91_s7, [#allocation12]  }
  0x89   :  { %s5908_s5 = scalar_lea.hbm %s6336_s8, 16 }
  0x8a   :  { %p5909_p8 = scmp.ne.s32.totalorder %s6336_s8, %s5908_s5  ;;  %p5912_p9 = scmp.lt.u32.totalorder %s5908_s5, %s6336_s8 }
  0x8c   :  { %p5914_p10 = pnand %p5912_p9, %p5909_p8 }
  0x8e   :  { %5917 = shalt.err (!%p5914_p10)
}
  0x8f   :  { %s5918_s20 = scalar_lea.vmem %s113_s12, 16  ;;  %s5922_s21 = scalar_lea.vmem %s113_s12, 32 }
  0x90   :  { %p5919_p11 = scmp.ne.s32.totalorder %s113_s12, %s5918_s20  ;;  %p5923_p12 = scmp.lt.s32.totalorder %s113_s12, %s113_s12 }
  0x91   :  { %p5924_p13 = scmp.lt.s32.totalorder %s5922_s21, %s5918_s20 }
  0x93   :  { %p5925_p0 = por %p5924_p13, %p5923_p12 }
  0x95   :  { %p5926_p1 = pnand %p5925_p0, %p5919_p11 }
  0x97   :  { %5929 = shalt.err (!%p5926_p1)
}
  0x98   :  { %115 = dma.hbm_to_vmem [thread:$0]  %s6336_s8, 16, %s113_s12, [#allocation15]  }
  0x99   :  { %5952 = dma.done.wait [#allocation3], 512  }
  0x9a   :  { %5953 = vsyncadd [#allocation3], 4294966784 }
  0x9b   :  { %5954 = dma.done.wait [#allocation6], 256  }
  0x9c   :  { %5955 = vsyncadd [#allocation6], 4294967040 }
  0x9d   :  { %5956 = dma.done.wait [#allocation9], 65664  }
  0x9e   :  { %5957 = vsyncadd [#allocation9], 4294901632 }
  0x9f   :  { %5958 = dma.done.wait [#allocation12], 8208  }
  0xa0   :  { %5959 = vsyncadd [#allocation12], 4294959088 }
  0xa1   :  { %5960 = dma.done.wait [#allocation15], 1040  }
  0xa2   :  { %5961 = vsyncadd [#allocation15], 4294966256  ;;  %v272_v0 = vld [vmem:[#allocation8] sm:$0xff]  ;;  %v273_v2 = vld [vmem:[#allocation8 + $0x8] sm:$0xff]  ;;  %v158_v32 = vlaneseq  ;;  %vm5978_vm0 = vmmov 0   ;;  %s5979_s8 = smov [#allocation17]  }
  0xa3   :  { %v276_v1 = vld [vmem:[#allocation8 + $0x20] sm:$0xff]  ;;  %v277_v4 = vld [vmem:[#allocation8 + $0x28] sm:$0xff]  ;;  %v6151_v56 = vld [vmem:[#allocation2] sm:$0xff]  ;;  %s4866_s23 = sshll.u32 %s5979_s8, 4  ;;  %s4867_s23 = int_to_ptr.vmem [resolvable:$true] %s4866_s23 }
  0xa4   :  { %v4880_v3 = vcombine.high %v272_v0, %v276_v1  ;;  %v4879_v5 = vcombine.low %v272_v0, %v276_v1  ;;  %v280_v6 = vld [vmem:[#allocation8 + $0x40] sm:$0xff]  ;;  %v4882_v8 = vcombine.high %v273_v2, %v277_v4  ;;  %v4881_v9 = vcombine.low %v273_v2, %v277_v4  ;;  %v281_v11 = vld [vmem:[#allocation8 + $0x48] sm:$0xff]  ;;  %v6153_v57 = vld [vmem:[#allocation5] sm:$0xff]  ;;  %s5930_s2 = scalar_lea.vmem %s4867_s23, 128  ;;  %p5935_p3 = scmp.lt.s32.totalorder %s4867_s23, %s4867_s23 }
  0xa5   :  { %v284_v7 = vld [vmem:[#allocation8 + $0x60] sm:$0xff]  ;;  %v285_v12 = vld [vmem:[#allocation8 + $0x68] sm:$0xff]  ;;  %v6146_v41 = vshrl.u32 %v158_v32, 7  ;;  %v149_v61 = vunpack.c.h.bf16 %v6151_v56  ;;  %v6158_v63 = vld [vmem:[#allocation7] sm:$0xff]  ;;  %p5931_p2 = scmp.ne.s32.totalorder %s4867_s23, %s5930_s2  ;;  %p5936_p4 = scmp.lt.s32.totalorder %s5930_s2, %s5930_s2 }
  0xa6   :  { %v4888_v10 = vcombine.high %v280_v6, %v284_v7  ;;  %v288_v13 = vld [vmem:[#allocation8 + $0x80] sm:$0xff]  ;;  %3386 = vmatprep.subr.bf16.mxu0 %v4880_v3  ;;  %v4890_v14 = vcombine.high %v281_v11, %v285_v12  ;;  %v289_v16 = vld [vmem:[#allocation8 + $0x88] sm:$0xff]  ;;  %3550 = vmatprep.subr.bf16.mxu1 %v4882_v8  ;;  %v4887_v18 = vcombine.low %v280_v6, %v284_v7 }
  0xa7   :  { %v292_v15 = vld [vmem:[#allocation8 + $0xa0] sm:$0xff]  ;;  %v293_v17 = vld [vmem:[#allocation8 + $0xa8] sm:$0xff]  ;;  %3387 = vmatpush1.bf16.msra.mxu0 %v4879_v5  ;;  %3551 = vmatpush1.bf16.msra.mxu1 %v4881_v9  ;;  %v4889_v19 = vcombine.low %v281_v11, %v285_v12  ;;  %v6149_v50 = vsub.s32 1, %v6146_v41  ;;  %p5937_p5 = por %p5936_p4, %p5935_p3 }
  0xa8   :  { %3388 = vmatprep.subr.bf16.mxu0 %v4888_v10  ;;  %v4896_v20 = vcombine.high %v288_v13, %v292_v15  ;;  %3552 = vmatprep.subr.bf16.mxu1 %v4890_v14  ;;  %v4898_v21 = vcombine.high %v289_v16, %v293_v17  ;;  %v296_v22 = vld [vmem:[#allocation8 + $0xc0] sm:$0xff]  ;;  %v297_v24 = vld [vmem:[#allocation8 + $0xc8] sm:$0xff]  ;;  %v4895_v26 = vcombine.low %v288_v13, %v292_v15 }
  0xa9   :  { %v300_v23 = vld [vmem:[#allocation8 + $0xe0] sm:$0xff]  ;;  %v301_v25 = vld [vmem:[#allocation8 + $0xe8] sm:$0xff]  ;;  %v4897_v27 = vcombine.low %v289_v16, %v293_v17  ;;  %v165_v62 = vrot.slane %v6153_v57, %v6149_v50  ;;  %v215_v2 = vrot.slane %v6158_v63, %v6149_v50  ;;  %p5938_p6 = pnand %p5937_p5, %p5931_p2 }
  0xaa   :  { %v4904_v28 = vcombine.high %v296_v22, %v300_v23  ;;  %v4906_v29 = vcombine.high %v297_v24, %v301_v25  ;;  %v304_v30 = vld [vmem:[#allocation8 + $0x100] sm:$0xff]  ;;  %v305_v33 = vld [vmem:[#allocation8 + $0x108] sm:$0xff]  ;;  %v4903_v35 = vcombine.low %v296_v22, %v300_v23  ;;  %v4905_v36 = vcombine.low %v297_v24, %v301_v25 }
  0xab   :  { %3389 = vmatpush1.bf16.msra.mxu0 %v4887_v18  ;;  %3553 = vmatpush1.bf16.msra.mxu1 %v4889_v19  ;;  %v308_v31 = vld [vmem:[#allocation8 + $0x120] sm:$0xff]  ;;  %v309_v34 = vld [vmem:[#allocation8 + $0x128] sm:$0xff]  ;;  %v199_v4 = vmul.f32 %v165_v62, %v149_v61  ;;  %v148_v62 = vunpack.c.l.bf16 %v6151_v56 }
  0xac   :  { %3390 = vmatprep.subr.bf16.mxu0 %v4896_v20  ;;  %3554 = vmatprep.subr.bf16.mxu1 %v4898_v21  ;;  %v4912_v37 = vcombine.high %v304_v30, %v308_v31  ;;  %v4914_v38 = vcombine.high %v305_v33, %v309_v34  ;;  %v312_v39 = vld [vmem:[#allocation8 + $0x140] sm:$0xff]  ;;  %v313_v42 = vld [vmem:[#allocation8 + $0x148] sm:$0xff]  ;;  %v4911_v44 = vcombine.low %v304_v30, %v308_v31 }
  0xad   :  { %v316_v40 = vld [vmem:[#allocation8 + $0x160] sm:$0xff]  ;;  %v317_v43 = vld [vmem:[#allocation8 + $0x168] sm:$0xff]  ;;  %v4913_v45 = vcombine.low %v305_v33, %v309_v34  ;;  %v249_v10 = vadd.f32 %v215_v2, %v199_v4 }
  0xae   :  { %v4920_v46 = vcombine.high %v312_v39, %v316_v40  ;;  %v4922_v47 = vcombine.high %v313_v42, %v317_v43  ;;  %v320_v48 = vld [vmem:[#allocation8 + $0x180] sm:$0xff]  ;;  %v321_v51 = vld [vmem:[#allocation8 + $0x188] sm:$0xff]  ;;  %v4919_v53 = vcombine.low %v312_v39, %v316_v40  ;;  %v4921_v54 = vcombine.low %v313_v42, %v317_v43 }
  0xaf   :  { %3391 = vmatpush1.bf16.msra.mxu0 %v4895_v26  ;;  %3555 = vmatpush1.bf16.msra.mxu1 %v4897_v27  ;;  %v324_v49 = vld [vmem:[#allocation8 + $0x1a0] sm:$0xff]  ;;  %v325_v52 = vld [vmem:[#allocation8 + $0x1a8] sm:$0xff]  ;;  %v257_v14 = vmax.f32 %v249_v10, 0.0 }
  0xb0   :  { %3392 = vmatprep.subr.bf16.mxu0 %v4904_v28  ;;  %3556 = vmatprep.subr.bf16.mxu1 %v4906_v29  ;;  %v4928_v55 = vcombine.high %v320_v48, %v324_v49  ;;  %v4930_v58 = vcombine.high %v321_v51, %v325_v52  ;;  %v328_v59 = vld [vmem:[#allocation8 + $0x1c0] sm:$0xff]  ;;  %v329_v0 = vld [vmem:[#allocation8 + $0x1c8] sm:$0xff]  ;;  %v4927_v3 = vcombine.low %v320_v48, %v324_v49  ;;  %v6167_v49 = vsub.s32 0, %v6146_v41 }
  0xb1   :  { %v332_v60 = vld [vmem:[#allocation8 + $0x1e0] sm:$0xff]  ;;  %v333_v1 = vld [vmem:[#allocation8 + $0x1e8] sm:$0xff]  ;;  %v4929_v5 = vcombine.low %v321_v51, %v325_v52  ;;  %v6162_v20 = vpack.c.bf16 %v257_v14, %v257_v14 }
  0xb2   :  { %v4936_v6 = vcombine.high %v328_v59, %v332_v60  ;;  %v4938_v7 = vcombine.high %v329_v0, %v333_v1  ;;  %v336_v8 = vld [vmem:[#allocation8 + $0x200] sm:$0xff]  ;;  %v337_v11 = vld [vmem:[#allocation8 + $0x208] sm:$0xff]  ;;  %v4935_v13 = vcombine.low %v328_v59, %v332_v60  ;;  %v4937_v15 = vcombine.low %v329_v0, %v333_v1  ;;  %v6175_v1 = vld [vmem:[#allocation2 + $0x8] sm:$0xff] }
  0xb3   :  { %3393 = vmatpush1.bf16.msra.mxu0 %v4903_v35  ;;  %3557 = vmatpush1.bf16.msra.mxu1 %v4905_v36  ;;  %v340_v9 = vld [vmem:[#allocation8 + $0x220] sm:$0xff]  ;;  %v341_v12 = vld [vmem:[#allocation8 + $0x228] sm:$0xff]  ;;  %v6170_v59 = vsub.s32 3, %v6146_v41  ;;  %v161_v0 = vrot.slane %v6153_v57, %v6167_v49 }
  0xb4   :  { %3394 = vmatprep.subr.bf16.mxu0 %v4912_v37  ;;  %3558 = vmatprep.subr.bf16.mxu1 %v4914_v38  ;;  %v4944_v16 = vcombine.high %v336_v8, %v340_v9  ;;  %v4946_v17 = vcombine.high %v337_v11, %v341_v12  ;;  %v344_v18 = vld [vmem:[#allocation8 + $0x240] sm:$0xff]  ;;  %v345_v21 = vld [vmem:[#allocation8 + $0x248] sm:$0xff]  ;;  %v4943_v23 = vcombine.low %v336_v8, %v340_v9  ;;  %v151_v8 = vunpack.c.h.bf16 %v6175_v1 }
  0xb5   :  { %v348_v19 = vld [vmem:[#allocation8 + $0x260] sm:$0xff]  ;;  %v349_v22 = vld [vmem:[#allocation8 + $0x268] sm:$0xff]  ;;  %3418 = vmatprep.mubr.bf16.mxu0 %v6162_v20  ;;  %v4945_v24 = vcombine.low %v337_v11, %v341_v12  ;;  %3582 = vmatprep.mubr.bf16.mxu1 %v6162_v20  ;;  %v173_v56 = vrot.slane %v6153_v57, %v6170_v59  ;;  %v198_v11 = vmul.f32 %v161_v0, %v148_v62 }
  0xb6   :  { %v4952_v25 = vcombine.high %v344_v18, %v348_v19  ;;  %v4954_v26 = vcombine.high %v345_v21, %v349_v22  ;;  %v352_v27 = vld [vmem:[#allocation8 + $0x280] sm:$0xff]  ;;  %v353_v29 = vld [vmem:[#allocation8 + $0x288] sm:$0xff]  ;;  %v4951_v31 = vcombine.low %v344_v18, %v348_v19  ;;  %v4953_v33 = vcombine.low %v345_v21, %v349_v22 }
  0xb7   :  { %3395 = vmatpush1.bf16.msra.mxu0 %v4911_v44  ;;  %3559 = vmatpush1.bf16.msra.mxu1 %v4913_v45  ;;  %v356_v28 = vld [vmem:[#allocation8 + $0x2a0] sm:$0xff]  ;;  %v357_v30 = vld [vmem:[#allocation8 + $0x2a8] sm:$0xff]  ;;  %v211_v12 = vrot.slane %v6158_v63, %v6167_v49  ;;  %v201_v19 = vmul.f32 %v173_v56, %v151_v8  ;;  %v223_v21 = vrot.slane %v6158_v63, %v6170_v59 }
  0xb8   :  { %3396 = vmatprep.subr.bf16.mxu0 %v4920_v46  ;;  %3560 = vmatprep.subr.bf16.mxu1 %v4922_v47  ;;  %v4960_v34 = vcombine.high %v352_v27, %v356_v28  ;;  %v4962_v35 = vcombine.high %v353_v29, %v357_v30  ;;  %v360_v36 = vld [vmem:[#allocation8 + $0x2c0] sm:$0xff]  ;;  %v361_v38 = vld [vmem:[#allocation8 + $0x2c8] sm:$0xff]  ;;  %v4959_v40 = vcombine.low %v352_v27, %v356_v28 }
  0xb9   :  { %v364_v37 = vld [vmem:[#allocation8 + $0x2e0] sm:$0xff]  ;;  %v365_v39 = vld [vmem:[#allocation8 + $0x2e8] sm:$0xff]  ;;  %v4961_v42 = vcombine.low %v353_v29, %v357_v30 }
  0xba   :  { %v4968_v43 = vcombine.high %v360_v36, %v364_v37  ;;  %v4970_v44 = vcombine.high %v361_v38, %v365_v39  ;;  %v368_v45 = vld [vmem:[#allocation8 + $0x300] sm:$0xff]  ;;  %v369_v47 = vld [vmem:[#allocation8 + $0x308] sm:$0xff]  ;;  %v4967_v51 = vcombine.low %v360_v36, %v364_v37  ;;  %v4969_v52 = vcombine.low %v361_v38, %v365_v39 }
  0xbb   :  { %3397 = vmatpush1.bf16.msra.mxu0 %v4919_v53  ;;  %3561 = vmatpush1.bf16.msra.mxu1 %v4921_v54  ;;  %v372_v46 = vld [vmem:[#allocation8 + $0x320] sm:$0xff]  ;;  %v373_v48 = vld [vmem:[#allocation8 + $0x328] sm:$0xff] }
  0xbc   :  { %3398 = vmatprep.subr.bf16.mxu0 %v4928_v55  ;;  %3562 = vmatprep.subr.bf16.mxu1 %v4930_v58  ;;  %v4976_v53 = vcombine.high %v368_v45, %v372_v46  ;;  %v4978_v54 = vcombine.high %v369_v47, %v373_v48  ;;  %v376_v55 = vld [vmem:[#allocation8 + $0x340] sm:$0xff]  ;;  %v377_v60 = vld [vmem:[#allocation8 + $0x348] sm:$0xff]  ;;  %v4975_v2 = vcombine.low %v368_v45, %v372_v46 }
  0xbd   :  { %v380_v58 = vld [vmem:[#allocation8 + $0x360] sm:$0xff]  ;;  %v381_v61 = vld [vmem:[#allocation8 + $0x368] sm:$0xff] }
  0xbe   :  { %v4984_v4 = vcombine.high %v376_v55, %v380_v58  ;;  %v385_v9 = vld [vmem:[#allocation8 + $0x388] sm:$0xff]  ;;  %v4985_v14 = vcombine.low %v377_v60, %v381_v61  ;;  %v396_v18 = vld [vmem:[#allocation8 + $0x3e0] sm:$0xff] }
  0xbf   :  { %3399 = vmatpush1.bf16.msra.mxu0 %v4927_v3  ;;  %3563 = vmatpush1.bf16.msra.mxu1 %v4929_v5  ;;  %v4977_v3 = vcombine.low %v369_v47, %v373_v48  ;;  %v4986_v5 = vcombine.high %v377_v60, %v381_v61  ;;  %v389_v10 = vld [vmem:[#allocation8 + $0x3a8] sm:$0xff]  ;;  %v400_v29 = vld [vmem:[#allocation8 + $0x400] sm:$0xff] }
  0xc0   :  { %3400 = vmatprep.subr.bf16.mxu0 %v4936_v6  ;;  %3564 = vmatprep.subr.bf16.mxu1 %v4938_v7  ;;  %v384_v6 = vld [vmem:[#allocation8 + $0x380] sm:$0xff]  ;;  %v393_v22 = vld [vmem:[#allocation8 + $0x3c8] sm:$0xff] }
  0xc1   :  { %v388_v7 = vld [vmem:[#allocation8 + $0x3a0] sm:$0xff]  ;;  %v409_v45 = vld [vmem:[#allocation8 + $0x448] sm:$0xff] }
  0xc2   :  { %v404_v30 = vld [vmem:[#allocation8 + $0x420] sm:$0xff]  ;;  %v413_v46 = vld [vmem:[#allocation8 + $0x468] sm:$0xff] }
  0xc3   :  { %3401 = vmatpush1.bf16.msra.mxu0 %v4935_v13  ;;  %3565 = vmatpush1.bf16.msra.mxu1 %v4937_v15  ;;  %v4983_v13 = vcombine.low %v376_v55, %v380_v58  ;;  %v4992_v15 = vcombine.high %v384_v6, %v388_v7  ;;  %v5008_v38 = vcombine.high %v400_v29, %v404_v30  ;;  %v417_v55 = vld [vmem:[#allocation8 + $0x488] sm:$0xff] }
  0xc4   :  { %3402 = vmatprep.subr.bf16.mxu0 %v4944_v16  ;;  %3566 = vmatprep.subr.bf16.mxu1 %v4946_v17  ;;  %v4994_v16 = vcombine.high %v385_v9, %v389_v10  ;;  %v392_v17 = vld [vmem:[#allocation8 + $0x3c0] sm:$0xff]  ;;  %v5007_v47 = vcombine.low %v400_v29, %v404_v30  ;;  %v421_v58 = vld [vmem:[#allocation8 + $0x4a8] sm:$0xff]  ;;  %v5017_v62 = vcombine.low %v409_v45, %v413_v46 }
  0xc5   :  { %v5000_v27 = vcombine.high %v392_v17, %v396_v18  ;;  %v4999_v36 = vcombine.low %v392_v17, %v396_v18  ;;  %v5025_v8 = vcombine.low %v417_v55, %v421_v58  ;;  %v440_v17 = vld [vmem:[#allocation8 + $0x540] sm:$0xff]  ;;  %v453_v30 = vld [vmem:[#allocation8 + $0x5a8] sm:$0xff] }
  0xc6   :  { %v444_v18 = vld [vmem:[#allocation8 + $0x560] sm:$0xff] }
  0xc7   :  { %3403 = vmatpush1.bf16.msra.mxu0 %v4943_v23  ;;  %3567 = vmatpush1.bf16.msra.mxu1 %v4945_v24  ;;  %v397_v23 = vld [vmem:[#allocation8 + $0x3e8] sm:$0xff]  ;;  %v248_v24 = vadd.f32 %v211_v12, %v198_v11 }
  0xc8   :  { %3404 = vmatprep.subr.bf16.mxu0 %v4952_v25  ;;  %3568 = vmatprep.subr.bf16.mxu1 %v4954_v26  ;;  %v4991_v25 = vcombine.low %v384_v6, %v388_v7  ;;  %v4993_v26 = vcombine.low %v385_v9, %v389_v10  ;;  %v5002_v28 = vcombine.high %v393_v22, %v397_v23  ;;  %v429_v6 = vld [vmem:[#allocation8 + $0x4e8] sm:$0xff]  ;;  %v432_v9 = vld [vmem:[#allocation8 + $0x500] sm:$0xff] }
  0xc9   :  { %v5001_v37 = vcombine.low %v393_v22, %v397_v23  ;;  %v436_v10 = vld [vmem:[#allocation8 + $0x520] sm:$0xff]  ;;  %v433_v11 = vld [vmem:[#allocation8 + $0x508] sm:$0xff] }
  0xca   :  { %v445_v22 = vld [vmem:[#allocation8 + $0x568] sm:$0xff]  ;;  %v5039_v23 = vcombine.low %v432_v9, %v436_v10 }
  0xcb   :  { %3405 = vmatpush1.bf16.msra.mxu0 %v4951_v31  ;;  %3569 = vmatpush1.bf16.msra.mxu1 %v4953_v33  ;;  %v251_v31 = vadd.f32 %v223_v21, %v201_v19  ;;  %v401_v33 = vld [vmem:[#allocation8 + $0x408] sm:$0xff] }
  0xcc   :  { %3406 = vmatprep.subr.bf16.mxu0 %v4960_v34  ;;  %3570 = vmatprep.subr.bf16.mxu1 %v4962_v35  ;;  %v405_v34 = vld [vmem:[#allocation8 + $0x428] sm:$0xff]  ;;  %v256_v35 = vmax.f32 %v248_v24, 0.0 }
  0xcd   :  { %v5010_v39 = vcombine.high %v401_v33, %v405_v34  ;;  %v5009_v48 = vcombine.low %v401_v33, %v405_v34  ;;  %v441_v19 = vld [vmem:[#allocation8 + $0x548] sm:$0xff] }
  0xce   :  { %v5050_v29 = vcombine.high %v441_v19, %v445_v22  ;;  %v5049_v33 = vcombine.low %v441_v19, %v445_v22  ;;  %v500_v22 = vld [vmem:[#allocation8 + $0x720] sm:$0xff] }
  0xcf   :  { %3407 = vmatpush1.bf16.msra.mxu0 %v4959_v40  ;;  %3571 = vmatpush1.bf16.msra.mxu1 %v4961_v42  ;;  %v408_v40 = vld [vmem:[#allocation8 + $0x440] sm:$0xff] }
  0xd0   :  { %3408 = vmatprep.subr.bf16.mxu0 %v4968_v43  ;;  %3572 = vmatprep.subr.bf16.mxu1 %v4970_v44  ;;  %v412_v42 = vld [vmem:[#allocation8 + $0x460] sm:$0xff]  ;;  %v259_v43 = vmax.f32 %v251_v31, 0.0  ;;  %v6184_v44 = vpack.c.bf16 %v256_v35, %v256_v35  ;;  %v5047_v31 = vcombine.low %v440_v17, %v444_v18 }
  0xd1   :  { %v5015_v61 = vcombine.low %v408_v40, %v412_v42  ;;  %v456_v35 = vld [vmem:[#allocation8 + $0x5c0] sm:$0xff] }
  0xd2   :  { %v6186_v60 = vpack.c.bf16 %v259_v43, %v259_v43 }
  0xd3   :  { %3409 = vmatpush1.bf16.msra.mxu0 %v4967_v51  ;;  %3573 = vmatpush1.bf16.msra.mxu1 %v4969_v52  ;;  %v5016_v51 = vcombine.high %v408_v40, %v412_v42  ;;  %v416_v52 = vld [vmem:[#allocation8 + $0x480] sm:$0xff] }
  0xd4   :  { %3410 = vmatprep.subr.bf16.mxu0 %v4976_v53  ;;  %3574 = vmatprep.subr.bf16.mxu1 %v4978_v54  ;;  %v5018_v53 = vcombine.high %v409_v45, %v413_v46  ;;  %v420_v54 = vld [vmem:[#allocation8 + $0x4a0] sm:$0xff] }
  0xd5   :  { %v5024_v0 = vcombine.high %v416_v52, %v420_v54  ;;  %v5023_v7 = vcombine.low %v416_v52, %v420_v54  ;;  %v464_v45 = vld [vmem:[#allocation8 + $0x600] sm:$0xff] }
  0xd6   :  { %v468_v46 = vld [vmem:[#allocation8 + $0x620] sm:$0xff] }
  0xd7   :  { %3411 = vmatpush1.bf16.msra.mxu0 %v4975_v2  ;;  %3575 = vmatpush1.bf16.msra.mxu1 %v4977_v3  ;;  %v424_v2 = vld [vmem:[#allocation8 + $0x4c0] sm:$0xff]  ;;  %v5072_v54 = vcombine.high %v464_v45, %v468_v46 }
  0xd8   :  { %3412 = vmatprep.subr.bf16.mxu0 %v4984_v4  ;;  %3576 = vmatprep.subr.bf16.mxu1 %v4986_v5  ;;  %v428_v3 = vld [vmem:[#allocation8 + $0x4e0] sm:$0xff]  ;;  %v425_v4 = vld [vmem:[#allocation8 + $0x4c8] sm:$0xff]  ;;  %v5026_v5 = vcombine.high %v417_v55, %v421_v58 }
  0xd9   :  { %v5032_v56 = vcombine.high %v424_v2, %v428_v3  ;;  %v5034_v12 = vcombine.high %v425_v4, %v429_v6  ;;  %v472_v55 = vld [vmem:[#allocation8 + $0x640] sm:$0xff] }
  0xda   :  { %v476_v58 = vld [vmem:[#allocation8 + $0x660] sm:$0xff] }
  0xdb   :  { %3413 = vmatpush1.bf16.msra.mxu0 %v4983_v13  ;;  %3577 = vmatpush1.bf16.msra.mxu1 %v4985_v14  ;;  %v437_v13 = vld [vmem:[#allocation8 + $0x528] sm:$0xff]  ;;  %v5031_v14 = vcombine.low %v424_v2, %v428_v3  ;;  %v5071_v2 = vcombine.low %v464_v45, %v468_v46  ;;  %v512_v46 = vld [vmem:[#allocation8 + $0x780] sm:$0xff] }
  0xdc   :  { %3414 = vmatprep.subr.bf16.mxu0 %v4992_v15  ;;  %3578 = vmatprep.subr.bf16.mxu1 %v4994_v16  ;;  %v5033_v15 = vcombine.low %v425_v4, %v429_v6  ;;  %v5040_v16 = vcombine.high %v432_v9, %v436_v10  ;;  %v5042_v21 = vcombine.high %v433_v11, %v437_v13  ;;  %v484_v6 = vld [vmem:[#allocation8 + $0x6a0] sm:$0xff] }
  0xdd   :  { %v5041_v24 = vcombine.low %v433_v11, %v437_v13  ;;  %v5080_v4 = vcombine.high %v472_v55, %v476_v58  ;;  %v5079_v9 = vcombine.low %v472_v55, %v476_v58  ;;  %v492_v13 = vld [vmem:[#allocation8 + $0x6e0] sm:$0xff] }
  0xdf   :  { %3415 = vmatpush1.bf16.msra.mxu0 %v4991_v25  ;;  %3579 = vmatpush1.bf16.msra.mxu1 %v4993_v26  ;;  %v5048_v25 = vcombine.high %v440_v17, %v444_v18  ;;  %v448_v26 = vld [vmem:[#allocation8 + $0x580] sm:$0xff] }
  0xe0   :  { %3416 = vmatprep.subr.bf16.mxu0 %v5000_v27  ;;  %3580 = vmatprep.subr.bf16.mxu1 %v5002_v28  ;;  %v452_v27 = vld [vmem:[#allocation8 + $0x5a0] sm:$0xff]  ;;  %v449_v28 = vld [vmem:[#allocation8 + $0x588] sm:$0xff] }
  0xe1   :  { %v5056_v34 = vcombine.high %v448_v26, %v452_v27  ;;  %v5055_v40 = vcombine.low %v448_v26, %v452_v27  ;;  %v5057_v42 = vcombine.low %v449_v28, %v453_v30  ;;  %v6193_v26 = vsub.s32 2, %v6146_v41 }
  0xe3   :  { %3417 = vmatpush1.bf16.msra.mxu0 %v4999_v36  ;;  %3581 = vmatpush1.bf16.msra.mxu1 %v5001_v37  ;;  %v460_v36 = vld [vmem:[#allocation8 + $0x5e0] sm:$0xff]  ;;  %v457_v37 = vld [vmem:[#allocation8 + $0x5c8] sm:$0xff] }
  0xe4   :  { %3427 = vmatprep.subr.bf16.mxu0 %v5008_v38  ;;  %3591 = vmatprep.subr.bf16.mxu1 %v5010_v39  ;;  %v5058_v38 = vcombine.high %v449_v28, %v453_v30  ;;  %v461_v39 = vld [vmem:[#allocation8 + $0x5e8] sm:$0xff]  ;;  %v5064_v43 = vcombine.high %v456_v35, %v460_v36  ;;  %v5063_v52 = vcombine.low %v456_v35, %v460_v36  ;;  %v504_v28 = vld [vmem:[#allocation8 + $0x740] sm:$0xff]  ;;  %v150_v36 = vunpack.c.l.bf16 %v6175_v1 }
  0xe5   :  { %v517_v1 = vld [vmem:[#allocation8 + $0x7a8] sm:$0xff] }
  0xe6   :  { %3419 = vmatmul.mubr.bf16.vlgmr.msra.gmra.mrb[0].mxu0 %v6184_v44  ;;  %3583 = vmatmul.mubr.bf16.vlgmr.msra.gmra.mrb[0].mxu1 %v6184_v44 }
  0xe7   :  { %3428 = vmatpush1.bf16.msra.mxu0 %v5007_v47  ;;  %3592 = vmatpush1.bf16.msra.mxu1 %v5009_v48  ;;  %v465_v47 = vld [vmem:[#allocation8 + $0x608] sm:$0xff]  ;;  %v5066_v48 = vcombine.high %v457_v37, %v461_v39 }
  0xe8   :  { %3429 = vmatprep.subr.bf16.mxu0 %v5016_v51  ;;  %3593 = vmatprep.subr.bf16.mxu1 %v5018_v53  ;;  %v469_v51 = vld [vmem:[#allocation8 + $0x628] sm:$0xff]  ;;  %v5065_v53 = vcombine.low %v457_v37, %v461_v39  ;;  %v169_v37 = vrot.slane %v6153_v57, %v6193_v26  ;;  %v6201_v39 = vsub.s32 5, %v6146_v41 }
  0xe9   :  { %3459 = vmatprep.mubr.bf16.mxu0 %v6186_v60  ;;  %3623 = vmatprep.mubr.bf16.mxu1 %v6186_v60  ;;  %v5073_v3 = vcombine.low %v465_v47, %v469_v51 }
  0xeb   :  { %3430 = vmatpush1.bf16.msra.mxu0 %v5015_v61  ;;  %3594 = vmatpush1.bf16.msra.mxu1 %v5017_v62  ;;  %v473_v61 = vld [vmem:[#allocation8 + $0x648] sm:$0xff]  ;;  %v5074_v62 = vcombine.high %v465_v47, %v469_v51  ;;  %v516_v47 = vld [vmem:[#allocation8 + $0x7a0] sm:$0xff]  ;;  %v200_v51 = vmul.f32 %v169_v37, %v150_v36 }
  0xec   :  { %3431 = vmatprep.subr.bf16.mxu0 %v5024_v0  ;;  %3595 = vmatprep.subr.bf16.mxu1 %v5026_v5  ;;  %v477_v0 = vld [vmem:[#allocation8 + $0x668] sm:$0xff]  ;;  %v480_v5 = vld [vmem:[#allocation8 + $0x680] sm:$0xff] }
  0xed   :  { %v5081_v10 = vcombine.low %v473_v61, %v477_v0  ;;  %v5088_v11 = vcombine.high %v480_v5, %v484_v6  ;;  %v5087_v17 = vcombine.low %v480_v5, %v484_v6  ;;  %v231_v6 = vrot.slane %v6158_v63, %v6201_v39 }
  0xef   :  { %3432 = vmatpush1.bf16.msra.mxu0 %v5023_v7  ;;  %3596 = vmatpush1.bf16.msra.mxu1 %v5025_v8  ;;  %v481_v7 = vld [vmem:[#allocation8 + $0x688] sm:$0xff]  ;;  %v5082_v8 = vcombine.high %v473_v61, %v477_v0  ;;  %v5120_v61 = vcombine.high %v512_v46, %v516_v47  ;;  %v524_v0 = vld [vmem:[#allocation8 + $0x7e0] sm:$0xff] }
  0xf0   :  { %3433 = vmatprep.subr.bf16.mxu0 %v5032_v56  ;;  %3597 = vmatprep.subr.bf16.mxu1 %v5034_v12  ;;  %v485_v56 = vld [vmem:[#allocation8 + $0x6a8] sm:$0xff]  ;;  %v488_v12 = vld [vmem:[#allocation8 + $0x6c0] sm:$0xff] }
  0xf1   :  { %v5089_v18 = vcombine.low %v481_v7, %v485_v56  ;;  %v5096_v19 = vcombine.high %v488_v12, %v492_v13  ;;  %v5095_v27 = vcombine.low %v488_v12, %v492_v13  ;;  %v533_v13 = vld [vmem:[#allocation8 + $0x828] sm:$0xff] }
  0xf3   :  { %3434 = vmatpush1.bf16.msra.mxu0 %v5031_v14  ;;  %3598 = vmatpush1.bf16.msra.mxu1 %v5033_v15  ;;  %v489_v14 = vld [vmem:[#allocation8 + $0x6c8] sm:$0xff]  ;;  %v5090_v15 = vcombine.high %v481_v7, %v485_v56 }
  0xf4   :  { %3435 = vmatprep.subr.bf16.mxu0 %v5040_v16  ;;  %3599 = vmatprep.subr.bf16.mxu1 %v5042_v21  ;;  %v493_v16 = vld [vmem:[#allocation8 + $0x6e8] sm:$0xff]  ;;  %v496_v21 = vld [vmem:[#allocation8 + $0x700] sm:$0xff] }
  0xf5   :  { %v5104_v30 = vcombine.high %v496_v21, %v500_v22  ;;  %v525_v7 = vld [vmem:[#allocation8 + $0x7e8] sm:$0xff] }
  0xf7   :  { %3436 = vmatpush1.bf16.msra.mxu0 %v5039_v23  ;;  %3600 = vmatpush1.bf16.msra.mxu1 %v5041_v24  ;;  %v497_v23 = vld [vmem:[#allocation8 + $0x708] sm:$0xff]  ;;  %v5098_v24 = vcombine.high %v489_v14, %v493_v16 }
  0xf8   :  { %3437 = vmatprep.subr.bf16.mxu0 %v5048_v25  ;;  %3601 = vmatprep.subr.bf16.mxu1 %v5050_v29  ;;  %v501_v25 = vld [vmem:[#allocation8 + $0x728] sm:$0xff]  ;;  %v5097_v29 = vcombine.low %v489_v14, %v493_v16 }
  0xf9   :  { %v5106_v35 = vcombine.high %v497_v23, %v501_v25 }
  0xfb   :  { %3438 = vmatpush1.bf16.msra.mxu0 %v5047_v31  ;;  %3602 = vmatpush1.bf16.msra.mxu1 %v5049_v33  ;;  %v508_v31 = vld [vmem:[#allocation8 + $0x760] sm:$0xff]  ;;  %v505_v33 = vld [vmem:[#allocation8 + $0x748] sm:$0xff] }
  0xfc   :  { %3439 = vmatprep.subr.bf16.mxu0 %v5056_v34  ;;  %3603 = vmatprep.subr.bf16.mxu1 %v5058_v38  ;;  %v509_v34 = vld [vmem:[#allocation8 + $0x768] sm:$0xff]  ;;  %v6198_v38 = vld [vmem:[#allocation2 + $0x10] sm:$0xff]  ;;  %v5111_v55 = vcombine.low %v504_v28, %v508_v31 }
  0xfd   :  { %v5114_v45 = vcombine.high %v505_v33, %v509_v34  ;;  %v5113_v58 = vcombine.low %v505_v33, %v509_v34  ;;  %v545_v33 = vld [vmem:[#allocation8 + $0x888] sm:$0xff] }
  0xff   :  { %3440 = vmatpush1.bf16.msra.mxu0 %v5055_v40  ;;  %3604 = vmatpush1.bf16.msra.mxu1 %v5057_v42  ;;  %v5103_v40 = vcombine.low %v496_v21, %v500_v22  ;;  %v5105_v42 = vcombine.low %v497_v23, %v501_v25  ;;  %v537_v22 = vld [vmem:[#allocation8 + $0x848] sm:$0xff] }
 0x100   :  { %3441 = vmatprep.subr.bf16.mxu0 %v5064_v43  ;;  %3605 = vmatprep.subr.bf16.mxu1 %v5066_v48  ;;  %v5112_v43 = vcombine.high %v504_v28, %v508_v31  ;;  %v513_v48 = vld [vmem:[#allocation8 + $0x788] sm:$0xff]  ;;  %v548_v31 = vld [vmem:[#allocation8 + $0x8a0] sm:$0xff] }
 0x101   :  { %v541_v25 = vld [vmem:[#allocation8 + $0x868] sm:$0xff] }
 0x102   :  { %v5146_v34 = vcombine.high %v537_v22, %v541_v25 }
 0x103   :  { %3442 = vmatpush1.bf16.msra.mxu0 %v5063_v52  ;;  %3606 = vmatpush1.bf16.msra.mxu1 %v5065_v53  ;;  %v219_v52 = vrot.slane %v6158_v63, %v6193_v26  ;;  %v153_v53 = vunpack.c.h.bf16 %v6198_v38 }
 0x104   :  { %3443 = vmatprep.subr.bf16.mxu0 %v5072_v54  ;;  %3607 = vmatprep.subr.bf16.mxu1 %v5074_v62  ;;  %v181_v54 = vrot.slane %v6153_v57, %v6201_v39  ;;  %v520_v62 = vld [vmem:[#allocation8 + $0x7c0] sm:$0xff]  ;;  %v5121_v57 = vcombine.low %v513_v48, %v517_v1 }
 0x105   :  { %v5128_v56 = vcombine.high %v520_v62, %v524_v0  ;;  %v5127_v16 = vcombine.low %v520_v62, %v524_v0 }
 0x106   :  { %v203_v5 = vmul.f32 %v181_v54, %v153_v53  ;;  %v560_v53 = vld [vmem:[#allocation8 + $0x900] sm:$0xff] }
 0x107   :  { %3444 = vmatpush1.bf16.msra.mxu0 %v5071_v2  ;;  %3608 = vmatpush1.bf16.msra.mxu1 %v5073_v3  ;;  %v5122_v2 = vcombine.high %v513_v48, %v517_v1  ;;  %v521_v3 = vld [vmem:[#allocation8 + $0x7c8] sm:$0xff]  ;;  %v564_v54 = vld [vmem:[#allocation8 + $0x920] sm:$0xff] }
 0x108   :  { %3445 = vmatprep.subr.bf16.mxu0 %v5080_v4  ;;  %3609 = vmatprep.subr.bf16.mxu1 %v5082_v8  ;;  %v250_v4 = vadd.f32 %v219_v52, %v200_v51  ;;  %v5119_v8 = vcombine.low %v512_v46, %v516_v47  ;;  %v5130_v12 = vcombine.high %v521_v3, %v525_v7  ;;  %v553_v46 = vld [vmem:[#allocation8 + $0x8c8] sm:$0xff] }
 0x109   :  { %v5129_v63 = vcombine.low %v521_v3, %v525_v7  ;;  %v557_v48 = vld [vmem:[#allocation8 + $0x8e8] sm:$0xff] }
 0x10a   :  { %v258_v14 = vmax.f32 %v250_v4, 0.0  ;;  %v5161_v0 = vcombine.low %v553_v46, %v557_v48  ;;  %v568_v4 = vld [vmem:[#allocation8 + $0x940] sm:$0xff]  ;;  %v573_v7 = vld [vmem:[#allocation8 + $0x968] sm:$0xff] }
 0x10b   :  { %3446 = vmatpush1.bf16.msra.mxu0 %v5079_v9  ;;  %3610 = vmatpush1.bf16.msra.mxu1 %v5081_v10  ;;  %v528_v9 = vld [vmem:[#allocation8 + $0x800] sm:$0xff] }
 0x10c   :  { %3447 = vmatprep.subr.bf16.mxu0 %v5088_v11  ;;  %3611 = vmatprep.subr.bf16.mxu1 %v5090_v15  ;;  %v532_v10 = vld [vmem:[#allocation8 + $0x820] sm:$0xff]  ;;  %v529_v11 = vld [vmem:[#allocation8 + $0x808] sm:$0xff]  ;;  %v253_v15 = vadd.f32 %v231_v6, %v203_v5 }
 0x10d   :  { %v5138_v21 = vcombine.high %v529_v11, %v533_v13  ;;  %v5137_v28 = vcombine.low %v529_v11, %v533_v13  ;;  %v572_v5 = vld [vmem:[#allocation8 + $0x960] sm:$0xff]  ;;  %v569_v6 = vld [vmem:[#allocation8 + $0x948] sm:$0xff] }
 0x10e   :  { %v261_v23 = vmax.f32 %v253_v15, 0.0  ;;  %v580_v11 = vld [vmem:[#allocation8 + $0x9a0] sm:$0xff]  ;;  %v581_v13 = vld [vmem:[#allocation8 + $0x9a8] sm:$0xff]  ;;  %v5177_v15 = vcombine.low %v569_v6, %v573_v7 }
 0x10f   :  { %3448 = vmatpush1.bf16.msra.mxu0 %v5087_v17  ;;  %3612 = vmatpush1.bf16.msra.mxu1 %v5089_v18  ;;  %v5136_v17 = vcombine.high %v528_v9, %v532_v10  ;;  %v536_v18 = vld [vmem:[#allocation8 + $0x840] sm:$0xff] }
 0x110   :  { %3449 = vmatprep.subr.bf16.mxu0 %v5096_v19  ;;  %3613 = vmatprep.subr.bf16.mxu1 %v5098_v24  ;;  %v540_v19 = vld [vmem:[#allocation8 + $0x860] sm:$0xff]  ;;  %v6210_v24 = vpack.c.bf16 %v258_v14, %v258_v14  ;;  %v6212_v36 = vpack.c.bf16 %v261_v23, %v261_v23  ;;  %v5175_v14 = vcombine.low %v568_v4, %v572_v5 }
 0x111   :  { %v5143_v37 = vcombine.low %v536_v18, %v540_v19 }
 0x113   :  { %3450 = vmatpush1.bf16.msra.mxu0 %v5095_v27  ;;  %3614 = vmatpush1.bf16.msra.mxu1 %v5097_v29  ;;  %v5135_v27 = vcombine.low %v528_v9, %v532_v10  ;;  %v5144_v29 = vcombine.high %v536_v18, %v540_v19  ;;  %v5178_v9 = vcombine.high %v569_v6, %v573_v7  ;;  %v576_v10 = vld [vmem:[#allocation8 + $0x980] sm:$0xff]  ;;  %v585_v19 = vld [vmem:[#allocation8 + $0x9c8] sm:$0xff] }
 0x114   :  { %3451 = vmatprep.subr.bf16.mxu0 %v5104_v30  ;;  %3615 = vmatprep.subr.bf16.mxu1 %v5106_v35  ;;  %v544_v30 = vld [vmem:[#allocation8 + $0x880] sm:$0xff]  ;;  %v549_v35 = vld [vmem:[#allocation8 + $0x8a8] sm:$0xff] }
 0x115   :  { %v5154_v47 = vcombine.high %v545_v33, %v549_v35  ;;  %v5151_v1 = vcombine.low %v544_v30, %v548_v31  ;;  %v5153_v51 = vcombine.low %v545_v33, %v549_v35  ;;  %v588_v18 = vld [vmem:[#allocation8 + $0x9e0] sm:$0xff] }
 0x117   :  { %3452 = vmatpush1.bf16.msra.mxu0 %v5103_v40  ;;  %3616 = vmatpush1.bf16.msra.mxu1 %v5105_v42  ;;  %v5145_v40 = vcombine.low %v537_v22, %v541_v25  ;;  %v5152_v42 = vcombine.high %v544_v30, %v548_v31  ;;  %v5183_v22 = vcombine.low %v576_v10, %v580_v11  ;;  %v593_v30 = vld [vmem:[#allocation8 + $0xa08] sm:$0xff] }
 0x118   :  { %3453 = vmatprep.subr.bf16.mxu0 %v5112_v43  ;;  %3617 = vmatprep.subr.bf16.mxu1 %v5114_v45  ;;  %v552_v43 = vld [vmem:[#allocation8 + $0x8c0] sm:$0xff]  ;;  %v597_v31 = vld [vmem:[#allocation8 + $0xa28] sm:$0xff] }
 0x119   :  { %v556_v45 = vld [vmem:[#allocation8 + $0x8e0] sm:$0xff] }
 0x11a   :  { %v5160_v52 = vcombine.high %v552_v43, %v556_v45  ;;  %v5159_v62 = vcombine.low %v552_v43, %v556_v45  ;;  %v601_v43 = vld [vmem:[#allocation8 + $0xa48] sm:$0xff] }
 0x11b   :  { %3454 = vmatpush1.bf16.msra.mxu0 %v5111_v55  ;;  %3618 = vmatpush1.bf16.msra.mxu1 %v5113_v58  ;;  %v561_v55 = vld [vmem:[#allocation8 + $0x908] sm:$0xff]  ;;  %v5162_v58 = vcombine.high %v553_v46, %v557_v48 }
 0x11c   :  { %3455 = vmatprep.subr.bf16.mxu0 %v5120_v61  ;;  %3619 = vmatprep.subr.bf16.mxu1 %v5122_v2  ;;  %v565_v61 = vld [vmem:[#allocation8 + $0x928] sm:$0xff]  ;;  %v5168_v2 = vcombine.high %v560_v53, %v564_v54 }
 0x11d   :  { %v5170_v3 = vcombine.high %v561_v55, %v565_v61  ;;  %v605_v45 = vld [vmem:[#allocation8 + $0xa68] sm:$0xff] }
 0x11f   :  { %3456 = vmatpush1.bf16.msra.mxu0 %v5119_v8  ;;  %3620 = vmatpush1.bf16.msra.mxu1 %v5121_v57  ;;  %v5167_v8 = vcombine.low %v560_v53, %v564_v54  ;;  %v5169_v57 = vcombine.low %v561_v55, %v565_v61  ;;  %v609_v53 = vld [vmem:[#allocation8 + $0xa88] sm:$0xff] }
 0x120   :  { %3457 = vmatprep.subr.bf16.mxu0 %v5128_v56  ;;  %3621 = vmatprep.subr.bf16.mxu1 %v5130_v12  ;;  %v5176_v56 = vcombine.high %v568_v4, %v572_v5  ;;  %v577_v12 = vld [vmem:[#allocation8 + $0x988] sm:$0xff] }
 0x121   :  { %v5185_v23 = vcombine.low %v577_v12, %v581_v13  ;;  %v613_v54 = vld [vmem:[#allocation8 + $0xaa8] sm:$0xff] }
 0x122   :  { %v621_v4 = vld [vmem:[#allocation8 + $0xae8] sm:$0xff]  ;;  %v5217_v6 = vcombine.low %v609_v53, %v613_v54 }
 0x123   :  { %3458 = vmatpush1.bf16.msra.mxu0 %v5127_v16  ;;  %3622 = vmatpush1.bf16.msra.mxu1 %v5129_v63  ;;  %v5184_v16 = vcombine.high %v576_v10, %v580_v11  ;;  %v5186_v63 = vcombine.high %v577_v12, %v581_v13  ;;  %v629_v10 = vld [vmem:[#allocation8 + $0xb28] sm:$0xff]  ;;  %v6219_v11 = vsub.s32 4, %v6146_v41 }
 0x124   :  { %3468 = vmatprep.subr.bf16.mxu0 %v5136_v17  ;;  %3632 = vmatprep.subr.bf16.mxu1 %v5138_v21  ;;  %v584_v17 = vld [vmem:[#allocation8 + $0x9c0] sm:$0xff]  ;;  %v589_v21 = vld [vmem:[#allocation8 + $0x9e8] sm:$0xff] }
 0x125   :  { %v5192_v25 = vcombine.high %v584_v17, %v588_v18  ;;  %v5191_v33 = vcombine.low %v584_v17, %v588_v18  ;;  %v6222_v17 = vsub.s32 7, %v6146_v41  ;;  %v633_v18 = vld [vmem:[#allocation8 + $0xb48] sm:$0xff] }
 0x126   :  { %3460 = vmatmul.mubr.bf16.vlgmr.msra.gmra.mrb[0].mxu0 %v6210_v24  ;;  %3624 = vmatmul.mubr.bf16.vlgmr.msra.gmra.mrb[0].mxu1 %v6210_v24 }
 0x127   :  { %3469 = vmatpush1.bf16.msra.mxu0 %v5135_v27  ;;  %3633 = vmatpush1.bf16.msra.mxu1 %v5137_v28  ;;  %v5194_v27 = vcombine.high %v585_v19, %v589_v21  ;;  %v592_v28 = vld [vmem:[#allocation8 + $0xa00] sm:$0xff] }
 0x128   :  { %3470 = vmatprep.subr.bf16.mxu0 %v5144_v29  ;;  %3634 = vmatprep.subr.bf16.mxu1 %v5146_v34  ;;  %v596_v29 = vld [vmem:[#allocation8 + $0xa20] sm:$0xff]  ;;  %v5193_v34 = vcombine.low %v585_v19, %v589_v21  ;;  %v637_v19 = vld [vmem:[#allocation8 + $0xb68] sm:$0xff]  ;;  %v152_v21 = vunpack.c.l.bf16 %v6198_v38 }
 0x129   :  { %3500 = vmatprep.mubr.bf16.mxu0 %v6212_v36  ;;  %3664 = vmatprep.mubr.bf16.mxu1 %v6212_v36  ;;  %v5200_v35 = vcombine.high %v592_v28, %v596_v29  ;;  %v5199_v46 = vcombine.low %v592_v28, %v596_v29 }
 0x12b   :  { %3471 = vmatpush1.bf16.msra.mxu0 %v5143_v37  ;;  %3635 = vmatpush1.bf16.msra.mxu1 %v5145_v40  ;;  %v5202_v37 = vcombine.high %v593_v30, %v597_v31  ;;  %v600_v40 = vld [vmem:[#allocation8 + $0xa40] sm:$0xff] }
 0x12c   :  { %3472 = vmatprep.subr.bf16.mxu0 %v5152_v42  ;;  %3636 = vmatprep.subr.bf16.mxu1 %v5154_v47  ;;  %v604_v42 = vld [vmem:[#allocation8 + $0xa60] sm:$0xff]  ;;  %v5201_v47 = vcombine.low %v593_v30, %v597_v31  ;;  %v5242_v30 = vcombine.high %v633_v18, %v637_v19 }
 0x12d   :  { %v5208_v48 = vcombine.high %v600_v40, %v604_v42  ;;  %v5207_v55 = vcombine.low %v600_v40, %v604_v42  ;;  %v640_v31 = vld [vmem:[#allocation8 + $0xb80] sm:$0xff]  ;;  %v6234_v42 = vld [vmem:[#allocation7] sm:$0xff] }
 0x12f   :  { %3473 = vmatpush1.bf16.msra.mxu0 %v5151_v1  ;;  %3637 = vmatpush1.bf16.msra.mxu1 %v5153_v51  ;;  %v5210_v1 = vcombine.high %v601_v43, %v605_v45  ;;  %v608_v51 = vld [vmem:[#allocation8 + $0xa80] sm:$0xff] }
 0x130   :  { %3474 = vmatprep.subr.bf16.mxu0 %v5160_v52  ;;  %3638 = vmatprep.subr.bf16.mxu1 %v5162_v58  ;;  %v612_v52 = vld [vmem:[#allocation8 + $0xaa0] sm:$0xff]  ;;  %v5209_v58 = vcombine.low %v601_v43, %v605_v45  ;;  %v227_v43 = vrot.slane %v6234_v42, %v6219_v11 }
 0x131   :  { %v5216_v61 = vcombine.high %v608_v51, %v612_v52  ;;  %v5215_v5 = vcombine.low %v608_v51, %v612_v52  ;;  %v652_v51 = vld [vmem:[#allocation8 + $0xbe0] sm:$0xff] }
 0x133   :  { %3475 = vmatpush1.bf16.msra.mxu0 %v5159_v62  ;;  %3639 = vmatpush1.bf16.msra.mxu1 %v5161_v0  ;;  %v5218_v62 = vcombine.high %v609_v53, %v613_v54  ;;  %v616_v0 = vld [vmem:[#allocation8 + $0xac0] sm:$0xff]  ;;  %v239_v53 = vrot.slane %v6234_v42, %v6222_v17  ;;  %v649_v54 = vld [vmem:[#allocation8 + $0xbc8] sm:$0xff] }
 0x134   :  { %3476 = vmatprep.subr.bf16.mxu0 %v5168_v2  ;;  %3640 = vmatprep.subr.bf16.mxu1 %v5170_v3  ;;  %v620_v2 = vld [vmem:[#allocation8 + $0xae0] sm:$0xff]  ;;  %v617_v3 = vld [vmem:[#allocation8 + $0xac8] sm:$0xff] }
 0x135   :  { %v5224_v7 = vcombine.high %v616_v0, %v620_v2  ;;  %v5223_v12 = vcombine.low %v616_v0, %v620_v2  ;;  %v5225_v13 = vcombine.low %v617_v3, %v621_v4 }
 0x137   :  { %3477 = vmatpush1.bf16.msra.mxu0 %v5167_v8  ;;  %3641 = vmatpush1.bf16.msra.mxu1 %v5169_v57  ;;  %v5226_v8 = vcombine.high %v617_v3, %v621_v4  ;;  %v624_v57 = vld [vmem:[#allocation8 + $0xb00] sm:$0xff] }
 0x138   :  { %3478 = vmatprep.subr.bf16.mxu0 %v5176_v56  ;;  %3642 = vmatprep.subr.bf16.mxu1 %v5178_v9  ;;  %v628_v56 = vld [vmem:[#allocation8 + $0xb20] sm:$0xff]  ;;  %v625_v9 = vld [vmem:[#allocation8 + $0xb08] sm:$0xff] }
 0x139   :  { %v5233_v28 = vcombine.low %v625_v9, %v629_v10  ;;  %v656_v3 = vld [vmem:[#allocation8 + $0xc00] sm:$0xff] }
 0x13a   :  { %v660_v4 = vld [vmem:[#allocation8 + $0xc20] sm:$0xff] }
 0x13b   :  { %3479 = vmatpush1.bf16.msra.mxu0 %v5175_v14  ;;  %3643 = vmatpush1.bf16.msra.mxu1 %v5177_v15  ;;  %v5232_v14 = vcombine.high %v624_v57, %v628_v56  ;;  %v5234_v15 = vcombine.high %v625_v9, %v629_v10  ;;  %v5264_v9 = vcombine.high %v656_v3, %v660_v4 }
 0x13c   :  { %3480 = vmatprep.subr.bf16.mxu0 %v5184_v16  ;;  %3644 = vmatprep.subr.bf16.mxu1 %v5186_v63  ;;  %v632_v16 = vld [vmem:[#allocation8 + $0xb40] sm:$0xff] }
 0x13d   :  { %v636_v63 = vld [vmem:[#allocation8 + $0xb60] sm:$0xff] }
 0x13e   :  { %v5240_v29 = vcombine.high %v632_v16, %v636_v63  ;;  %v5239_v45 = vcombine.low %v632_v16, %v636_v63  ;;  %v665_v16 = vld [vmem:[#allocation8 + $0xc48] sm:$0xff] }
 0x13f   :  { %3481 = vmatpush1.bf16.msra.mxu0 %v5183_v22  ;;  %3645 = vmatpush1.bf16.msra.mxu1 %v5185_v23  ;;  %v6225_v22 = vld [vmem:[#allocation5] sm:$0xff]  ;;  %v669_v63 = vld [vmem:[#allocation8 + $0xc68] sm:$0xff] }
 0x140   :  { %3482 = vmatprep.subr.bf16.mxu0 %v5192_v25  ;;  %3646 = vmatprep.subr.bf16.mxu1 %v5194_v27  ;;  %v177_v23 = vrot.slane %v6225_v22, %v6219_v11  ;;  %v6229_v25 = vld [vmem:[#allocation2 + $0x18] sm:$0xff]  ;;  %v5231_v27 = vcombine.low %v624_v57, %v628_v56  ;;  %v189_v38 = vrot.slane %v6225_v22, %v6222_v17 }
 0x142   :  { %v202_v40 = vmul.f32 %v177_v23, %v152_v21  ;;  %v5274_v23 = vcombine.high %v665_v16, %v669_v63 }
 0x143   :  { %3483 = vmatpush1.bf16.msra.mxu0 %v5191_v33  ;;  %3647 = vmatpush1.bf16.msra.mxu1 %v5193_v34  ;;  %v644_v33 = vld [vmem:[#allocation8 + $0xba0] sm:$0xff]  ;;  %v155_v34 = vunpack.c.h.bf16 %v6229_v25 }
 0x144   :  { %3484 = vmatprep.subr.bf16.mxu0 %v5200_v35  ;;  %3648 = vmatprep.subr.bf16.mxu1 %v5202_v37  ;;  %v641_v35 = vld [vmem:[#allocation8 + $0xb88] sm:$0xff] }
 0x145   :  { %v645_v37 = vld [vmem:[#allocation8 + $0xba8] sm:$0xff]  ;;  %v205_v52 = vmul.f32 %v189_v38, %v155_v34  ;;  %v5273_v34 = vcombine.low %v665_v16, %v669_v63  ;;  %v712_v63 = vld [vmem:[#allocation8 + $0xdc0] sm:$0xff] }
 0x147   :  { %3485 = vmatpush1.bf16.msra.mxu0 %v5199_v46  ;;  %3649 = vmatpush1.bf16.msra.mxu1 %v5201_v47  ;;  %v5241_v46 = vcombine.low %v633_v18, %v637_v19  ;;  %v5248_v47 = vcombine.high %v640_v31, %v644_v33  ;;  %v5263_v18 = vcombine.low %v656_v3, %v660_v4  ;;  %v697_v3 = vld [vmem:[#allocation8 + $0xd48] sm:$0xff] }
 0x148   :  { %3486 = vmatprep.subr.bf16.mxu0 %v5208_v48  ;;  %3650 = vmatprep.subr.bf16.mxu1 %v5210_v1  ;;  %v5250_v48 = vcombine.high %v641_v35, %v645_v37  ;;  %v648_v1 = vld [vmem:[#allocation8 + $0xbc0] sm:$0xff]  ;;  %v701_v4 = vld [vmem:[#allocation8 + $0xd68] sm:$0xff] }
 0x149   :  { %v5256_v0 = vcombine.high %v648_v1, %v652_v51  ;;  %v5255_v57 = vcombine.low %v648_v1, %v652_v51  ;;  %v688_v51 = vld [vmem:[#allocation8 + $0xd00] sm:$0xff] }
 0x14b   :  { %3487 = vmatpush1.bf16.msra.mxu0 %v5207_v55  ;;  %3651 = vmatpush1.bf16.msra.mxu1 %v5209_v58  ;;  %v653_v55 = vld [vmem:[#allocation8 + $0xbe8] sm:$0xff]  ;;  %v252_v58 = vadd.f32 %v227_v43, %v202_v40  ;;  %v684_v40 = vld [vmem:[#allocation8 + $0xce0] sm:$0xff] }
 0x14c   :  { %3488 = vmatprep.subr.bf16.mxu0 %v5216_v61  ;;  %3652 = vmatprep.subr.bf16.mxu1 %v5218_v62  ;;  %v5247_v61 = vcombine.low %v640_v31, %v644_v33  ;;  %v5249_v62 = vcombine.low %v641_v35, %v645_v37  ;;  %v5258_v2 = vcombine.high %v649_v54, %v653_v55  ;;  %v677_v31 = vld [vmem:[#allocation8 + $0xca8] sm:$0xff]  ;;  %v680_v37 = vld [vmem:[#allocation8 + $0xcc0] sm:$0xff] }
 0x14d   :  { %v5257_v56 = vcombine.low %v649_v54, %v653_v55  ;;  %v681_v43 = vld [vmem:[#allocation8 + $0xcc8] sm:$0xff]  ;;  %v5287_v55 = vcombine.low %v680_v37, %v684_v40 }
 0x14e   :  { %v693_v54 = vld [vmem:[#allocation8 + $0xd28] sm:$0xff] }
 0x14f   :  { %3489 = vmatpush1.bf16.msra.mxu0 %v5215_v5  ;;  %3653 = vmatpush1.bf16.msra.mxu1 %v5217_v6  ;;  %v255_v5 = vadd.f32 %v239_v53, %v205_v52  ;;  %v657_v6 = vld [vmem:[#allocation8 + $0xc08] sm:$0xff]  ;;  %v692_v52 = vld [vmem:[#allocation8 + $0xd20] sm:$0xff] }
 0x150   :  { %3490 = vmatprep.subr.bf16.mxu0 %v5224_v7  ;;  %3654 = vmatprep.subr.bf16.mxu1 %v5226_v8  ;;  %v661_v7 = vld [vmem:[#allocation8 + $0xc28] sm:$0xff]  ;;  %v260_v8 = vmax.f32 %v252_v58, 0.0 }
 0x151   :  { %v5266_v10 = vcombine.high %v657_v6, %v661_v7  ;;  %v5265_v19 = vcombine.low %v657_v6, %v661_v7  ;;  %v689_v53 = vld [vmem:[#allocation8 + $0xd08] sm:$0xff] }
 0x152   :  { %v5297_v6 = vcombine.low %v689_v53, %v693_v54 }
 0x153   :  { %3491 = vmatpush1.bf16.msra.mxu0 %v5223_v12  ;;  %3655 = vmatpush1.bf16.msra.mxu1 %v5225_v13  ;;  %v664_v12 = vld [vmem:[#allocation8 + $0xc40] sm:$0xff] }
 0x154   :  { %3492 = vmatprep.subr.bf16.mxu0 %v5232_v14  ;;  %3656 = vmatprep.subr.bf16.mxu1 %v5234_v15  ;;  %v668_v13 = vld [vmem:[#allocation8 + $0xc60] sm:$0xff]  ;;  %v263_v14 = vmax.f32 %v255_v5, 0.0  ;;  %v6240_v15 = vpack.c.bf16 %v260_v8, %v260_v8  ;;  %v5295_v5 = vcombine.low %v688_v51, %v692_v52  ;;  %v5306_v8 = vcombine.high %v697_v3, %v701_v4 }
 0x155   :  { %v5272_v21 = vcombine.high %v664_v12, %v668_v13  ;;  %v5271_v33 = vcombine.low %v664_v12, %v668_v13  ;;  %v5305_v13 = vcombine.low %v697_v3, %v701_v4  ;;  %v744_v4 = vld [vmem:[#allocation8 + $0xec0] sm:$0xff] }
 0x157   :  { %3493 = vmatpush1.bf16.msra.mxu0 %v5231_v27  ;;  %3657 = vmatpush1.bf16.msra.mxu1 %v5233_v28  ;;  %v672_v27 = vld [vmem:[#allocation8 + $0xc80] sm:$0xff] }
 0x158   :  { %3494 = vmatprep.subr.bf16.mxu0 %v5240_v29  ;;  %3658 = vmatprep.subr.bf16.mxu1 %v5242_v30  ;;  %v676_v28 = vld [vmem:[#allocation8 + $0xca0] sm:$0xff]  ;;  %v6242_v29 = vpack.c.bf16 %v263_v14, %v263_v14  ;;  %v673_v30 = vld [vmem:[#allocation8 + $0xc88] sm:$0xff] }
 0x159   :  { %v5280_v38 = vcombine.high %v672_v27, %v676_v28  ;;  %v5282_v35 = vcombine.high %v673_v30, %v677_v31 }
 0x15b   :  { %3495 = vmatpush1.bf16.msra.mxu0 %v5239_v45  ;;  %3659 = vmatpush1.bf16.msra.mxu1 %v5241_v46  ;;  %v685_v45 = vld [vmem:[#allocation8 + $0xce8] sm:$0xff]  ;;  %v5279_v46 = vcombine.low %v672_v27, %v676_v28 }
 0x15c   :  { %3496 = vmatprep.subr.bf16.mxu0 %v5248_v47  ;;  %3660 = vmatprep.subr.bf16.mxu1 %v5250_v48  ;;  %v5281_v47 = vcombine.low %v673_v30, %v677_v31  ;;  %v5288_v48 = vcombine.high %v680_v37, %v684_v40  ;;  %v5290_v1 = vcombine.high %v681_v43, %v685_v45  ;;  %v720_v31 = vld [vmem:[#allocation8 + $0xe00] sm:$0xff] }
 0x15d   :  { %v5289_v58 = vcombine.low %v681_v43, %v685_v45  ;;  %v728_v45 = vld [vmem:[#allocation8 + $0xe40] sm:$0xff] }
 0x15f   :  { %3497 = vmatpush1.bf16.msra.mxu0 %v5247_v61  ;;  %3661 = vmatpush1.bf16.msra.mxu1 %v5249_v62  ;;  %v5296_v61 = vcombine.high %v688_v51, %v692_v52  ;;  %v5298_v62 = vcombine.high %v689_v53, %v693_v54  ;;  %v736_v54 = vld [vmem:[#allocation8 + $0xe80] sm:$0xff] }
 0x160   :  { %3498 = vmatprep.subr.bf16.mxu0 %v5256_v0  ;;  %3662 = vmatprep.subr.bf16.mxu1 %v5258_v2  ;;  %v696_v0 = vld [vmem:[#allocation8 + $0xd40] sm:$0xff] }
 0x161   :  { %v700_v2 = vld [vmem:[#allocation8 + $0xd60] sm:$0xff] }
 0x162   :  { %v5304_v7 = vcombine.high %v696_v0, %v700_v2  ;;  %v5303_v12 = vcombine.low %v696_v0, %v700_v2 }
 0x163   :  { %3499 = vmatpush1.bf16.msra.mxu0 %v5255_v57  ;;  %3663 = vmatpush1.bf16.msra.mxu1 %v5257_v56  ;;  %v704_v57 = vld [vmem:[#allocation8 + $0xd80] sm:$0xff] }
 0x164   :  { %3509 = vmatprep.subr.bf16.mxu0 %v5264_v9  ;;  %3673 = vmatprep.subr.bf16.mxu1 %v5266_v10  ;;  %v708_v56 = vld [vmem:[#allocation8 + $0xda0] sm:$0xff]  ;;  %v705_v9 = vld [vmem:[#allocation8 + $0xd88] sm:$0xff] }
 0x165   :  { %v709_v10 = vld [vmem:[#allocation8 + $0xda8] sm:$0xff]  ;;  %v5312_v14 = vcombine.high %v704_v57, %v708_v56 }
 0x166   :  { %3501 = vmatmul.mubr.bf16.vlgmr.msra.gmra.mrb[0].mxu0 %v6240_v15  ;;  %3665 = vmatmul.mubr.bf16.vlgmr.msra.gmra.mrb[0].mxu1 %v6240_v15  ;;  %v5314_v16 = vcombine.high %v705_v9, %v709_v10  ;;  %v5313_v27 = vcombine.low %v705_v9, %v709_v10  ;;  %v752_v10 = vld [vmem:[#allocation8 + $0xf00] sm:$0xff] }
 0x167   :  { %3510 = vmatpush1.bf16.msra.mxu0 %v5263_v18  ;;  %3674 = vmatpush1.bf16.msra.mxu1 %v5265_v19  ;;  %v716_v18 = vld [vmem:[#allocation8 + $0xde0] sm:$0xff]  ;;  %v713_v19 = vld [vmem:[#allocation8 + $0xdc8] sm:$0xff] }
 0x168   :  { %3511 = vmatprep.subr.bf16.mxu0 %v5272_v21  ;;  %3675 = vmatprep.subr.bf16.mxu1 %v5274_v23  ;;  %v717_v21 = vld [vmem:[#allocation8 + $0xde8] sm:$0xff]  ;;  %v5311_v23 = vcombine.low %v704_v57, %v708_v56  ;;  %v5320_v28 = vcombine.high %v712_v63, %v716_v18 }
 0x169   :  { %3541 = vmatprep.mubr.bf16.mxu0 %v6242_v29  ;;  %3705 = vmatprep.mubr.bf16.mxu1 %v6242_v29  ;;  %v5322_v30 = vcombine.high %v713_v19, %v717_v21  ;;  %v5321_v37 = vcombine.low %v713_v19, %v717_v21 }
 0x16b   :  { %3512 = vmatpush1.bf16.msra.mxu0 %v5271_v33  ;;  %3676 = vmatpush1.bf16.msra.mxu1 %v5273_v34  ;;  %v724_v33 = vld [vmem:[#allocation8 + $0xe20] sm:$0xff]  ;;  %v721_v34 = vld [vmem:[#allocation8 + $0xe08] sm:$0xff] }
 0x16c   :  { %3513 = vmatprep.subr.bf16.mxu0 %v5280_v38  ;;  %3677 = vmatprep.subr.bf16.mxu1 %v5282_v35  ;;  %v725_v38 = vld [vmem:[#allocation8 + $0xe28] sm:$0xff]  ;;  %v5319_v35 = vcombine.low %v712_v63, %v716_v18  ;;  %v5328_v40 = vcombine.high %v720_v31, %v724_v33 }
 0x16d   :  { %v5330_v43 = vcombine.high %v721_v34, %v725_v38  ;;  %v5329_v51 = vcombine.low %v721_v34, %v725_v38 }
 0x16f   :  { %3514 = vmatpush1.bf16.msra.mxu0 %v5279_v46  ;;  %3678 = vmatpush1.bf16.msra.mxu1 %v5281_v47  ;;  %v732_v46 = vld [vmem:[#allocation8 + $0xe60] sm:$0xff]  ;;  %v729_v47 = vld [vmem:[#allocation8 + $0xe48] sm:$0xff] }
 0x170   :  { %3515 = vmatprep.subr.bf16.mxu0 %v5288_v48  ;;  %3679 = vmatprep.subr.bf16.mxu1 %v5290_v1  ;;  %v733_v48 = vld [vmem:[#allocation8 + $0xe68] sm:$0xff]  ;;  %v5327_v1 = vcombine.low %v720_v31, %v724_v33  ;;  %v5336_v52 = vcombine.high %v728_v45, %v732_v46  ;;  %v154_v31 = vunpack.c.l.bf16 %v6229_v25 }
 0x171   :  { %v5338_v53 = vcombine.high %v729_v47, %v733_v48  ;;  %v5337_v0 = vcombine.low %v729_v47, %v733_v48 }
 0x173   :  { %3516 = vmatpush1.bf16.msra.mxu0 %v5287_v55  ;;  %3680 = vmatpush1.bf16.msra.mxu1 %v5289_v58  ;;  %v740_v55 = vld [vmem:[#allocation8 + $0xea0] sm:$0xff]  ;;  %v737_v58 = vld [vmem:[#allocation8 + $0xe88] sm:$0xff] }
 0x174   :  { %3517 = vmatprep.subr.bf16.mxu0 %v5296_v61  ;;  %3681 = vmatprep.subr.bf16.mxu1 %v5298_v62  ;;  %v741_v61 = vld [vmem:[#allocation8 + $0xea8] sm:$0xff]  ;;  %v5335_v62 = vcombine.low %v728_v45, %v732_v46  ;;  %v5344_v2 = vcombine.high %v736_v54, %v740_v55 }
 0x175   :  { %v5346_v3 = vcombine.high %v737_v58, %v741_v61  ;;  %v5345_v57 = vcombine.low %v737_v58, %v741_v61  ;;  %v773_v45 = vld [vmem:[#allocation8 + $0xfa8] sm:$0xff] }
 0x177   :  { %3518 = vmatpush1.bf16.msra.mxu0 %v5295_v5  ;;  %3682 = vmatpush1.bf16.msra.mxu1 %v5297_v6  ;;  %v748_v5 = vld [vmem:[#allocation8 + $0xee0] sm:$0xff]  ;;  %v745_v6 = vld [vmem:[#allocation8 + $0xec8] sm:$0xff] }
 0x178   :  { %3519 = vmatprep.subr.bf16.mxu0 %v5304_v7  ;;  %3683 = vmatprep.subr.bf16.mxu1 %v5306_v8  ;;  %v749_v7 = vld [vmem:[#allocation8 + $0xee8] sm:$0xff]  ;;  %v5343_v8 = vcombine.low %v736_v54, %v740_v55  ;;  %v5352_v56 = vcombine.high %v744_v4, %v748_v5  ;;  %v5351_v63 = vcombine.low %v744_v4, %v748_v5  ;;  %v275_v4 = vld [vmem:[#allocation8 + $0x18] sm:$0xff] }
 0x179   :  { %v5354_v9 = vcombine.high %v745_v6, %v749_v7  ;;  %v5353_v18 = vcombine.low %v745_v6, %v749_v7  ;;  %v781_v54 = vld [vmem:[#allocation8 + $0xfe8] sm:$0xff]  ;;  %v279_v5 = vld [vmem:[#allocation8 + $0x38] sm:$0xff] }
 0x17b   :  { %3520 = vmatpush1.bf16.msra.mxu0 %v5303_v12  ;;  %3684 = vmatpush1.bf16.msra.mxu1 %v5305_v13  ;;  %v756_v12 = vld [vmem:[#allocation8 + $0xf20] sm:$0xff]  ;;  %v753_v13 = vld [vmem:[#allocation8 + $0xf08] sm:$0xff] }
 0x17c   :  { %3521 = vmatprep.subr.bf16.mxu0 %v5312_v14  ;;  %3685 = vmatprep.subr.bf16.mxu1 %v5314_v16  ;;  %v757_v14 = vld [vmem:[#allocation8 + $0xf28] sm:$0xff]  ;;  %v6249_v16 = vsub.s32 6, %v6146_v41  ;;  %v5360_v19 = vcombine.high %v752_v10, %v756_v12  ;;  %v5359_v41 = vcombine.low %v752_v10, %v756_v12  ;;  %v283_v12 = vld [vmem:[#allocation8 + $0x58] sm:$0xff] }
 0x17d   :  { %v5362_v21 = vcombine.high %v753_v13, %v757_v14  ;;  %v5361_v34 = vcombine.low %v753_v13, %v757_v14  ;;  %v287_v13 = vld [vmem:[#allocation8 + $0x78] sm:$0xff] }
 0x17e   :  { %v185_v33 = vrot.slane %v6225_v22, %v6249_v16  ;;  %v235_v47 = vrot.slane %v6234_v42, %v6249_v16 }
 0x17f   :  { %3522 = vmatpush1.bf16.msra.mxu0 %v5311_v23  ;;  %3686 = vmatpush1.bf16.msra.mxu1 %v5313_v27  ;;  %v760_v23 = vld [vmem:[#allocation8 + $0xf40] sm:$0xff] }
 0x180   :  { %3523 = vmatprep.subr.bf16.mxu0 %v5320_v28  ;;  %3687 = vmatprep.subr.bf16.mxu1 %v5322_v30  ;;  %v764_v27 = vld [vmem:[#allocation8 + $0xf60] sm:$0xff]  ;;  %v761_v28 = vld [vmem:[#allocation8 + $0xf48] sm:$0xff]  ;;  %v204_v46 = vmul.f32 %v185_v33, %v154_v31  ;;  %v4893_v31 = vcombine.low %v283_v12, %v287_v13 }
 0x181   :  { %v765_v30 = vld [vmem:[#allocation8 + $0xf68] sm:$0xff]  ;;  %v5368_v38 = vcombine.high %v760_v23, %v764_v27  ;;  %v5367_v25 = vcombine.low %v760_v23, %v764_v27  ;;  %v294_v23 = vld [vmem:[#allocation8 + $0xb0] sm:$0xff]  ;;  %v291_v27 = vld [vmem:[#allocation8 + $0x98] sm:$0xff] }
 0x182   :  { %v5369_v22 = vcombine.low %v761_v28, %v765_v30  ;;  %v254_v55 = vadd.f32 %v235_v47, %v204_v46  ;;  %v306_v47 = vld [vmem:[#allocation8 + $0x110] sm:$0xff] }
 0x183   :  { %3524 = vmatpush1.bf16.msra.mxu0 %v5319_v35  ;;  %3688 = vmatpush1.bf16.msra.mxu1 %v5321_v37  ;;  %v5370_v35 = vcombine.high %v761_v28, %v765_v30  ;;  %v768_v37 = vld [vmem:[#allocation8 + $0xf80] sm:$0xff]  ;;  %v295_v28 = vld [vmem:[#allocation8 + $0xb8] sm:$0xff] }
 0x184   :  { %3525 = vmatprep.subr.bf16.mxu0 %v5328_v40  ;;  %3689 = vmatprep.subr.bf16.mxu1 %v5330_v43  ;;  %v772_v40 = vld [vmem:[#allocation8 + $0xfa0] sm:$0xff]  ;;  %v769_v43 = vld [vmem:[#allocation8 + $0xf88] sm:$0xff] }
 0x185   :  { %v5376_v48 = vcombine.high %v768_v37, %v772_v40  ;;  %v5375_v58 = vcombine.low %v768_v37, %v772_v40  ;;  %v5377_v61 = vcombine.low %v769_v43, %v773_v45  ;;  %v303_v37 = vld [vmem:[#allocation8 + $0xf8] sm:$0xff] }
 0x187   :  { %3526 = vmatpush1.bf16.msra.mxu0 %v5327_v1  ;;  %3690 = vmatpush1.bf16.msra.mxu1 %v5329_v51  ;;  %v5378_v1 = vcombine.high %v769_v43, %v773_v45  ;;  %v776_v51 = vld [vmem:[#allocation8 + $0xfc0] sm:$0xff]  ;;  %v4901_v43 = vcombine.low %v291_v27, %v295_v28 }
 0x188   :  { %3527 = vmatprep.subr.bf16.mxu0 %v5336_v52  ;;  %3691 = vmatprep.subr.bf16.mxu1 %v5338_v53  ;;  %v780_v52 = vld [vmem:[#allocation8 + $0xfe0] sm:$0xff]  ;;  %v777_v53 = vld [vmem:[#allocation8 + $0xfc8] sm:$0xff] }
 0x189   :  { %v5386_v42 = vcombine.high %v777_v53, %v781_v54  ;;  %v5383_v6 = vcombine.low %v776_v51, %v780_v52  ;;  %v5385_v7 = vcombine.low %v777_v53, %v781_v54  ;;  %v314_v53 = vld [vmem:[#allocation8 + $0x150] sm:$0xff] }
 0x18a   :  { %v318_v54 = vld [vmem:[#allocation8 + $0x170] sm:$0xff] }
 0x18b   :  { %3528 = vmatpush1.bf16.msra.mxu0 %v5335_v62  ;;  %3692 = vmatpush1.bf16.msra.mxu1 %v5337_v0  ;;  %v5384_v62 = vcombine.high %v776_v51, %v780_v52  ;;  %v274_v0 = vld [vmem:[#allocation8 + $0x10] sm:$0xff] }
 0x18c   :  { %3529 = vmatprep.subr.bf16.mxu0 %v5344_v2  ;;  %3693 = vmatprep.subr.bf16.mxu1 %v5346_v3  ;;  %v278_v2 = vld [vmem:[#allocation8 + $0x30] sm:$0xff]  ;;  %v262_v3 = vmax.f32 %v254_v55, 0.0  ;;  %v315_v55 = vld [vmem:[#allocation8 + $0x158] sm:$0xff] }
 0x18d   :  { %v4883_v14 = vcombine.low %v274_v0, %v278_v2 }
 0x18e   :  { %v6256_v10 = vpack.c.bf16 %v262_v3, %v262_v3  ;;  %v326_v3 = vld [vmem:[#allocation8 + $0x1b0] sm:$0xff] }
 0x18f   :  { %3530 = vmatpush1.bf16.msra.mxu0 %v5343_v8  ;;  %3694 = vmatpush1.bf16.msra.mxu1 %v5345_v57  ;;  %v4884_v8 = vcombine.high %v274_v0, %v278_v2  ;;  %v4886_v57 = vcombine.high %v275_v4, %v279_v5  ;;  %v322_v2 = vld [vmem:[#allocation8 + $0x190] sm:$0xff] }
 0x190   :  { %3531 = vmatprep.subr.bf16.mxu0 %v5352_v56  ;;  %3695 = vmatprep.subr.bf16.mxu1 %v5354_v9  ;;  %v282_v56 = vld [vmem:[#allocation8 + $0x50] sm:$0xff] }
 0x191   :  { %v286_v9 = vld [vmem:[#allocation8 + $0x70] sm:$0xff] }
 0x192   :  { %v4891_v30 = vcombine.low %v282_v56, %v286_v9 }
 0x193   :  { %3532 = vmatpush1.bf16.msra.mxu0 %v5351_v63  ;;  %3696 = vmatpush1.bf16.msra.mxu1 %v5353_v18  ;;  %v4885_v63 = vcombine.low %v275_v4, %v279_v5  ;;  %v4892_v18 = vcombine.high %v282_v56, %v286_v9  ;;  %v323_v4 = vld [vmem:[#allocation8 + $0x198] sm:$0xff]  ;;  %v330_v56 = vld [vmem:[#allocation8 + $0x1d0] sm:$0xff] }
 0x194   :  { %3533 = vmatprep.subr.bf16.mxu0 %v5360_v19  ;;  %3697 = vmatprep.subr.bf16.mxu1 %v5362_v21  ;;  %v4894_v19 = vcombine.high %v283_v12, %v287_v13  ;;  %v290_v21 = vld [vmem:[#allocation8 + $0x90] sm:$0xff]  ;;  %v327_v5 = vld [vmem:[#allocation8 + $0x1b8] sm:$0xff] }
 0x195   :  { %v4900_v33 = vcombine.high %v290_v21, %v294_v23  ;;  %v4899_v40 = vcombine.low %v290_v21, %v294_v23  ;;  %v334_v9 = vld [vmem:[#allocation8 + $0x1f0] sm:$0xff]  ;;  %v331_v12 = vld [vmem:[#allocation8 + $0x1d8] sm:$0xff] }
 0x196   :  { %v335_v13 = vld [vmem:[#allocation8 + $0x1f8] sm:$0xff]  ;;  %v338_v21 = vld [vmem:[#allocation8 + $0x210] sm:$0xff] }
 0x197   :  { %3534 = vmatpush1.bf16.msra.mxu0 %v5359_v41  ;;  %3698 = vmatpush1.bf16.msra.mxu1 %v5361_v34  ;;  %v4902_v41 = vcombine.high %v291_v27, %v295_v28  ;;  %v298_v34 = vld [vmem:[#allocation8 + $0xd0] sm:$0xff]  ;;  %v339_v27 = vld [vmem:[#allocation8 + $0x218] sm:$0xff] }
 0x198   :  { %3535 = vmatprep.subr.bf16.mxu0 %v5368_v38  ;;  %3699 = vmatprep.subr.bf16.mxu1 %v5370_v35  ;;  %v302_v38 = vld [vmem:[#allocation8 + $0xf0] sm:$0xff]  ;;  %v299_v35 = vld [vmem:[#allocation8 + $0xd8] sm:$0xff] }
 0x199   :  { %v4908_v45 = vcombine.high %v298_v34, %v302_v38  ;;  %v4910_v46 = vcombine.high %v299_v35, %v303_v37  ;;  %v4909_v51 = vcombine.low %v299_v35, %v303_v37  ;;  %v342_v23 = vld [vmem:[#allocation8 + $0x230] sm:$0xff]  ;;  %v343_v28 = vld [vmem:[#allocation8 + $0x238] sm:$0xff] }
 0x19a   :  { %v347_v35 = vld [vmem:[#allocation8 + $0x258] sm:$0xff] }
 0x19b   :  { %3536 = vmatpush1.bf16.msra.mxu0 %v5367_v25  ;;  %3700 = vmatpush1.bf16.msra.mxu1 %v5369_v22  ;;  %v310_v25 = vld [vmem:[#allocation8 + $0x130] sm:$0xff]  ;;  %v307_v22 = vld [vmem:[#allocation8 + $0x118] sm:$0xff] }
 0x19c   :  { %3537 = vmatprep.subr.bf16.mxu0 %v5376_v48  ;;  %3701 = vmatprep.subr.bf16.mxu1 %v5378_v1  ;;  %v311_v48 = vld [vmem:[#allocation8 + $0x138] sm:$0xff]  ;;  %v4907_v1 = vcombine.low %v298_v34, %v302_v38  ;;  %v4916_v52 = vcombine.high %v306_v47, %v310_v25  ;;  %v346_v34 = vld [vmem:[#allocation8 + $0x250] sm:$0xff] }
 0x19d   :  { %v350_v38 = vld [vmem:[#allocation8 + $0x270] sm:$0xff]  ;;  %v351_v37 = vld [vmem:[#allocation8 + $0x278] sm:$0xff] }
 0x19f   :  { %3538 = vmatpush1.bf16.msra.mxu0 %v5375_v58  ;;  %3702 = vmatpush1.bf16.msra.mxu1 %v5377_v61  ;;  %v319_v58 = vld [vmem:[#allocation8 + $0x178] sm:$0xff]  ;;  %v4915_v61 = vcombine.low %v306_v47, %v310_v25  ;;  %v354_v47 = vld [vmem:[#allocation8 + $0x290] sm:$0xff] }
 0x1a0   :  { %3539 = vmatprep.subr.bf16.mxu0 %v5384_v62  ;;  %3703 = vmatprep.subr.bf16.mxu1 %v5386_v42  ;;  %v4917_v62 = vcombine.low %v307_v22, %v311_v48  ;;  %v4924_v42 = vcombine.high %v314_v53, %v318_v54  ;;  %v4926_v0 = vcombine.high %v315_v55, %v319_v58  ;;  %v358_v25 = vld [vmem:[#allocation8 + $0x2b0] sm:$0xff] }
 0x1a3   :  { %3540 = vmatpush1.bf16.msra.mxu0 %v5383_v6  ;;  %3704 = vmatpush1.bf16.msra.mxu1 %v5385_v7  ;;  %v4923_v6 = vcombine.low %v314_v53, %v318_v54  ;;  %v4925_v7 = vcombine.low %v315_v55, %v319_v58  ;;  %v362_v53 = vld [vmem:[#allocation8 + $0x2d0] sm:$0xff]  ;;  %v363_v55 = vld [vmem:[#allocation8 + $0x2d8] sm:$0xff] }
 0x1a4   :  { %3714 = vmatprep.subr.bf16.mxu0 %v4884_v8  ;;  %3878 = vmatprep.subr.bf16.mxu1 %v4886_v57  ;;  %v4932_v8 = vcombine.high %v322_v2, %v326_v3  ;;  %v4934_v57 = vcombine.high %v323_v4, %v327_v5  ;;  %v366_v54 = vld [vmem:[#allocation8 + $0x2f0] sm:$0xff]  ;;  %v367_v58 = vld [vmem:[#allocation8 + $0x2f8] sm:$0xff] }
 0x1a6   :  { %3542 = vmatmul.mubr.bf16.vlgmr.msra.gmra.mrb[0].mxu0 %v6256_v10  ;;  %3706 = vmatmul.mubr.bf16.vlgmr.msra.gmra.mrb[0].mxu1 %v6256_v10 }
 0x1a7   :  { %3715 = vmatpush1.bf16.msra.mxu0 %v4883_v14  ;;  %3879 = vmatpush1.bf16.msra.mxu1 %v4885_v63  ;;  %v4931_v14 = vcombine.low %v322_v2, %v326_v3  ;;  %v4933_v63 = vcombine.low %v323_v4, %v327_v5  ;;  %v370_v2 = vld [vmem:[#allocation8 + $0x310] sm:$0xff]  ;;  %v371_v4 = vld [vmem:[#allocation8 + $0x318] sm:$0xff] }
 0x1a8   :  { %3716 = vmatprep.subr.bf16.mxu0 %v4892_v18  ;;  %3880 = vmatprep.subr.bf16.mxu1 %v4894_v19  ;;  %v4940_v18 = vcombine.high %v330_v56, %v334_v9  ;;  %v4942_v19 = vcombine.high %v331_v12, %v335_v13  ;;  %v374_v3 = vld [vmem:[#allocation8 + $0x330] sm:$0xff]  ;;  %v375_v5 = vld [vmem:[#allocation8 + $0x338] sm:$0xff] }
 0x1a9   :  { %3746 = vmatprep.mubr.bf16.mxu0 %v6162_v20  ;;  %3910 = vmatprep.mubr.bf16.mxu1 %v6162_v20  ;;  %v4918_v20 = vcombine.high %v307_v22, %v311_v48  ;;  %v355_v22 = vld [vmem:[#allocation8 + $0x298] sm:$0xff] }
 0x1aa   :  { %v359_v48 = vld [vmem:[#allocation8 + $0x2b8] sm:$0xff] }
 0x1ab   :  { %3717 = vmatpush1.bf16.msra.mxu0 %v4891_v30  ;;  %3881 = vmatpush1.bf16.msra.mxu1 %v4893_v31  ;;  %v4939_v30 = vcombine.low %v330_v56, %v334_v9  ;;  %v4941_v31 = vcombine.low %v331_v12, %v335_v13  ;;  %v378_v56 = vld [vmem:[#allocation8 + $0x350] sm:$0xff]  ;;  %v379_v12 = vld [vmem:[#allocation8 + $0x358] sm:$0xff] }
 0x1ac   :  { %3718 = vmatprep.subr.bf16.mxu0 %v4900_v33  ;;  %3882 = vmatprep.subr.bf16.mxu1 %v4902_v41  ;;  %v4948_v33 = vcombine.high %v338_v21, %v342_v23  ;;  %v4950_v41 = vcombine.high %v339_v27, %v343_v28  ;;  %v382_v9 = vld [vmem:[#allocation8 + $0x370] sm:$0xff]  ;;  %v383_v13 = vld [vmem:[#allocation8 + $0x378] sm:$0xff] }
 0x1af   :  { %3719 = vmatpush1.bf16.msra.mxu0 %v4899_v40  ;;  %3883 = vmatpush1.bf16.msra.mxu1 %v4901_v43  ;;  %v4947_v40 = vcombine.low %v338_v21, %v342_v23  ;;  %v4949_v43 = vcombine.low %v339_v27, %v343_v28  ;;  %v386_v21 = vld [vmem:[#allocation8 + $0x390] sm:$0xff]  ;;  %v387_v27 = vld [vmem:[#allocation8 + $0x398] sm:$0xff] }
 0x1b0   :  { %3720 = vmatprep.subr.bf16.mxu0 %v4908_v45  ;;  %3884 = vmatprep.subr.bf16.mxu1 %v4910_v46  ;;  %v4956_v45 = vcombine.high %v346_v34, %v350_v38  ;;  %v4958_v46 = vcombine.high %v347_v35, %v351_v37  ;;  %v390_v23 = vld [vmem:[#allocation8 + $0x3b0] sm:$0xff]  ;;  %v391_v28 = vld [vmem:[#allocation8 + $0x3b8] sm:$0xff] }
 0x1b3   :  { %3721 = vmatpush1.bf16.msra.mxu0 %v4907_v1  ;;  %3885 = vmatpush1.bf16.msra.mxu1 %v4909_v51  ;;  %v4955_v1 = vcombine.low %v346_v34, %v350_v38  ;;  %v4957_v51 = vcombine.low %v347_v35, %v351_v37  ;;  %v394_v34 = vld [vmem:[#allocation8 + $0x3d0] sm:$0xff]  ;;  %v395_v35 = vld [vmem:[#allocation8 + $0x3d8] sm:$0xff] }
 0x1b4   :  { %3722 = vmatprep.subr.bf16.mxu0 %v4916_v52  ;;  %3886 = vmatprep.subr.bf16.mxu1 %v4918_v20  ;;  %v4964_v52 = vcombine.high %v354_v47, %v358_v25  ;;  %v4966_v20 = vcombine.high %v355_v22, %v359_v48  ;;  %v398_v38 = vld [vmem:[#allocation8 + $0x3f0] sm:$0xff]  ;;  %v399_v37 = vld [vmem:[#allocation8 + $0x3f8] sm:$0xff] }
 0x1b7   :  { %3723 = vmatpush1.bf16.msra.mxu0 %v4915_v61  ;;  %3887 = vmatpush1.bf16.msra.mxu1 %v4917_v62  ;;  %v4963_v61 = vcombine.low %v354_v47, %v358_v25  ;;  %v4965_v62 = vcombine.low %v355_v22, %v359_v48  ;;  %v402_v47 = vld [vmem:[#allocation8 + $0x410] sm:$0xff]  ;;  %v403_v22 = vld [vmem:[#allocation8 + $0x418] sm:$0xff] }
 0x1b8   :  { %3724 = vmatprep.subr.bf16.mxu0 %v4924_v42  ;;  %3888 = vmatprep.subr.bf16.mxu1 %v4926_v0  ;;  %v4972_v42 = vcombine.high %v362_v53, %v366_v54  ;;  %v4974_v0 = vcombine.high %v363_v55, %v367_v58  ;;  %v406_v25 = vld [vmem:[#allocation8 + $0x430] sm:$0xff]  ;;  %v407_v48 = vld [vmem:[#allocation8 + $0x438] sm:$0xff] }
 0x1bb   :  { %3725 = vmatpush1.bf16.msra.mxu0 %v4923_v6  ;;  %3889 = vmatpush1.bf16.msra.mxu1 %v4925_v7  ;;  %v4971_v6 = vcombine.low %v362_v53, %v366_v54  ;;  %v4973_v7 = vcombine.low %v363_v55, %v367_v58  ;;  %v410_v53 = vld [vmem:[#allocation8 + $0x450] sm:$0xff]  ;;  %v411_v55 = vld [vmem:[#allocation8 + $0x458] sm:$0xff] }
 0x1bc   :  { %3726 = vmatprep.subr.bf16.mxu0 %v4932_v8  ;;  %3890 = vmatprep.subr.bf16.mxu1 %v4934_v57  ;;  %v4980_v8 = vcombine.high %v370_v2, %v374_v3  ;;  %v4982_v57 = vcombine.high %v371_v4, %v375_v5  ;;  %v414_v54 = vld [vmem:[#allocation8 + $0x470] sm:$0xff]  ;;  %v415_v58 = vld [vmem:[#allocation8 + $0x478] sm:$0xff] }
 0x1bf   :  { %3727 = vmatpush1.bf16.msra.mxu0 %v4931_v14  ;;  %3891 = vmatpush1.bf16.msra.mxu1 %v4933_v63  ;;  %v4979_v14 = vcombine.low %v370_v2, %v374_v3  ;;  %v4981_v63 = vcombine.low %v371_v4, %v375_v5  ;;  %v418_v2 = vld [vmem:[#allocation8 + $0x490] sm:$0xff]  ;;  %v419_v4 = vld [vmem:[#allocation8 + $0x498] sm:$0xff] }
 0x1c0   :  { %3728 = vmatprep.subr.bf16.mxu0 %v4940_v18  ;;  %3892 = vmatprep.subr.bf16.mxu1 %v4942_v19  ;;  %v4988_v18 = vcombine.high %v378_v56, %v382_v9  ;;  %v4990_v19 = vcombine.high %v379_v12, %v383_v13  ;;  %v422_v3 = vld [vmem:[#allocation8 + $0x4b0] sm:$0xff]  ;;  %v423_v5 = vld [vmem:[#allocation8 + $0x4b8] sm:$0xff] }
 0x1c3   :  { %3729 = vmatpush1.bf16.msra.mxu0 %v4939_v30  ;;  %3893 = vmatpush1.bf16.msra.mxu1 %v4941_v31  ;;  %v4987_v30 = vcombine.low %v378_v56, %v382_v9  ;;  %v4989_v31 = vcombine.low %v379_v12, %v383_v13  ;;  %v426_v56 = vld [vmem:[#allocation8 + $0x4d0] sm:$0xff]  ;;  %v427_v12 = vld [vmem:[#allocation8 + $0x4d8] sm:$0xff] }
 0x1c4   :  { %3730 = vmatprep.subr.bf16.mxu0 %v4948_v33  ;;  %3894 = vmatprep.subr.bf16.mxu1 %v4950_v41  ;;  %v4996_v33 = vcombine.high %v386_v21, %v390_v23  ;;  %v4998_v41 = vcombine.high %v387_v27, %v391_v28  ;;  %v430_v9 = vld [vmem:[#allocation8 + $0x4f0] sm:$0xff]  ;;  %v431_v13 = vld [vmem:[#allocation8 + $0x4f8] sm:$0xff] }
 0x1c7   :  { %3731 = vmatpush1.bf16.msra.mxu0 %v4947_v40  ;;  %3895 = vmatpush1.bf16.msra.mxu1 %v4949_v43  ;;  %v4995_v40 = vcombine.low %v386_v21, %v390_v23  ;;  %v4997_v43 = vcombine.low %v387_v27, %v391_v28  ;;  %v438_v21 = vld [vmem:[#allocation8 + $0x530] sm:$0xff]  ;;  %v435_v23 = vld [vmem:[#allocation8 + $0x518] sm:$0xff]  ;;  %v5035_v28 = vcombine.low %v426_v56, %v430_v9 }
 0x1c8   :  { %3732 = vmatprep.subr.bf16.mxu0 %v4956_v45  ;;  %3896 = vmatprep.subr.bf16.mxu1 %v4958_v46  ;;  %v5004_v45 = vcombine.high %v394_v34, %v398_v38  ;;  %v5006_v46 = vcombine.high %v395_v35, %v399_v37  ;;  %v439_v27 = vld [vmem:[#allocation8 + $0x538] sm:$0xff] }
 0x1cb   :  { %3733 = vmatpush1.bf16.msra.mxu0 %v4955_v1  ;;  %3897 = vmatpush1.bf16.msra.mxu1 %v4957_v51  ;;  %v5003_v1 = vcombine.low %v394_v34, %v398_v38  ;;  %v5005_v51 = vcombine.low %v395_v35, %v399_v37  ;;  %v443_v34 = vld [vmem:[#allocation8 + $0x558] sm:$0xff]  ;;  %v5045_v37 = vcombine.low %v435_v23, %v439_v27 }
 0x1cc   :  { %3734 = vmatprep.subr.bf16.mxu0 %v4964_v52  ;;  %3898 = vmatprep.subr.bf16.mxu1 %v4966_v20  ;;  %v5012_v52 = vcombine.high %v402_v47, %v406_v25  ;;  %v5014_v20 = vcombine.high %v403_v22, %v407_v48  ;;  %v447_v38 = vld [vmem:[#allocation8 + $0x578] sm:$0xff] }
 0x1cf   :  { %3735 = vmatpush1.bf16.msra.mxu0 %v4963_v61  ;;  %3899 = vmatpush1.bf16.msra.mxu1 %v4965_v62  ;;  %v5011_v61 = vcombine.low %v402_v47, %v406_v25  ;;  %v5013_v62 = vcombine.low %v403_v22, %v407_v48  ;;  %v451_v47 = vld [vmem:[#allocation8 + $0x598] sm:$0xff]  ;;  %v5053_v48 = vcombine.low %v443_v34, %v447_v38 }
 0x1d0   :  { %3736 = vmatprep.subr.bf16.mxu0 %v4972_v42  ;;  %3900 = vmatprep.subr.bf16.mxu1 %v4974_v0  ;;  %v5020_v42 = vcombine.high %v410_v53, %v414_v54  ;;  %v5022_v0 = vcombine.high %v411_v55, %v415_v58  ;;  %v455_v25 = vld [vmem:[#allocation8 + $0x5b8] sm:$0xff] }
 0x1d3   :  { %3737 = vmatpush1.bf16.msra.mxu0 %v4971_v6  ;;  %3901 = vmatpush1.bf16.msra.mxu1 %v4973_v7  ;;  %v5019_v6 = vcombine.low %v410_v53, %v414_v54  ;;  %v5021_v7 = vcombine.low %v411_v55, %v415_v58  ;;  %v459_v53 = vld [vmem:[#allocation8 + $0x5d8] sm:$0xff]  ;;  %v5061_v58 = vcombine.low %v451_v47, %v455_v25 }
 0x1d4   :  { %3738 = vmatprep.subr.bf16.mxu0 %v4980_v8  ;;  %3902 = vmatprep.subr.bf16.mxu1 %v4982_v57  ;;  %v5028_v8 = vcombine.high %v418_v2, %v422_v3  ;;  %v5030_v57 = vcombine.high %v419_v4, %v423_v5  ;;  %v463_v54 = vld [vmem:[#allocation8 + $0x5f8] sm:$0xff] }
 0x1d7   :  { %3739 = vmatpush1.bf16.msra.mxu0 %v4979_v14  ;;  %3903 = vmatpush1.bf16.msra.mxu1 %v4981_v63  ;;  %v5027_v14 = vcombine.low %v418_v2, %v422_v3  ;;  %v5036_v63 = vcombine.high %v426_v56, %v430_v9  ;;  %v467_v2 = vld [vmem:[#allocation8 + $0x618] sm:$0xff] }
 0x1d8   :  { %3740 = vmatprep.subr.bf16.mxu0 %v4988_v18  ;;  %3904 = vmatprep.subr.bf16.mxu1 %v4990_v19  ;;  %v5038_v18 = vcombine.high %v427_v12, %v431_v13  ;;  %v434_v19 = vld [vmem:[#allocation8 + $0x510] sm:$0xff]  ;;  %v471_v3 = vld [vmem:[#allocation8 + $0x638] sm:$0xff] }
 0x1d9   :  { %v5043_v35 = vcombine.low %v434_v19, %v438_v21  ;;  %v475_v56 = vld [vmem:[#allocation8 + $0x658] sm:$0xff] }
 0x1da   :  { %v479_v9 = vld [vmem:[#allocation8 + $0x678] sm:$0xff] }
 0x1db   :  { %3741 = vmatpush1.bf16.msra.mxu0 %v4987_v30  ;;  %3905 = vmatpush1.bf16.msra.mxu1 %v4989_v31  ;;  %v5037_v30 = vcombine.low %v427_v12, %v431_v13  ;;  %v5044_v31 = vcombine.high %v434_v19, %v438_v21  ;;  %v5077_v13 = vcombine.low %v467_v2, %v471_v3  ;;  %v483_v19 = vld [vmem:[#allocation8 + $0x698] sm:$0xff] }
 0x1dc   :  { %3742 = vmatprep.subr.bf16.mxu0 %v4996_v33  ;;  %3906 = vmatprep.subr.bf16.mxu1 %v4998_v41  ;;  %v442_v33 = vld [vmem:[#allocation8 + $0x550] sm:$0xff]  ;;  %v487_v21 = vld [vmem:[#allocation8 + $0x6b8] sm:$0xff] }
 0x1dd   :  { %v446_v41 = vld [vmem:[#allocation8 + $0x570] sm:$0xff] }
 0x1de   :  { %v5051_v22 = vcombine.low %v442_v33, %v446_v41 }
 0x1df   :  { %3743 = vmatpush1.bf16.msra.mxu0 %v4995_v40  ;;  %3907 = vmatpush1.bf16.msra.mxu1 %v4997_v43  ;;  %v5052_v40 = vcombine.high %v442_v33, %v446_v41  ;;  %v5054_v43 = vcombine.high %v443_v34, %v447_v38  ;;  %v491_v33 = vld [vmem:[#allocation8 + $0x6d8] sm:$0xff]  ;;  %v5093_v38 = vcombine.low %v483_v19, %v487_v21 }
 0x1e0   :  { %3744 = vmatprep.subr.bf16.mxu0 %v5004_v45  ;;  %3908 = vmatprep.subr.bf16.mxu1 %v5006_v46  ;;  %v450_v45 = vld [vmem:[#allocation8 + $0x590] sm:$0xff]  ;;  %v495_v41 = vld [vmem:[#allocation8 + $0x6f8] sm:$0xff] }
 0x1e1   :  { %v454_v46 = vld [vmem:[#allocation8 + $0x5b0] sm:$0xff] }
 0x1e2   :  { %v5059_v55 = vcombine.low %v450_v45, %v454_v46 }
 0x1e3   :  { %3745 = vmatpush1.bf16.msra.mxu0 %v5003_v1  ;;  %3909 = vmatpush1.bf16.msra.mxu1 %v5005_v51  ;;  %v5060_v1 = vcombine.high %v450_v45, %v454_v46  ;;  %v5062_v51 = vcombine.high %v451_v47, %v455_v25  ;;  %v499_v45 = vld [vmem:[#allocation8 + $0x718] sm:$0xff]  ;;  %v5101_v25 = vcombine.low %v491_v33, %v495_v41 }
 0x1e4   :  { %3755 = vmatprep.subr.bf16.mxu0 %v5012_v52  ;;  %3919 = vmatprep.subr.bf16.mxu1 %v5014_v20  ;;  %v458_v52 = vld [vmem:[#allocation8 + $0x5d0] sm:$0xff]  ;;  %v503_v46 = vld [vmem:[#allocation8 + $0x738] sm:$0xff] }
 0x1e5   :  { %v462_v20 = vld [vmem:[#allocation8 + $0x5f0] sm:$0xff] }
 0x1e6   :  { %3747 = vmatmul.mubr.bf16.vlgmr.msra.gmra.mrb[4].mxu0 %v6184_v44  ;;  %3911 = vmatmul.mubr.bf16.vlgmr.msra.gmra.mrb[4].mxu1 %v6184_v44  ;;  %v5029_v44 = vcombine.low %v419_v4, %v423_v5  ;;  %v5067_v4 = vcombine.low %v458_v52, %v462_v20  ;;  %v5069_v5 = vcombine.low %v459_v53, %v463_v54 }
 0x1e7   :  { %3756 = vmatpush1.bf16.msra.mxu0 %v5011_v61  ;;  %3920 = vmatpush1.bf16.msra.mxu1 %v5013_v62  ;;  %v5068_v61 = vcombine.high %v458_v52, %v462_v20  ;;  %v5070_v62 = vcombine.high %v459_v53, %v463_v54  ;;  %v507_v52 = vld [vmem:[#allocation8 + $0x758] sm:$0xff]  ;;  %v5109_v54 = vcombine.low %v499_v45, %v503_v46 }
 0x1e8   :  { %3757 = vmatprep.subr.bf16.mxu0 %v5020_v42  ;;  %3921 = vmatprep.subr.bf16.mxu1 %v5022_v0  ;;  %v466_v42 = vld [vmem:[#allocation8 + $0x610] sm:$0xff]  ;;  %v511_v20 = vld [vmem:[#allocation8 + $0x778] sm:$0xff] }
 0x1e9   :  { %3787 = vmatprep.mubr.bf16.mxu0 %v6186_v60  ;;  %3951 = vmatprep.mubr.bf16.mxu1 %v6186_v60  ;;  %v5046_v60 = vcombine.high %v435_v23, %v439_v27  ;;  %v470_v0 = vld [vmem:[#allocation8 + $0x630] sm:$0xff]  ;;  %v5085_v27 = vcombine.low %v475_v56, %v479_v9 }
 0x1ea   :  { %v5075_v12 = vcombine.low %v466_v42, %v470_v0 }
 0x1eb   :  { %3758 = vmatpush1.bf16.msra.mxu0 %v5019_v6  ;;  %3922 = vmatpush1.bf16.msra.mxu1 %v5021_v7  ;;  %v5076_v6 = vcombine.high %v466_v42, %v470_v0  ;;  %v5078_v7 = vcombine.high %v467_v2, %v471_v3  ;;  %v515_v42 = vld [vmem:[#allocation8 + $0x798] sm:$0xff]  ;;  %v5117_v3 = vcombine.low %v507_v52, %v511_v20 }
 0x1ec   :  { %3759 = vmatprep.subr.bf16.mxu0 %v5028_v8  ;;  %3923 = vmatprep.subr.bf16.mxu1 %v5030_v57  ;;  %v474_v8 = vld [vmem:[#allocation8 + $0x650] sm:$0xff]  ;;  %v519_v0 = vld [vmem:[#allocation8 + $0x7b8] sm:$0xff] }
 0x1ed   :  { %v478_v57 = vld [vmem:[#allocation8 + $0x670] sm:$0xff] }
 0x1ee   :  { %v5083_v23 = vcombine.low %v474_v8, %v478_v57 }
 0x1ef   :  { %3760 = vmatpush1.bf16.msra.mxu0 %v5027_v14  ;;  %3924 = vmatpush1.bf16.msra.mxu1 %v5029_v44  ;;  %v5084_v14 = vcombine.high %v474_v8, %v478_v57  ;;  %v5086_v44 = vcombine.high %v475_v56, %v479_v9  ;;  %v523_v8 = vld [vmem:[#allocation8 + $0x7d8] sm:$0xff]  ;;  %v5125_v9 = vcombine.low %v515_v42, %v519_v0 }
 0x1f0   :  { %3761 = vmatprep.subr.bf16.mxu0 %v5036_v63  ;;  %3925 = vmatprep.subr.bf16.mxu1 %v5038_v18  ;;  %v482_v63 = vld [vmem:[#allocation8 + $0x690] sm:$0xff]  ;;  %v527_v57 = vld [vmem:[#allocation8 + $0x7f8] sm:$0xff] }
 0x1f1   :  { %v486_v18 = vld [vmem:[#allocation8 + $0x6b0] sm:$0xff] }
 0x1f2   :  { %v5091_v34 = vcombine.low %v482_v63, %v486_v18 }
 0x1f3   :  { %3762 = vmatpush1.bf16.msra.mxu0 %v5035_v28  ;;  %3926 = vmatpush1.bf16.msra.mxu1 %v5037_v30  ;;  %v5092_v28 = vcombine.high %v482_v63, %v486_v18  ;;  %v5094_v30 = vcombine.high %v483_v19, %v487_v21  ;;  %v531_v63 = vld [vmem:[#allocation8 + $0x818] sm:$0xff]  ;;  %v5133_v21 = vcombine.low %v523_v8, %v527_v57 }
 0x1f4   :  { %3763 = vmatprep.subr.bf16.mxu0 %v5044_v31  ;;  %3927 = vmatprep.subr.bf16.mxu1 %v5046_v60  ;;  %v490_v31 = vld [vmem:[#allocation8 + $0x6d0] sm:$0xff]  ;;  %v535_v18 = vld [vmem:[#allocation8 + $0x838] sm:$0xff] }
 0x1f5   :  { %v494_v60 = vld [vmem:[#allocation8 + $0x6f0] sm:$0xff] }
 0x1f6   :  { %v5099_v47 = vcombine.low %v490_v31, %v494_v60 }
 0x1f7   :  { %3764 = vmatpush1.bf16.msra.mxu0 %v5043_v35  ;;  %3928 = vmatpush1.bf16.msra.mxu1 %v5045_v37  ;;  %v5100_v35 = vcombine.high %v490_v31, %v494_v60  ;;  %v5102_v37 = vcombine.high %v491_v33, %v495_v41  ;;  %v539_v31 = vld [vmem:[#allocation8 + $0x858] sm:$0xff]  ;;  %v5141_v41 = vcombine.low %v531_v63, %v535_v18 }
 0x1f8   :  { %3765 = vmatprep.subr.bf16.mxu0 %v5052_v40  ;;  %3929 = vmatprep.subr.bf16.mxu1 %v5054_v43  ;;  %v498_v40 = vld [vmem:[#allocation8 + $0x710] sm:$0xff]  ;;  %v543_v60 = vld [vmem:[#allocation8 + $0x878] sm:$0xff] }
 0x1f9   :  { %v502_v43 = vld [vmem:[#allocation8 + $0x730] sm:$0xff] }
 0x1fa   :  { %v5107_v53 = vcombine.low %v498_v40, %v502_v43 }
 0x1fb   :  { %3766 = vmatpush1.bf16.msra.mxu0 %v5051_v22  ;;  %3930 = vmatpush1.bf16.msra.mxu1 %v5053_v48  ;;  %v5108_v22 = vcombine.high %v498_v40, %v502_v43  ;;  %v5110_v48 = vcombine.high %v499_v45, %v503_v46  ;;  %v547_v40 = vld [vmem:[#allocation8 + $0x898] sm:$0xff]  ;;  %v5149_v46 = vcombine.low %v539_v31, %v543_v60 }
 0x1fc   :  { %3767 = vmatprep.subr.bf16.mxu0 %v5060_v1  ;;  %3931 = vmatprep.subr.bf16.mxu1 %v5062_v51  ;;  %v506_v1 = vld [vmem:[#allocation8 + $0x750] sm:$0xff]  ;;  %v551_v43 = vld [vmem:[#allocation8 + $0x8b8] sm:$0xff] }
 0x1fd   :  { %v510_v51 = vld [vmem:[#allocation8 + $0x770] sm:$0xff] }
 0x1fe   :  { %v5115_v2 = vcombine.low %v506_v1, %v510_v51 }
 0x1ff   :  { %3768 = vmatpush1.bf16.msra.mxu0 %v5059_v55  ;;  %3932 = vmatpush1.bf16.msra.mxu1 %v5061_v58  ;;  %v5116_v55 = vcombine.high %v506_v1, %v510_v51  ;;  %v5118_v58 = vcombine.high %v507_v52, %v511_v20  ;;  %v555_v1 = vld [vmem:[#allocation8 + $0x8d8] sm:$0xff] }
 0x200   :  { %3769 = vmatprep.subr.bf16.mxu0 %v5068_v61  ;;  %3933 = vmatprep.subr.bf16.mxu1 %v5070_v62  ;;  %v514_v61 = vld [vmem:[#allocation8 + $0x790] sm:$0xff]  ;;  %v559_v51 = vld [vmem:[#allocation8 + $0x8f8] sm:$0xff] }
 0x201   :  { %v518_v62 = vld [vmem:[#allocation8 + $0x7b0] sm:$0xff] }
 0x202   :  { %v5123_v56 = vcombine.low %v514_v61, %v518_v62 }
 0x203   :  { %3770 = vmatpush1.bf16.msra.mxu0 %v5067_v4  ;;  %3934 = vmatpush1.bf16.msra.mxu1 %v5069_v5  ;;  %v5124_v4 = vcombine.high %v514_v61, %v518_v62  ;;  %v5126_v5 = vcombine.high %v515_v42, %v519_v0  ;;  %v567_v61 = vld [vmem:[#allocation8 + $0x938] sm:$0xff]  ;;  %v5165_v42 = vcombine.low %v555_v1, %v559_v51 }
 0x204   :  { %3771 = vmatprep.subr.bf16.mxu0 %v5076_v6  ;;  %3935 = vmatprep.subr.bf16.mxu1 %v5078_v7  ;;  %v522_v6 = vld [vmem:[#allocation8 + $0x7d0] sm:$0xff] }
 0x205   :  { %v526_v7 = vld [vmem:[#allocation8 + $0x7f0] sm:$0xff] }
 0x206   :  { %v5131_v19 = vcombine.low %v522_v6, %v526_v7 }
 0x207   :  { %3772 = vmatpush1.bf16.msra.mxu0 %v5075_v12  ;;  %3936 = vmatpush1.bf16.msra.mxu1 %v5077_v13  ;;  %v5132_v12 = vcombine.high %v522_v6, %v526_v7  ;;  %v5134_v13 = vcombine.high %v523_v8, %v527_v57 }
 0x208   :  { %3773 = vmatprep.subr.bf16.mxu0 %v5084_v14  ;;  %3937 = vmatprep.subr.bf16.mxu1 %v5086_v44  ;;  %v530_v14 = vld [vmem:[#allocation8 + $0x810] sm:$0xff] }
 0x209   :  { %v534_v44 = vld [vmem:[#allocation8 + $0x830] sm:$0xff] }
 0x20a   :  { %v5139_v33 = vcombine.low %v530_v14, %v534_v44 }
 0x20b   :  { %3774 = vmatpush1.bf16.msra.mxu0 %v5083_v23  ;;  %3938 = vmatpush1.bf16.msra.mxu1 %v5085_v27  ;;  %v5140_v23 = vcombine.high %v530_v14, %v534_v44  ;;  %v5142_v27 = vcombine.high %v531_v63, %v535_v18 }
 0x20c   :  { %3775 = vmatprep.subr.bf16.mxu0 %v5092_v28  ;;  %3939 = vmatprep.subr.bf16.mxu1 %v5094_v30  ;;  %v538_v28 = vld [vmem:[#allocation8 + $0x850] sm:$0xff] }
 0x20d   :  { %v542_v30 = vld [vmem:[#allocation8 + $0x870] sm:$0xff] }
 0x20e   :  { %v5147_v45 = vcombine.low %v538_v28, %v542_v30 }
 0x20f   :  { %3776 = vmatpush1.bf16.msra.mxu0 %v5091_v34  ;;  %3940 = vmatpush1.bf16.msra.mxu1 %v5093_v38  ;;  %v5148_v34 = vcombine.high %v538_v28, %v542_v30  ;;  %v5150_v38 = vcombine.high %v539_v31, %v543_v60 }
 0x210   :  { %3777 = vmatprep.subr.bf16.mxu0 %v5100_v35  ;;  %3941 = vmatprep.subr.bf16.mxu1 %v5102_v37  ;;  %v546_v35 = vld [vmem:[#allocation8 + $0x890] sm:$0xff] }
 0x211   :  { %v550_v37 = vld [vmem:[#allocation8 + $0x8b0] sm:$0xff] }
 0x212   :  { %v5155_v52 = vcombine.low %v546_v35, %v550_v37 }
 0x213   :  { %3778 = vmatpush1.bf16.msra.mxu0 %v5099_v47  ;;  %3942 = vmatpush1.bf16.msra.mxu1 %v5101_v25  ;;  %v5156_v47 = vcombine.high %v546_v35, %v550_v37  ;;  %v5158_v25 = vcombine.high %v547_v40, %v551_v43 }
 0x214   :  { %3779 = vmatprep.subr.bf16.mxu0 %v5108_v22  ;;  %3943 = vmatprep.subr.bf16.mxu1 %v5110_v48  ;;  %v554_v22 = vld [vmem:[#allocation8 + $0x8d0] sm:$0xff] }
 0x215   :  { %v558_v48 = vld [vmem:[#allocation8 + $0x8f0] sm:$0xff] }
 0x216   :  { %v5164_v20 = vcombine.high %v554_v22, %v558_v48  ;;  %v5163_v62 = vcombine.low %v554_v22, %v558_v48 }
 0x217   :  { %3780 = vmatpush1.bf16.msra.mxu0 %v5107_v53  ;;  %3944 = vmatpush1.bf16.msra.mxu1 %v5109_v54  ;;  %v5166_v53 = vcombine.high %v555_v1, %v559_v51  ;;  %v562_v54 = vld [vmem:[#allocation8 + $0x910] sm:$0xff] }
 0x218   :  { %3781 = vmatprep.subr.bf16.mxu0 %v5116_v55  ;;  %3945 = vmatprep.subr.bf16.mxu1 %v5118_v58  ;;  %v566_v55 = vld [vmem:[#allocation8 + $0x930] sm:$0xff]  ;;  %v563_v58 = vld [vmem:[#allocation8 + $0x918] sm:$0xff] }
 0x219   :  { %v5172_v0 = vcombine.high %v562_v54, %v566_v55  ;;  %v5171_v6 = vcombine.low %v562_v54, %v566_v55  ;;  %v5173_v7 = vcombine.low %v563_v58, %v567_v61 }
 0x21b   :  { %3782 = vmatpush1.bf16.msra.mxu0 %v5115_v2  ;;  %3946 = vmatpush1.bf16.msra.mxu1 %v5117_v3  ;;  %v570_v2 = vld [vmem:[#allocation8 + $0x950] sm:$0xff] }
 0x21c   :  { %3783 = vmatprep.subr.bf16.mxu0 %v5124_v4  ;;  %3947 = vmatprep.subr.bf16.mxu1 %v5126_v5  ;;  %v574_v3 = vld [vmem:[#allocation8 + $0x970] sm:$0xff]  ;;  %v571_v4 = vld [vmem:[#allocation8 + $0x958] sm:$0xff] }
 0x21d   :  { %v575_v5 = vld [vmem:[#allocation8 + $0x978] sm:$0xff]  ;;  %v5180_v8 = vcombine.high %v570_v2, %v574_v3  ;;  %v5179_v14 = vcombine.low %v570_v2, %v574_v3 }
 0x21e   :  { %v5182_v57 = vcombine.high %v571_v4, %v575_v5  ;;  %v5181_v44 = vcombine.low %v571_v4, %v575_v5 }
 0x21f   :  { %3784 = vmatpush1.bf16.msra.mxu0 %v5123_v56  ;;  %3948 = vmatpush1.bf16.msra.mxu1 %v5125_v9  ;;  %v578_v56 = vld [vmem:[#allocation8 + $0x990] sm:$0xff] }
 0x220   :  { %3785 = vmatprep.subr.bf16.mxu0 %v5132_v12  ;;  %3949 = vmatprep.subr.bf16.mxu1 %v5134_v13  ;;  %v582_v9 = vld [vmem:[#allocation8 + $0x9b0] sm:$0xff]  ;;  %v579_v12 = vld [vmem:[#allocation8 + $0x998] sm:$0xff] }
 0x221   :  { %v583_v13 = vld [vmem:[#allocation8 + $0x9b8] sm:$0xff]  ;;  %v5188_v63 = vcombine.high %v578_v56, %v582_v9  ;;  %v5187_v28 = vcombine.low %v578_v56, %v582_v9 }
 0x222   :  { %v5190_v18 = vcombine.high %v579_v12, %v583_v13  ;;  %v5189_v30 = vcombine.low %v579_v12, %v583_v13 }
 0x223   :  { %3786 = vmatpush1.bf16.msra.mxu0 %v5131_v19  ;;  %3950 = vmatpush1.bf16.msra.mxu1 %v5133_v21  ;;  %v586_v19 = vld [vmem:[#allocation8 + $0x9d0] sm:$0xff] }
 0x224   :  { %3796 = vmatprep.subr.bf16.mxu0 %v5140_v23  ;;  %3960 = vmatprep.subr.bf16.mxu1 %v5142_v27  ;;  %v590_v21 = vld [vmem:[#allocation8 + $0x9f0] sm:$0xff]  ;;  %v587_v23 = vld [vmem:[#allocation8 + $0x9d8] sm:$0xff] }
 0x225   :  { %v591_v27 = vld [vmem:[#allocation8 + $0x9f8] sm:$0xff]  ;;  %v5196_v31 = vcombine.high %v586_v19, %v590_v21  ;;  %v5195_v35 = vcombine.low %v586_v19, %v590_v21 }
 0x226   :  { %3788 = vmatmul.mubr.bf16.vlgmr.msra.gmra.mrb[4].mxu0 %v6210_v24  ;;  %3952 = vmatmul.mubr.bf16.vlgmr.msra.gmra.mrb[4].mxu1 %v6210_v24  ;;  %v5157_v24 = vcombine.low %v547_v40, %v551_v43  ;;  %v5198_v60 = vcombine.high %v587_v23, %v591_v27  ;;  %v5197_v37 = vcombine.low %v587_v23, %v591_v27 }
 0x227   :  { %3797 = vmatpush1.bf16.msra.mxu0 %v5139_v33  ;;  %3961 = vmatpush1.bf16.msra.mxu1 %v5141_v41  ;;  %v594_v33 = vld [vmem:[#allocation8 + $0xa10] sm:$0xff] }
 0x228   :  { %3798 = vmatprep.subr.bf16.mxu0 %v5148_v34  ;;  %3962 = vmatprep.subr.bf16.mxu1 %v5150_v38  ;;  %v598_v41 = vld [vmem:[#allocation8 + $0xa30] sm:$0xff]  ;;  %v595_v34 = vld [vmem:[#allocation8 + $0xa18] sm:$0xff] }
 0x229   :  { %3828 = vmatprep.mubr.bf16.mxu0 %v6212_v36  ;;  %3992 = vmatprep.mubr.bf16.mxu1 %v6212_v36  ;;  %v5174_v36 = vcombine.high %v563_v58, %v567_v61  ;;  %v599_v38 = vld [vmem:[#allocation8 + $0xa38] sm:$0xff]  ;;  %v5204_v40 = vcombine.high %v594_v33, %v598_v41  ;;  %v5203_v22 = vcombine.low %v594_v33, %v598_v41 }
 0x22a   :  { %v5206_v43 = vcombine.high %v595_v34, %v599_v38  ;;  %v5205_v48 = vcombine.low %v595_v34, %v599_v38 }
 0x22b   :  { %3799 = vmatpush1.bf16.msra.mxu0 %v5147_v45  ;;  %3963 = vmatpush1.bf16.msra.mxu1 %v5149_v46  ;;  %v602_v45 = vld [vmem:[#allocation8 + $0xa50] sm:$0xff] }
 0x22c   :  { %3800 = vmatprep.subr.bf16.mxu0 %v5156_v47  ;;  %3964 = vmatprep.subr.bf16.mxu1 %v5158_v25  ;;  %v606_v46 = vld [vmem:[#allocation8 + $0xa70] sm:$0xff]  ;;  %v603_v47 = vld [vmem:[#allocation8 + $0xa58] sm:$0xff] }
 0x22d   :  { %v607_v25 = vld [vmem:[#allocation8 + $0xa78] sm:$0xff]  ;;  %v5212_v1 = vcombine.high %v602_v45, %v606_v46  ;;  %v5211_v54 = vcombine.low %v602_v45, %v606_v46 }
 0x22e   :  { %v5214_v51 = vcombine.high %v603_v47, %v607_v25  ;;  %v5213_v55 = vcombine.low %v603_v47, %v607_v25 }
 0x22f   :  { %3801 = vmatpush1.bf16.msra.mxu0 %v5155_v52  ;;  %3965 = vmatpush1.bf16.msra.mxu1 %v5157_v24  ;;  %v610_v52 = vld [vmem:[#allocation8 + $0xa90] sm:$0xff] }
 0x230   :  { %3802 = vmatprep.subr.bf16.mxu0 %v5164_v20  ;;  %3966 = vmatprep.subr.bf16.mxu1 %v5166_v53  ;;  %v614_v24 = vld [vmem:[#allocation8 + $0xab0] sm:$0xff]  ;;  %v611_v20 = vld [vmem:[#allocation8 + $0xa98] sm:$0xff] }
 0x231   :  { %v615_v53 = vld [vmem:[#allocation8 + $0xab8] sm:$0xff]  ;;  %v5220_v58 = vcombine.high %v610_v52, %v614_v24  ;;  %v5219_v2 = vcombine.low %v610_v52, %v614_v24 }
 0x232   :  { %v5222_v61 = vcombine.high %v611_v20, %v615_v53  ;;  %v5221_v3 = vcombine.low %v611_v20, %v615_v53 }
 0x233   :  { %3803 = vmatpush1.bf16.msra.mxu0 %v5163_v62  ;;  %3967 = vmatpush1.bf16.msra.mxu1 %v5165_v42  ;;  %v618_v62 = vld [vmem:[#allocation8 + $0xad0] sm:$0xff] }
 0x234   :  { %3804 = vmatprep.subr.bf16.mxu0 %v5172_v0  ;;  %3968 = vmatprep.subr.bf16.mxu1 %v5174_v36  ;;  %v622_v42 = vld [vmem:[#allocation8 + $0xaf0] sm:$0xff]  ;;  %v619_v0 = vld [vmem:[#allocation8 + $0xad8] sm:$0xff] }
 0x235   :  { %v623_v36 = vld [vmem:[#allocation8 + $0xaf8] sm:$0xff]  ;;  %v5228_v4 = vcombine.high %v618_v62, %v622_v42  ;;  %v5227_v56 = vcombine.low %v618_v62, %v622_v42 }
 0x236   :  { %v5230_v5 = vcombine.high %v619_v0, %v623_v36  ;;  %v5229_v9 = vcombine.low %v619_v0, %v623_v36 }
 0x237   :  { %3805 = vmatpush1.bf16.msra.mxu0 %v5171_v6  ;;  %3969 = vmatpush1.bf16.msra.mxu1 %v5173_v7  ;;  %v626_v6 = vld [vmem:[#allocation8 + $0xb10] sm:$0xff] }
 0x238   :  { %3806 = vmatprep.subr.bf16.mxu0 %v5180_v8  ;;  %3970 = vmatprep.subr.bf16.mxu1 %v5182_v57  ;;  %v630_v7 = vld [vmem:[#allocation8 + $0xb30] sm:$0xff]  ;;  %v627_v8 = vld [vmem:[#allocation8 + $0xb18] sm:$0xff] }
 0x239   :  { %v631_v57 = vld [vmem:[#allocation8 + $0xb38] sm:$0xff]  ;;  %v5236_v12 = vcombine.high %v626_v6, %v630_v7  ;;  %v5235_v19 = vcombine.low %v626_v6, %v630_v7 }
 0x23a   :  { %v5238_v13 = vcombine.high %v627_v8, %v631_v57  ;;  %v5237_v21 = vcombine.low %v627_v8, %v631_v57 }
 0x23b   :  { %3807 = vmatpush1.bf16.msra.mxu0 %v5179_v14  ;;  %3971 = vmatpush1.bf16.msra.mxu1 %v5181_v44  ;;  %v634_v14 = vld [vmem:[#allocation8 + $0xb50] sm:$0xff] }
 0x23c   :  { %3808 = vmatprep.subr.bf16.mxu0 %v5188_v63  ;;  %3972 = vmatprep.subr.bf16.mxu1 %v5190_v18  ;;  %v638_v44 = vld [vmem:[#allocation8 + $0xb70] sm:$0xff]  ;;  %v635_v63 = vld [vmem:[#allocation8 + $0xb58] sm:$0xff] }
 0x23d   :  { %v639_v18 = vld [vmem:[#allocation8 + $0xb78] sm:$0xff]  ;;  %v5244_v23 = vcombine.high %v634_v14, %v638_v44  ;;  %v5243_v33 = vcombine.low %v634_v14, %v638_v44 }
 0x23e   :  { %v5246_v27 = vcombine.high %v635_v63, %v639_v18  ;;  %v5245_v41 = vcombine.low %v635_v63, %v639_v18  ;;  %v690_v18 = vld [vmem:[#allocation8 + $0xd10] sm:$0xff] }
 0x23f   :  { %3809 = vmatpush1.bf16.msra.mxu0 %v5187_v28  ;;  %3973 = vmatpush1.bf16.msra.mxu1 %v5189_v30  ;;  %v642_v28 = vld [vmem:[#allocation8 + $0xb90] sm:$0xff] }
 0x240   :  { %3810 = vmatprep.subr.bf16.mxu0 %v5196_v31  ;;  %3974 = vmatprep.subr.bf16.mxu1 %v5198_v60  ;;  %v646_v30 = vld [vmem:[#allocation8 + $0xbb0] sm:$0xff]  ;;  %v643_v31 = vld [vmem:[#allocation8 + $0xb98] sm:$0xff] }
 0x241   :  { %v647_v60 = vld [vmem:[#allocation8 + $0xbb8] sm:$0xff]  ;;  %v5252_v34 = vcombine.high %v642_v28, %v646_v30  ;;  %v5251_v45 = vcombine.low %v642_v28, %v646_v30 }
 0x242   :  { %v5254_v38 = vcombine.high %v643_v31, %v647_v60  ;;  %v5253_v46 = vcombine.low %v643_v31, %v647_v60  ;;  %v698_v31 = vld [vmem:[#allocation8 + $0xd50] sm:$0xff] }
 0x243   :  { %3811 = vmatpush1.bf16.msra.mxu0 %v5195_v35  ;;  %3975 = vmatpush1.bf16.msra.mxu1 %v5197_v37  ;;  %v650_v35 = vld [vmem:[#allocation8 + $0xbd0] sm:$0xff] }
 0x244   :  { %3812 = vmatprep.subr.bf16.mxu0 %v5204_v40  ;;  %3976 = vmatprep.subr.bf16.mxu1 %v5206_v43  ;;  %v654_v37 = vld [vmem:[#allocation8 + $0xbf0] sm:$0xff]  ;;  %v651_v40 = vld [vmem:[#allocation8 + $0xbd8] sm:$0xff] }
 0x245   :  { %v655_v43 = vld [vmem:[#allocation8 + $0xbf8] sm:$0xff]  ;;  %v5260_v47 = vcombine.high %v650_v35, %v654_v37  ;;  %v5259_v52 = vcombine.low %v650_v35, %v654_v37  ;;  %v702_v60 = vld [vmem:[#allocation8 + $0xd70] sm:$0xff] }
 0x246   :  { %v5262_v25 = vcombine.high %v651_v40, %v655_v43  ;;  %v5261_v24 = vcombine.low %v651_v40, %v655_v43  ;;  %v5308_v35 = vcombine.high %v698_v31, %v702_v60  ;;  %v706_v40 = vld [vmem:[#allocation8 + $0xd90] sm:$0xff] }
 0x247   :  { %3813 = vmatpush1.bf16.msra.mxu0 %v5203_v22  ;;  %3977 = vmatpush1.bf16.msra.mxu1 %v5205_v48  ;;  %v658_v22 = vld [vmem:[#allocation8 + $0xc10] sm:$0xff] }
 0x248   :  { %3814 = vmatprep.subr.bf16.mxu0 %v5212_v1  ;;  %3978 = vmatprep.subr.bf16.mxu1 %v5214_v51  ;;  %v662_v48 = vld [vmem:[#allocation8 + $0xc30] sm:$0xff]  ;;  %v659_v1 = vld [vmem:[#allocation8 + $0xc18] sm:$0xff] }
 0x249   :  { %v663_v51 = vld [vmem:[#allocation8 + $0xc38] sm:$0xff]  ;;  %v5268_v20 = vcombine.high %v658_v22, %v662_v48  ;;  %v5267_v62 = vcombine.low %v658_v22, %v662_v48  ;;  %v710_v43 = vld [vmem:[#allocation8 + $0xdb0] sm:$0xff] }
 0x24a   :  { %v5270_v53 = vcombine.high %v659_v1, %v663_v51  ;;  %v5269_v42 = vcombine.low %v659_v1, %v663_v51  ;;  %v5316_v22 = vcombine.high %v706_v40, %v710_v43  ;;  %v714_v51 = vld [vmem:[#allocation8 + $0xdd0] sm:$0xff] }
 0x24b   :  { %3815 = vmatpush1.bf16.msra.mxu0 %v5211_v54  ;;  %3979 = vmatpush1.bf16.msra.mxu1 %v5213_v55  ;;  %v666_v54 = vld [vmem:[#allocation8 + $0xc50] sm:$0xff] }
 0x24c   :  { %3816 = vmatprep.subr.bf16.mxu0 %v5220_v58  ;;  %3980 = vmatprep.subr.bf16.mxu1 %v5222_v61  ;;  %v670_v55 = vld [vmem:[#allocation8 + $0xc70] sm:$0xff]  ;;  %v667_v58 = vld [vmem:[#allocation8 + $0xc58] sm:$0xff] }
 0x24d   :  { %v671_v61 = vld [vmem:[#allocation8 + $0xc78] sm:$0xff]  ;;  %v5276_v0 = vcombine.high %v666_v54, %v670_v55  ;;  %v5275_v6 = vcombine.low %v666_v54, %v670_v55 }
 0x24e   :  { %v5278_v36 = vcombine.high %v667_v58, %v671_v61  ;;  %v5277_v7 = vcombine.low %v667_v58, %v671_v61  ;;  %v719_v54 = vld [vmem:[#allocation8 + $0xdf8] sm:$0xff]  ;;  %v5315_v61 = vcombine.low %v706_v40, %v710_v43 }
 0x24f   :  { %3817 = vmatpush1.bf16.msra.mxu0 %v5219_v2  ;;  %3981 = vmatpush1.bf16.msra.mxu1 %v5221_v3  ;;  %v674_v2 = vld [vmem:[#allocation8 + $0xc90] sm:$0xff] }
 0x250   :  { %3818 = vmatprep.subr.bf16.mxu0 %v5228_v4  ;;  %3982 = vmatprep.subr.bf16.mxu1 %v5230_v5  ;;  %v678_v3 = vld [vmem:[#allocation8 + $0xcb0] sm:$0xff]  ;;  %v675_v4 = vld [vmem:[#allocation8 + $0xc98] sm:$0xff] }
 0x251   :  { %v679_v5 = vld [vmem:[#allocation8 + $0xcb8] sm:$0xff]  ;;  %v5284_v8 = vcombine.high %v674_v2, %v678_v3  ;;  %v5283_v14 = vcombine.low %v674_v2, %v678_v3 }
 0x252   :  { %v5286_v57 = vcombine.high %v675_v4, %v679_v5 }
 0x253   :  { %3819 = vmatpush1.bf16.msra.mxu0 %v5227_v56  ;;  %3983 = vmatpush1.bf16.msra.mxu1 %v5229_v9  ;;  %v682_v56 = vld [vmem:[#allocation8 + $0xcd0] sm:$0xff] }
 0x254   :  { %3820 = vmatprep.subr.bf16.mxu0 %v5236_v12  ;;  %3984 = vmatprep.subr.bf16.mxu1 %v5238_v13  ;;  %v686_v9 = vld [vmem:[#allocation8 + $0xcf0] sm:$0xff]  ;;  %v683_v12 = vld [vmem:[#allocation8 + $0xcd8] sm:$0xff] }
 0x255   :  { %v687_v13 = vld [vmem:[#allocation8 + $0xcf8] sm:$0xff]  ;;  %v5292_v44 = vcombine.high %v682_v56, %v686_v9 }
 0x256   :  { %v5294_v63 = vcombine.high %v683_v12, %v687_v13  ;;  %v5293_v28 = vcombine.low %v683_v12, %v687_v13  ;;  %v730_v12 = vld [vmem:[#allocation8 + $0xe50] sm:$0xff] }
 0x257   :  { %3821 = vmatpush1.bf16.msra.mxu0 %v5235_v19  ;;  %3985 = vmatpush1.bf16.msra.mxu1 %v5237_v21  ;;  %v694_v19 = vld [vmem:[#allocation8 + $0xd30] sm:$0xff]  ;;  %v691_v21 = vld [vmem:[#allocation8 + $0xd18] sm:$0xff] }
 0x258   :  { %3822 = vmatprep.subr.bf16.mxu0 %v5244_v23  ;;  %3986 = vmatprep.subr.bf16.mxu1 %v5246_v27  ;;  %v695_v23 = vld [vmem:[#allocation8 + $0xd38] sm:$0xff]  ;;  %v5291_v27 = vcombine.low %v682_v56, %v686_v9  ;;  %v5300_v30 = vcombine.high %v690_v18, %v694_v19  ;;  %v734_v13 = vld [vmem:[#allocation8 + $0xe70] sm:$0xff] }
 0x25b   :  { %3823 = vmatpush1.bf16.msra.mxu0 %v5243_v33  ;;  %3987 = vmatpush1.bf16.msra.mxu1 %v5245_v41  ;;  %v699_v33 = vld [vmem:[#allocation8 + $0xd58] sm:$0xff] }
 0x25c   :  { %3824 = vmatprep.subr.bf16.mxu0 %v5252_v34  ;;  %3988 = vmatprep.subr.bf16.mxu1 %v5254_v38  ;;  %v703_v41 = vld [vmem:[#allocation8 + $0xd78] sm:$0xff]  ;;  %v5299_v34 = vcombine.low %v690_v18, %v694_v19  ;;  %v5301_v38 = vcombine.low %v691_v21, %v695_v23  ;;  %v5340_v18 = vcombine.high %v730_v12, %v734_v13 }
 0x25d   :  { %v5310_v37 = vcombine.high %v699_v33, %v703_v41 }
 0x25f   :  { %3825 = vmatpush1.bf16.msra.mxu0 %v5251_v45  ;;  %3989 = vmatpush1.bf16.msra.mxu1 %v5253_v46  ;;  %v707_v45 = vld [vmem:[#allocation8 + $0xd98] sm:$0xff] }
 0x260   :  { %3826 = vmatprep.subr.bf16.mxu0 %v5260_v47  ;;  %3990 = vmatprep.subr.bf16.mxu1 %v5262_v25  ;;  %v711_v46 = vld [vmem:[#allocation8 + $0xdb8] sm:$0xff]  ;;  %v5307_v47 = vcombine.low %v698_v31, %v702_v60  ;;  %v5309_v25 = vcombine.low %v699_v33, %v703_v41  ;;  %v746_v33 = vld [vmem:[#allocation8 + $0xed0] sm:$0xff] }
 0x261   :  { %v5318_v1 = vcombine.high %v707_v45, %v711_v46  ;;  %v750_v41 = vld [vmem:[#allocation8 + $0xef0] sm:$0xff] }
 0x262   :  { %v5356_v40 = vcombine.high %v746_v33, %v750_v41 }
 0x263   :  { %3827 = vmatpush1.bf16.msra.mxu0 %v5259_v52  ;;  %3991 = vmatpush1.bf16.msra.mxu1 %v5261_v24  ;;  %v718_v52 = vld [vmem:[#allocation8 + $0xdf0] sm:$0xff] }
 0x264   :  { %3837 = vmatprep.subr.bf16.mxu0 %v5268_v20  ;;  %4001 = vmatprep.subr.bf16.mxu1 %v5270_v53  ;;  %v715_v53 = vld [vmem:[#allocation8 + $0xdd8] sm:$0xff] }
 0x265   :  { %v5326_v3 = vcombine.high %v715_v53, %v719_v54 }
 0x266   :  { %3829 = vmatmul.mubr.bf16.vlgmr.msra.gmra.mrb[4].mxu0 %v6240_v15  ;;  %3993 = vmatmul.mubr.bf16.vlgmr.msra.gmra.mrb[4].mxu1 %v6240_v15  ;;  %v5285_v15 = vcombine.low %v675_v4, %v679_v5  ;;  %v722_v4 = vld [vmem:[#allocation8 + $0xe10] sm:$0xff] }
 0x267   :  { %3838 = vmatpush1.bf16.msra.mxu0 %v5267_v62  ;;  %4002 = vmatpush1.bf16.msra.mxu1 %v5269_v42  ;;  %v726_v5 = vld [vmem:[#allocation8 + $0xe30] sm:$0xff] }
 0x268   :  { %3839 = vmatprep.subr.bf16.mxu0 %v5276_v0  ;;  %4003 = vmatprep.subr.bf16.mxu1 %v5278_v36  ;;  %v5317_v0 = vcombine.low %v707_v45, %v711_v46  ;;  %v5324_v36 = vcombine.high %v714_v51, %v718_v52  ;;  %v5332_v56 = vcombine.high %v722_v4, %v726_v5  ;;  %v754_v45 = vld [vmem:[#allocation8 + $0xf10] sm:$0xff] }
 0x269   :  { %3869 = vmatprep.mubr.bf16.mxu0 %v6242_v29  ;;  %4033 = vmatprep.mubr.bf16.mxu1 %v6242_v29  ;;  %v5302_v29 = vcombine.high %v691_v21, %v695_v23  ;;  %v738_v21 = vld [vmem:[#allocation8 + $0xe90] sm:$0xff] }
 0x26a   :  { %v742_v23 = vld [vmem:[#allocation8 + $0xeb0] sm:$0xff] }
 0x26b   :  { %3840 = vmatpush1.bf16.msra.mxu0 %v5275_v6  ;;  %4004 = vmatpush1.bf16.msra.mxu1 %v5277_v7  ;;  %v723_v6 = vld [vmem:[#allocation8 + $0xe18] sm:$0xff]  ;;  %v5348_v31 = vcombine.high %v738_v21, %v742_v23  ;;  %v758_v46 = vld [vmem:[#allocation8 + $0xf30] sm:$0xff] }
 0x26c   :  { %3841 = vmatprep.subr.bf16.mxu0 %v5284_v8  ;;  %4005 = vmatprep.subr.bf16.mxu1 %v5286_v57  ;;  %v727_v7 = vld [vmem:[#allocation8 + $0xe38] sm:$0xff]  ;;  %v5323_v8 = vcombine.low %v714_v51, %v718_v52  ;;  %v5325_v57 = vcombine.low %v715_v53, %v719_v54  ;;  %v5364_v51 = vcombine.high %v754_v45, %v758_v46  ;;  %v762_v53 = vld [vmem:[#allocation8 + $0xf50] sm:$0xff] }
 0x26d   :  { %v5334_v9 = vcombine.high %v723_v6, %v727_v7  ;;  %v766_v54 = vld [vmem:[#allocation8 + $0xf70] sm:$0xff] }
 0x26f   :  { %3842 = vmatpush1.bf16.msra.mxu0 %v5283_v14  ;;  %4006 = vmatpush1.bf16.msra.mxu1 %v5285_v15  ;;  %v731_v14 = vld [vmem:[#allocation8 + $0xe58] sm:$0xff] }
 0x270   :  { %3843 = vmatprep.subr.bf16.mxu0 %v5292_v44  ;;  %4007 = vmatprep.subr.bf16.mxu1 %v5294_v63  ;;  %v735_v15 = vld [vmem:[#allocation8 + $0xe78] sm:$0xff]  ;;  %v5331_v44 = vcombine.low %v722_v4, %v726_v5  ;;  %v5333_v63 = vcombine.low %v723_v6, %v727_v7  ;;  %v6282_v6 = vld [vmem:[#allocation10] sm:$0xff]  ;;  %v5371_v7 = vcombine.low %v762_v53, %v766_v54 }
 0x271   :  { %v5342_v19 = vcombine.high %v731_v14, %v735_v15  ;;  %v771_v4 = vld [vmem:[#allocation8 + $0xf98] sm:$0xff] }
 0x272   :  { %v775_v5 = vld [vmem:[#allocation8 + $0xfb8] sm:$0xff] }
 0x273   :  { %3844 = vmatpush1.bf16.msra.mxu0 %v5291_v27  ;;  %4008 = vmatpush1.bf16.msra.mxu1 %v5293_v28  ;;  %v739_v27 = vld [vmem:[#allocation8 + $0xe98] sm:$0xff] }
 0x274   :  { %3845 = vmatprep.subr.bf16.mxu0 %v5300_v30  ;;  %4009 = vmatprep.subr.bf16.mxu1 %v5302_v29  ;;  %v743_v28 = vld [vmem:[#allocation8 + $0xeb8] sm:$0xff]  ;;  %v5339_v30 = vcombine.low %v730_v12, %v734_v13  ;;  %v5341_v29 = vcombine.low %v731_v14, %v735_v15  ;;  %v782_v12 = vld [vmem:[#allocation8 + $0xff0] sm:$0xff]  ;;  %v793_v13 = vrot.slane %v6282_v6, %v6149_v50 }
 0x275   :  { %v5350_v60 = vcombine.high %v739_v27, %v743_v28  ;;  %v779_v14 = vld [vmem:[#allocation8 + $0xfd8] sm:$0xff] }
 0x276   :  { %v783_v15 = vld [vmem:[#allocation8 + $0xff8] sm:$0xff] }
 0x277   :  { %3846 = vmatpush1.bf16.msra.mxu0 %v5299_v34  ;;  %4010 = vmatpush1.bf16.msra.mxu1 %v5301_v38  ;;  %v747_v34 = vld [vmem:[#allocation8 + $0xed8] sm:$0xff]  ;;  %v5389_v50 = vcombine.low %v779_v14, %v783_v15 }
 0x278   :  { %3847 = vmatprep.subr.bf16.mxu0 %v5308_v35  ;;  %4011 = vmatprep.subr.bf16.mxu1 %v5310_v37  ;;  %v751_v38 = vld [vmem:[#allocation8 + $0xef8] sm:$0xff]  ;;  %v5347_v35 = vcombine.low %v738_v21, %v742_v23  ;;  %v5349_v37 = vcombine.low %v739_v27, %v743_v28  ;;  %v5390_v21 = vcombine.high %v779_v14, %v783_v15  ;;  %v5689_v14 = vld [vmem:[#allocation11 + $0x180] sm:$0xff]   ;;  %v5690_v15 = vld [vmem:[#allocation11 + $0x148] sm:$0xff]  }
 0x279   :  { %v6274_v48 = vpop.f32.mrb[0].mxu0  ;;  %v6276_v24 = vpop.f32.mrb[0].mxu1  ;;  %v5358_v43 = vcombine.high %v747_v34, %v751_v38 }
 0x27a   :  { %v6278_v20 = vpop.f32.mrb[1].mxu0  ;;  %v6280_v55 = vpop.f32.mrb[1].mxu1 }
 0x27b   :  { %v3547_v58 = vpop.f32.mrb[2].mxu0  ;;  %3848 = vmatpush1.bf16.msra.mxu0 %v5307_v47  ;;  %v3711_v62 = vpop.f32.mrb[2].mxu1  ;;  %4012 = vmatpush1.bf16.msra.mxu1 %v5309_v25  ;;  %v755_v47 = vld [vmem:[#allocation8 + $0xf18] sm:$0xff]  ;;  %v5583_v23 = vadd.f32 %v6278_v20, %v793_v13 }
 0x27c   :  { %v3548_v42 = vpop.f32.mrb[3].mxu0  ;;  %3849 = vmatprep.subr.bf16.mxu0 %v5316_v22  ;;  %v3712_v2 = vpop.f32.mrb[3].mxu1  ;;  %4013 = vmatprep.subr.bf16.mxu1 %v5318_v1  ;;  %v759_v25 = vld [vmem:[#allocation8 + $0xf38] sm:$0xff]  ;;  %v5355_v22 = vcombine.low %v746_v33, %v750_v41  ;;  %v5357_v1 = vcombine.low %v747_v34, %v751_v38  ;;  %v5363_v62 = vcombine.low %v754_v45, %v758_v46  ;;  %v5657_v33 = vld [vmem:[#allocation11 + $0x80] sm:$0xff]   ;;  %v5658_v41 = vld [vmem:[#allocation11 + $0x48] sm:$0xff]  }
 0x27d   :  { %v5366_v52 = vcombine.high %v755_v47, %v759_v25  ;;  %v763_v58 = vld [vmem:[#allocation8 + $0xf58] sm:$0xff]  ;;  %v5365_v42 = vcombine.low %v755_v47, %v759_v25  ;;  %v770_v2 = vld [vmem:[#allocation8 + $0xf90] sm:$0xff]  ;;  %v5666_v46 = vld [vmem:[#allocation11 + $0x58] sm:$0xff]  }
 0x27e   :  { %v5660_v38 = vld [vmem:[#allocation11 + $0x8] sm:$0xff]   ;;  %v5665_v45 = vld [vmem:[#allocation11 + $0x90] sm:$0xff]   ;;  %v5667_v47 = vld [vmem:[#allocation11 + $0xd8] sm:$0xff]  }
 0x27f   :  { %3850 = vmatpush1.bf16.msra.mxu0 %v5315_v61  ;;  %4014 = vmatpush1.bf16.msra.mxu1 %v5317_v0  ;;  %v767_v61 = vld [vmem:[#allocation8 + $0xf78] sm:$0xff]  ;;  %v5372_v0 = vcombine.high %v762_v53, %v766_v54  ;;  %v5669_v25 = vld [vmem:[#allocation11 + $0x98] sm:$0xff]   ;;  %v5674_v53 = vld [vmem:[#allocation11 + $0x68] sm:$0xff]  }
 0x280   :  { %3851 = vmatprep.subr.bf16.mxu0 %v5324_v36  ;;  %4015 = vmatprep.subr.bf16.mxu1 %v5326_v3  ;;  %v5374_v36 = vcombine.high %v763_v58, %v767_v61  ;;  %v774_v3 = vld [vmem:[#allocation8 + $0xfb0] sm:$0xff] }
 0x281   :  { %v5675_v54 = vld [vmem:[#allocation11 + $0xe8] sm:$0xff]  }
 0x283   :  { %3852 = vmatpush1.bf16.msra.mxu0 %v5323_v8  ;;  %4016 = vmatpush1.bf16.msra.mxu1 %v5325_v57  ;;  %v5373_v8 = vcombine.low %v763_v58, %v767_v61  ;;  %v5380_v57 = vcombine.high %v770_v2, %v774_v3  ;;  %v5676_v58 = vld [vmem:[#allocation11 + $0x28] sm:$0xff]   ;;  %v789_v61 = vrot.slane %v6282_v6, %v6167_v49  ;;  %v5683_v49 = vld [vmem:[#allocation11 + $0xf8] sm:$0xff]  }
 0x284   :  { %3853 = vmatprep.subr.bf16.mxu0 %v5332_v56  ;;  %4017 = vmatprep.subr.bf16.mxu1 %v5334_v9  ;;  %v5382_v56 = vcombine.high %v771_v4, %v775_v5  ;;  %v778_v9 = vld [vmem:[#allocation8 + $0xfd0] sm:$0xff] }
 0x285   :  { %v5387_v28 = vcombine.low %v778_v9, %v782_v12 }
 0x287   :  { %3854 = vmatpush1.bf16.msra.mxu0 %v5331_v44  ;;  %4018 = vmatpush1.bf16.msra.mxu1 %v5333_v63  ;;  %v801_v44 = vrot.slane %v6282_v6, %v6170_v59  ;;  %v5379_v63 = vcombine.low %v770_v2, %v774_v3  ;;  %v5655_v59 = vld [vmem:[#allocation11 + $0xc0] sm:$0xff]   ;;  %v5680_v2 = vld [vmem:[#allocation11 + $0x30] sm:$0xff]   ;;  %v5582_v3 = vadd.f32 %v6274_v48, %v789_v61 }
 0x288   :  { %3855 = vmatprep.subr.bf16.mxu0 %v5340_v18  ;;  %4019 = vmatprep.subr.bf16.mxu1 %v5342_v19  ;;  %v5381_v18 = vcombine.low %v771_v4, %v775_v5  ;;  %v5388_v19 = vcombine.high %v778_v9, %v782_v12  ;;  %v5681_v4 = vld [vmem:[#allocation11 + $0xb0] sm:$0xff]   ;;  %v5682_v5 = vld [vmem:[#allocation11 + $0x78] sm:$0xff]   ;;  %v5687_v12 = vld [vmem:[#allocation11 + $0x1c0] sm:$0xff]  }
 0x289   :  { %v5585_v27 = vadd.f32 %v6280_v55, %v801_v44  ;;  %v5659_v55 = vld [vmem:[#allocation11 + $0xc8] sm:$0xff]   ;;  %v5688_v48 = vld [vmem:[#allocation11 + $0x100] sm:$0xff]  }
 0x28a   :  { %v5691_v44 = vld [vmem:[#allocation11 + $0x1c8] sm:$0xff]  }
 0x28b   :  { %3856 = vmatpush1.bf16.msra.mxu0 %v5339_v30  ;;  %4020 = vmatpush1.bf16.msra.mxu1 %v5341_v29  ;;  %v5654_v30 = vld [vmem:[#allocation11 + $0x40] sm:$0xff]   ;;  %v4043_v29 = vmax.f32 %v5583_v23, 0.0  ;;  %v5696_v23 = vld [vmem:[#allocation11 + $0x110] sm:$0xff]  }
 0x28c   :  { %3857 = vmatprep.subr.bf16.mxu0 %v5348_v31  ;;  %4021 = vmatprep.subr.bf16.mxu1 %v5350_v60  ;;  %v4045_v31 = vmax.f32 %v5585_v27, 0.0  ;;  %v5656_v60 = vld [vmem:[#allocation11] sm:$0xff]   ;;  %v5697_v27 = vld [vmem:[#allocation11 + $0x190] sm:$0xff]  }
 0x28d   :  { %v4051_v20 = vpack.c.bf16 %v4043_v29, %v4043_v29  ;;  %v5702_v29 = vld [vmem:[#allocation11 + $0x160] sm:$0xff]  }
 0x28e   :  { %v4053_v34 = vpack.c.bf16 %v4045_v31, %v4045_v31  ;;  %v5703_v31 = vld [vmem:[#allocation11 + $0x1e0] sm:$0xff]  }
 0x28f   :  { %3858 = vmatpush1.bf16.msra.mxu0 %v5347_v35  ;;  %4022 = vmatpush1.bf16.msra.mxu1 %v5349_v37  ;;  %v5661_v35 = vld [vmem:[#allocation11 + $0x88] sm:$0xff]   ;;  %v5662_v37 = vld [vmem:[#allocation11 + $0x50] sm:$0xff]  }
 0x290   :  { %3859 = vmatprep.subr.bf16.mxu0 %v5356_v40  ;;  %4023 = vmatprep.subr.bf16.mxu1 %v5358_v43  ;;  %v5663_v40 = vld [vmem:[#allocation11 + $0xd0] sm:$0xff]  }
 0x291   :  { %v5664_v43 = vld [vmem:[#allocation11 + $0x10] sm:$0xff]  }
 0x293   :  { %3860 = vmatpush1.bf16.msra.mxu0 %v5355_v22  ;;  %4024 = vmatpush1.bf16.msra.mxu1 %v5357_v1  ;;  %v5670_v22 = vld [vmem:[#allocation11 + $0x60] sm:$0xff]  }
 0x294   :  { %3861 = vmatprep.subr.bf16.mxu0 %v5364_v51  ;;  %4025 = vmatprep.subr.bf16.mxu1 %v5366_v52  ;;  %v5671_v1 = vld [vmem:[#allocation11 + $0xe0] sm:$0xff]  }
 0x295   :  { %v5672_v51 = vld [vmem:[#allocation11 + $0x20] sm:$0xff]  }
 0x296   :  { %v5673_v52 = vld [vmem:[#allocation11 + $0xa0] sm:$0xff]  }
 0x297   :  { %3862 = vmatpush1.bf16.msra.mxu0 %v5363_v62  ;;  %4026 = vmatpush1.bf16.msra.mxu1 %v5365_v42  ;;  %v5677_v62 = vld [vmem:[#allocation11 + $0xa8] sm:$0xff]   ;;  %v5678_v42 = vld [vmem:[#allocation11 + $0x70] sm:$0xff]  }
 0x298   :  { %3863 = vmatprep.subr.bf16.mxu0 %v5372_v0  ;;  %4027 = vmatprep.subr.bf16.mxu1 %v5374_v36  ;;  %v797_v0 = vrot.slane %v6282_v6, %v6193_v26  ;;  %v5679_v36 = vld [vmem:[#allocation11 + $0xf0] sm:$0xff]   ;;  %v5685_v26 = vld [vmem:[#allocation11 + $0xb8] sm:$0xff]  }
 0x29b   :  { %3864 = vmatpush1.bf16.msra.mxu0 %v5371_v7  ;;  %4028 = vmatpush1.bf16.msra.mxu1 %v5373_v8  ;;  %v5584_v7 = vadd.f32 %v6276_v24, %v797_v0  ;;  %v5684_v8 = vld [vmem:[#allocation11 + $0x38] sm:$0xff]  }
 0x29c   :  { %3865 = vmatprep.subr.bf16.mxu0 %v5380_v57  ;;  %4029 = vmatprep.subr.bf16.mxu1 %v5382_v56  ;;  %v4042_v57 = vmax.f32 %v5582_v3, 0.0  ;;  %v5686_v56 = vld [vmem:[#allocation11 + $0x140] sm:$0xff]  }
 0x29d   :  { %v4044_v9 = vmax.f32 %v5584_v7, 0.0 }
 0x29e   :  { %v4050_v13 = vpack.c.bf16 %v4042_v57, %v4042_v57  ;;  %v5719_v57 = vld [vmem:[#allocation14 + $0x8] sm:$0xff]  }
 0x29f   :  { %3866 = vmatpush1.bf16.msra.mxu0 %v5379_v63  ;;  %4030 = vmatpush1.bf16.msra.mxu1 %v5381_v18  ;;  %v4052_v24 = vpack.c.bf16 %v4044_v9, %v4044_v9  ;;  %v5692_v63 = vld [vmem:[#allocation11 + $0x108] sm:$0xff]  }
 0x2a0   :  { %3867 = vmatprep.subr.bf16.mxu0 %v5388_v19  ;;  %4031 = vmatprep.subr.bf16.mxu1 %v5390_v21  ;;  %v5693_v18 = vld [vmem:[#allocation11 + $0x188] sm:$0xff]   ;;  %v5694_v19 = vld [vmem:[#allocation11 + $0x150] sm:$0xff]  }
 0x2a1   :  { %v5695_v21 = vld [vmem:[#allocation11 + $0x1d0] sm:$0xff]   ;;  %v5722_v9 = vld [vmem:[#allocation14 + $0x20] sm:$0xff]  }
 0x2a3   :  { %3868 = vmatpush1.bf16.msra.mxu0 %v5387_v28  ;;  %4032 = vmatpush1.bf16.msra.mxu1 %v5389_v50  ;;  %v5698_v28 = vld [vmem:[#allocation11 + $0x158] sm:$0xff]  }
 0x2a4   :  { %5465 = vmatprep.subr.bf16.mxu0 %v5654_v30  ;;  %5487 = vmatprep.subr.bf16.mxu1 %v5655_v59  ;;  %v5699_v50 = vld [vmem:[#allocation11 + $0x1d8] sm:$0xff]  }
 0x2a5   :  { %v5700_v30 = vld [vmem:[#allocation11 + $0x118] sm:$0xff]  }
 0x2a6   :  { %3870 = vmatmul.mubr.bf16.vlgmr.msra.gmra.mrb[4].mxu0 %v6256_v10  ;;  %4034 = vmatmul.mubr.bf16.vlgmr.msra.gmra.mrb[4].mxu1 %v6256_v10  ;;  %v5668_v10 = vld [vmem:[#allocation11 + $0x18] sm:$0xff]  }
 0x2a7   :  { %5466 = vmatpush3.bf16.msra.mxu0 %v5656_v60  ;;  %4609 = vmatprep.mubr.bf16.mxu0 %v4051_v20  ;;  %v5701_v59 = vld [vmem:[#allocation11 + $0x198] sm:$0xff]   ;;  %v5704_v60 = vld [vmem:[#allocation11 + $0x120] sm:$0xff]   ;;  %v5707_v20 = vld [vmem:[#allocation11 + $0x1e8] sm:$0xff]  }
 0x2a8   :  { %5488 = vmatpush3.bf16.msra.mxu1 %v5657_v33  ;;  %4649 = vmatprep.mubr.bf16.mxu1 %v4053_v34  ;;  %v5705_v33 = vld [vmem:[#allocation11 + $0x1a0] sm:$0xff]   ;;  %v5709_v34 = vld [vmem:[#allocation11 + $0x1a8] sm:$0xff]  }
 0x2a9   :  { %5467 = vmatprep.subr.bf16.mxu0 %v5658_v41  ;;  %5489 = vmatprep.subr.bf16.mxu1 %v5659_v55  ;;  %v5706_v41 = vld [vmem:[#allocation11 + $0x168] sm:$0xff]  }
 0x2aa   :  { %v5708_v55 = vld [vmem:[#allocation11 + $0x128] sm:$0xff]  }
 0x2ab   :  { %5468 = vmatpush3.bf16.msra.mxu0 %v5660_v38  ;;  %v5710_v38 = vld [vmem:[#allocation11 + $0x170] sm:$0xff]  }
 0x2ac   :  { %5490 = vmatpush3.bf16.msra.mxu1 %v5661_v35  ;;  %5469 = vmatprep.subr.bf16.mxu0 %v5662_v37  ;;  %v5711_v35 = vld [vmem:[#allocation11 + $0x1f0] sm:$0xff]  }
 0x2ad   :  { %5491 = vmatprep.subr.bf16.mxu1 %v5663_v40  ;;  %v5712_v37 = vld [vmem:[#allocation11 + $0x130] sm:$0xff]  }
 0x2ae   :  { %v5713_v40 = vld [vmem:[#allocation11 + $0x1b0] sm:$0xff]  }
 0x2af   :  { %5470 = vmatpush3.bf16.msra.mxu0 %v5664_v43  ;;  %v5714_v43 = vld [vmem:[#allocation11 + $0x178] sm:$0xff]  }
 0x2b0   :  { %5492 = vmatpush3.bf16.msra.mxu1 %v5665_v45  ;;  %5471 = vmatprep.subr.bf16.mxu0 %v5666_v46  ;;  %v5715_v45 = vld [vmem:[#allocation11 + $0x1f8] sm:$0xff]  }
 0x2b1   :  { %5493 = vmatprep.subr.bf16.mxu1 %v5667_v47  ;;  %v5716_v46 = vld [vmem:[#allocation11 + $0x138] sm:$0xff]  }
 0x2b2   :  { %v5717_v47 = vld [vmem:[#allocation11 + $0x1b8] sm:$0xff]  }
 0x2b3   :  { %5472 = vmatpush3.bf16.msra.mxu0 %v5668_v10  ;;  %v5977_v10 = vmov 0.0  }
 0x2b4   :  { %5494 = vmatpush3.bf16.msra.mxu1 %v5669_v25  ;;  %5473 = vmatprep.subr.bf16.mxu0 %v5670_v22  ;;  %v805_v25 = vrot.slane %v6282_v6, %v6219_v11  ;;  %v813_v22 = vrot.slane %v6282_v6, %v6249_v16 }
 0x2b5   :  { %5495 = vmatprep.subr.bf16.mxu1 %v5671_v1  ;;  %v809_v1 = vrot.slane %v6282_v6, %v6201_v39 }
 0x2b7   :  { %5474 = vmatpush3.bf16.msra.mxu0 %v5672_v51  ;;  %v817_v51 = vrot.slane %v6282_v6, %v6222_v17 }
 0x2b8   :  { %5496 = vmatpush3.bf16.msra.mxu1 %v5673_v52  ;;  %5475 = vmatprep.subr.bf16.mxu0 %v5674_v53 }
 0x2b9   :  { %5497 = vmatprep.subr.bf16.mxu1 %v5675_v54 }
 0x2bb   :  { %5476 = vmatpush3.bf16.msra.mxu0 %v5676_v58 }
 0x2bc   :  { %5498 = vmatpush3.bf16.msra.mxu1 %v5677_v62  ;;  %5477 = vmatprep.subr.bf16.mxu0 %v5678_v42 }
 0x2bd   :  { %5499 = vmatprep.subr.bf16.mxu1 %v5679_v36 }
 0x2bf   :  { %5478 = vmatpush3.bf16.msra.mxu0 %v5680_v2 }
 0x2c0   :  { %5500 = vmatpush3.bf16.msra.mxu1 %v5681_v4  ;;  %5479 = vmatprep.subr.bf16.mxu0 %v5682_v5 }
 0x2c1   :  { %5501 = vmatprep.subr.bf16.mxu1 %v5683_v49  ;;  %v5718_v49 = vld [vmem:[#allocation14] sm:$0xff]  }
 0x2c3   :  { %5480 = vmatpush3.bf16.msra.mxu0 %v5684_v8 }
 0x2c4   :  { %5502 = vmatpush3.bf16.msra.mxu1 %v5685_v26  ;;  %5509 = vmatprep.subr.bf16.mxu0 %v5686_v56  ;;  %v5720_v26 = vld [vmem:[#allocation14 + $0x10] sm:$0xff]   ;;  %v5721_v56 = vld [vmem:[#allocation14 + $0x18] sm:$0xff]  }
 0x2c5   :  { %5531 = vmatprep.subr.bf16.mxu1 %v5687_v12 }
 0x2c6   :  { %4610 = vmatmul.mubr.bf16.vlgmr.msra.gmra.mrb[8].mxu0 %v4050_v13  ;;  %v5391_v13 = vld [vmem:[#allocation13] ss:$0 sm:$0xff] }
 0x2c7   :  { %4650 = vmatmul.mubr.bf16.vlgmr.msra.gmra.mrb[8].mxu1 %v4052_v24  ;;  %5510 = vmatpush3.bf16.msra.mxu0 %v5688_v48 }
 0x2c8   :  { %5532 = vmatpush3.bf16.msra.mxu1 %v5689_v14  ;;  %5511 = vmatprep.subr.bf16.mxu0 %v5690_v15 }
 0x2c9   :  { %5533 = vmatprep.subr.bf16.mxu1 %v5691_v44 }
 0x2cb   :  { %5512 = vmatpush3.bf16.msra.mxu0 %v5692_v63 }
 0x2cc   :  { %5534 = vmatpush3.bf16.msra.mxu1 %v5693_v18  ;;  %5513 = vmatprep.subr.bf16.mxu0 %v5694_v19 }
 0x2cd   :  { %5535 = vmatprep.subr.bf16.mxu1 %v5695_v21 }
 0x2cf   :  { %5514 = vmatpush3.bf16.msra.mxu0 %v5696_v23 }
 0x2d0   :  { %5536 = vmatpush3.bf16.msra.mxu1 %v5697_v27  ;;  %5515 = vmatprep.subr.bf16.mxu0 %v5698_v28  ;;  %v5723_v28 = vld [vmem:[#allocation14 + $0x28] sm:$0xff]  }
 0x2d1   :  { %5537 = vmatprep.subr.bf16.mxu1 %v5699_v50  ;;  %v5724_v50 = vld [vmem:[#allocation14 + $0x30] sm:$0xff]  }
 0x2d3   :  { %5516 = vmatpush3.bf16.msra.mxu0 %v5700_v30  ;;  %v5725_v30 = vld [vmem:[#allocation14 + $0x38] sm:$0xff]  }
 0x2d4   :  { %5538 = vmatpush3.bf16.msra.mxu1 %v5701_v59  ;;  %5517 = vmatprep.subr.bf16.mxu0 %v5702_v29 }
 0x2d5   :  { %5539 = vmatprep.subr.bf16.mxu1 %v5703_v31 }
 0x2d7   :  { %5518 = vmatpush3.bf16.msra.mxu0 %v5704_v60 }
 0x2d8   :  { %5540 = vmatpush3.bf16.msra.mxu1 %v5705_v33  ;;  %5519 = vmatprep.subr.bf16.mxu0 %v5706_v41 }
 0x2d9   :  { %5541 = vmatprep.subr.bf16.mxu1 %v5707_v20 }
 0x2db   :  { %5520 = vmatpush3.bf16.msra.mxu0 %v5708_v55 }
 0x2dc   :  { %5542 = vmatpush3.bf16.msra.mxu1 %v5709_v34  ;;  %5521 = vmatprep.subr.bf16.mxu0 %v5710_v38 }
 0x2dd   :  { %5543 = vmatprep.subr.bf16.mxu1 %v5711_v35 }
 0x2df   :  { %5522 = vmatpush3.bf16.msra.mxu0 %v5712_v37 }
 0x2e0   :  { %5544 = vmatpush3.bf16.msra.mxu1 %v5713_v40  ;;  %5523 = vmatprep.subr.bf16.mxu0 %v5714_v43 }
 0x2e1   :  { %5545 = vmatprep.subr.bf16.mxu1 %v5715_v45  ;;  %v5456_v45 = vld [vmem:[#allocation16] ss:$0 sm:$0xff] }
 0x2e3   :  { %5524 = vmatpush3.bf16.msra.mxu0 %v5716_v46 }
 0x2e4   :  { %5546 = vmatpush3.bf16.msra.mxu1 %v5717_v47  ;;  %5562 = vmatprep.subr.bf16.mxu0 %v5977_v10 }
 0x379   :  { %v3871_v52 = vpop.f32.mrb[4].mxu0  ;;  %v4035_v54 = vpop.f32.mrb[4].mxu1 }
 0x37a   :  { %v5586_v53 = vadd.f32 %v3871_v52, %v805_v25  ;;  %v3873_v58 = vpop.f32.mrb[5].mxu0  ;;  %v5588_v61 = vadd.f32 %v4035_v54, %v813_v22  ;;  %v4037_v42 = vpop.f32.mrb[5].mxu1  ;;  %v4856_v54 = vand.u32 127, %v158_v32 }
 0x37b   :  { %v5587_v62 = vadd.f32 %v3873_v58, %v809_v1  ;;  %v3875_v0 = vpop.f32.mrb[6].mxu0  ;;  %v5589_v2 = vadd.f32 %v4037_v42, %v817_v51  ;;  %v4039_v11 = vpop.f32.mrb[6].mxu1 }
 0x37c   :  { %v4046_v36 = vmax.f32 %v5586_v53, 0.0  ;;  %v3876_v3 = vpop.f32.mrb[7].mxu0  ;;  %v4048_v4 = vmax.f32 %v5588_v61, 0.0  ;;  %v4040_v5 = vpop.f32.mrb[7].mxu1  ;;  %vm4857_vm1 = vcmp.eq.s32.totalorder %v4856_v54, 1 }
 0x37d   :  { %v4047_v16 = vmax.f32 %v5587_v62, 0.0  ;;  %v4049_v7 = vmax.f32 %v5589_v2, 0.0 }
 0x37e   :  { %v4054_v8 = vpack.c.bf16 %v4046_v36, %v4046_v36  ;;  %v4056_v6 = vpack.c.bf16 %v4048_v4, %v4048_v4 }
 0x37f   :  { %v4055_v39 = vpack.c.bf16 %v4047_v16, %v4047_v16  ;;  %v4057_v17 = vpack.c.bf16 %v4049_v7, %v4049_v7 }
 0x381   :  { %4689 = vmatprep.mubr.bf16.mxu0 %v4055_v39  ;;  %4729 = vmatprep.mubr.bf16.mxu1 %v4057_v17 }
 0x382   :  { %4690 = vmatmul.mubr.bf16.vlgmr.msra.gmra.mrb[12].mxu0 %v4054_v8  ;;  %4730 = vmatmul.mubr.bf16.vlgmr.msra.gmra.mrb[12].mxu1 %v4056_v6 }
 0x383   :  { %5563 = vmatpush3.bf16.msra.mxu0 %v5718_v49  ;;  %5578 = vmatprep.mubr.msk.bf16.mxu0 %vm5978_vm0, %v5977_v10 }
 0x384   :  { %5564 = vmatprep.subr.bf16.mxu0 %v5977_v10 }
 0x387   :  { %5565 = vmatpush3.bf16.msra.mxu0 %v5719_v57 }
 0x388   :  { %5566 = vmatprep.subr.bf16.mxu0 %v5977_v10 }
 0x38b   :  { %5567 = vmatpush3.bf16.msra.mxu0 %v5720_v26 }
 0x38c   :  { %5568 = vmatprep.subr.bf16.mxu0 %v5977_v10 }
 0x38f   :  { %5569 = vmatpush3.bf16.msra.mxu0 %v5721_v56 }
 0x390   :  { %5570 = vmatprep.subr.bf16.mxu0 %v5977_v10 }
 0x393   :  { %5571 = vmatpush3.bf16.msra.mxu0 %v5722_v9 }
 0x394   :  { %5572 = vmatprep.subr.bf16.mxu0 %v5977_v10 }
 0x397   :  { %5573 = vmatpush3.bf16.msra.mxu0 %v5723_v28 }
 0x398   :  { %5574 = vmatprep.subr.bf16.mxu0 %v5977_v10 }
 0x399   :  { %v5481_v12 = vpop.f32.mrb[8].mxu0 }
 0x39a   :  { %v5503_v48 = vpop.f32.mrb[8].mxu1  ;;  %v5482_v14 = vpop.f32.mrb[9].mxu0 }
 0x39b   :  { %v5483_v15 = vadd.f32 %v5482_v14, %v5481_v12  ;;  %v5504_v24 = vpop.f32.mrb[9].mxu1  ;;  %v5484_v44 = vpop.f32.mrb[10].mxu0  ;;  %5575 = vmatpush3.bf16.msra.mxu0 %v5724_v50 }
 0x39c   :  { %v5505_v63 = vadd.f32 %v5504_v24, %v5503_v48  ;;  %v5506_v18 = vpop.f32.mrb[10].mxu1  ;;  %v5485_v19 = vpop.f32.mrb[11].mxu0  ;;  %5576 = vmatprep.subr.bf16.mxu0 %v5977_v10 }
 0x39d   :  { %v4612_v21 = vadd.f32 %v5483_v15, %v5391_v13  ;;  %v5507_v23 = vpop.f32.mrb[11].mxu1 }
 0x39f   :  { %v4652_v27 = vadd.f32 %v5505_v63, %v4612_v21  ;;  %5577 = vmatpush3.bf16.msra.mxu0 %v5725_v30 }
 0x455   :  { %v5525_v59 = vpop.f32.mrb[12].mxu0  ;;  %v5547_v29 = vpop.f32.mrb[12].mxu1 }
 0x456   :  { %v5526_v31 = vpop.f32.mrb[13].mxu0  ;;  %v5548_v33 = vpop.f32.mrb[13].mxu1 }
 0x457   :  { %v5527_v60 = vadd.f32 %v5526_v31, %v5525_v59  ;;  %v5528_v41 = vpop.f32.mrb[14].mxu0  ;;  %v5549_v20 = vadd.f32 %v5548_v33, %v5547_v29  ;;  %v5550_v55 = vpop.f32.mrb[14].mxu1 }
 0x458   :  { %v5529_v34 = vpop.f32.mrb[15].mxu0  ;;  %v5551_v35 = vpop.f32.mrb[15].mxu1 }
 0x459   :  { %v4692_v38 = vadd.f32 %v5527_v60, %v4652_v27 }
 0x45b   :  { %v4732_v37 = vadd.f32 %v5549_v20, %v4692_v38 }
 0x45d   :  { %v4737_v40 = vmax.f32 %v4732_v37, 0.0 }
 0x45f   :  { %v4738_v43 = vpack.c.bf16 %v4737_v40, %v4737_v40 }
 0x461   :  { %5579 = vmatmul.mubr.bf16.vlgmr.msra.gmra.mrb[16].mxu0 %v4738_v43 }
 0x534   :  { %v4844_v46 = vpop.f32.mrb[16].mxu0 }
 0x535   :  { %v4845_v47 = vadd.f32 %v5456_v45, %v4844_v46  ;;  %v5580_v25 = vpop.f32.mrb[17].mxu0 }
 0x536   :  { %v4847_v10 = vpop.f32.mrb[18].mxu0 }
 0x537   :  { %v4850_v22 = vsub.f32 0.0, %v4845_v47  ;;  %v5581_v1 = vpop.f32.mrb[19].mxu0 }
 0x539   :  { %v4851_v51 = vmul.f32 1.442695, %v4850_v22 }
 0x53b   :  { %5726 = vpow2.f32 %v4851_v51 }
 0x545   :  { %v5727_v52 = vpop.eup %5726 }
 0x546   :  { %v4853_v53 = vadd.f32 1.0, %v5727_v52 }
 0x548   :  { %5728 = vrcp.f32 %v4853_v53 }
 0x552   :  { %v5729_v58 = vpop.eup %5728 }
 0x553   :  { %v4858_v61 = vsel %vm4857_vm1, %v5729_v58, %v4845_v47 }
 0x554   :  { %4859 = vst [vmem:[#allocation17] sm:$0xff] %v4858_v61 }
 0x555   :  { %5941 = shalt.err (!%p5938_p6)
}
 0x556   :  { %s5942_s7 = scalar_lea.hbm %s6337_s9, 128 }
 0x557   :  { %p5943_p7 = scmp.ne.s32.totalorder %s6337_s9, %s5942_s7  ;;  %p5946_p8 = scmp.lt.u32.totalorder %s5942_s7, %s6337_s9 }
 0x559   :  { %p5948_p9 = pnand %p5946_p8, %p5943_p7 }
 0x55b   :  { %5951 = shalt.err (!%p5948_p9)
}
 0x55c   :  { %4869 = dma.vmem_to_hbm [thread:$0]  %s4867_s23, 128, %s6337_s9, [#allocation4]  }
 0x55d   :  { %5962 = dma.done.wait [#allocation4], 128  }
 0x55e   :  { %5963 = vsyncadd [#allocation4], 4294967168 }
 0x55f   :  { %4873 = vsyncpa [#allocation3], 1 }
 0x560   :  { %4874 = vsyncpa [#allocation6], 1 }
 0x561   :  { %4875 = vsyncpa [#allocation9], 1 }
 0x562   :  { %4876 = vsyncpa [#allocation12], 1 }
 0x563   :  { %4877 = vsyncpa [#allocation15], 1 }
 0x564   :  { %4878 = vsyncpa [#allocation4], 1 }

</bundles_post_ra>
